<compile_context>
chip_gen: v7x
topology: tpu7x:2x2x1
jax: 0.10.0
libtpu: 0.0.40
codegen_flags: <defaults>
</compile_context>

<pallas_src>
import jax
import jax.numpy as jnp
import numpy as np
from jax.experimental import pallas as pl
from jax.experimental.pallas import tpu as pltpu

N_FEATURES = 100
N_OUT = 28 * 28                 # 784
HIDDEN = (256, 512, 1024)
OUT_PAD = 896                   # 784 -> 7*128: lane-dense output store

INT8_BATCH_MAX = 256            # b_pad <= this -> weight-DMA bound -> int8 W3/W4


def _round_up(n, m):
    return ((n + m - 1) // m) * m


def _plan(batch):
    """Pick (batch_tile, padded_batch, use_int8_weights) for a batch size."""
    if batch <= 128:
        tb = _round_up(batch, 8)          # single full-extent block
    else:
        tb, best = 128, _round_up(batch, 128)
        for cand in range(128, 31, -16):  # multiples of 16; prefer larger tiles
            pad = _round_up(batch, cand)
            if pad < best:
                tb, best = cand, pad
    b_pad = _round_up(batch, tb)
    return tb, b_pad, b_pad <= INT8_BATCH_MAX


def _leaky_relu(x, slope=0.2):
    return jnp.where(x > 0, x, slope * x)


def generator_kernel(x_ref,
                     w1_ref, b1_ref,
                     w2_ref, b2_ref,
                     w3_ref, s3_ref, b3_ref,
                     w4_ref, s4_ref, b4_ref,
                     o_ref):
    # Layer 1: Linear(100 -> 256) + LeakyReLU (bf16 MXU, f32 accumulate).
    x = x_ref[...].astype(jnp.bfloat16)
    h = jnp.dot(x, w1_ref[...], preferred_element_type=jnp.float32)
    h = _leaky_relu(h + b1_ref[...]).astype(jnp.bfloat16)
    # Layer 2: Linear(256 -> 512) + LeakyReLU.
    h = jnp.dot(h, w2_ref[...], preferred_element_type=jnp.float32)
    h = _leaky_relu(h + b2_ref[...]).astype(jnp.bfloat16)
    # Layer 3: Linear(512 -> 1024) + LeakyReLU.  w3 is either int8 (per-output-
    # channel scale applied post-dot in f32) or bf16 (scale == 1).
    w3 = w3_ref[...].astype(jnp.bfloat16)
    h = jnp.dot(h, w3, preferred_element_type=jnp.float32)
    h = _leaky_relu(h * s3_ref[...] + b3_ref[...]).astype(jnp.bfloat16)
    # Layer 4: Linear(1024 -> 896 [=784 padded]) + Tanh; bf16 lane-dense store.
    w4 = w4_ref[...].astype(jnp.bfloat16)
    h = jnp.dot(h, w4, preferred_element_type=jnp.float32)
    o_ref[...] = jnp.tanh(h * s4_ref[...] + b4_ref[...]).astype(jnp.bfloat16)


def generator_forward_padded(x, packed):
    """(B, 100) f32 -> (b_pad, 896) bf16.  Padded rows/cols to be sliced off."""
    batch = x.shape[0]
    tb, b_pad, use_int8 = _plan(batch)

    if b_pad != batch:                      # batch-pad only when needed (cheap)
        x = jnp.zeros((b_pad, N_FEATURES), x.dtype).at[:batch].set(x)

    w1, b1 = packed["w1"], packed["b1"]
    w2, b2 = packed["w2"], packed["b2"]
    b3, b4 = packed["b3"], packed["b4"]
    if use_int8:
        w3, s3 = packed["w3_i8"], packed["s3"]
        w4, s4 = packed["w4_i8"], packed["s4"]
    else:
        w3, s3 = packed["w3_bf16"], packed["ones3"]
        w4, s4 = packed["w4_bf16"], packed["ones4"]

    const = lambda i: (0, 0)        # weights/biases: VMEM-resident across tiles
    row = lambda i: (i, 0)          # activations: tiled along batch

    operands = (x, w1, b1, w2, b2, w3, s3, b3, w4, s4, b4)
    w_flops = (N_FEATURES * HIDDEN[0] + HIDDEN[0] * HIDDEN[1]
               + HIDDEN[1] * HIDDEN[2] + HIDDEN[2] * OUT_PAD)
    bytes_accessed = sum(int(np.prod(a.shape)) * a.dtype.itemsize for a in operands)
    bytes_accessed += b_pad * OUT_PAD * 2   # bf16 output writeback
    cost = pl.CostEstimate(flops=2 * b_pad * w_flops,
                           transcendentals=b_pad * OUT_PAD,
                           bytes_accessed=bytes_accessed)

    return pl.pallas_call(
        generator_kernel,
        out_shape=jax.ShapeDtypeStruct((b_pad, OUT_PAD), jnp.bfloat16),
        grid_spec=pltpu.PrefetchScalarGridSpec(
            num_scalar_prefetch=0,
            grid=(b_pad // tb,),
            in_specs=[
                pl.BlockSpec((tb, N_FEATURES), row),
                pl.BlockSpec((N_FEATURES, HIDDEN[0]), const),
                pl.BlockSpec((1, HIDDEN[0]), const),
                pl.BlockSpec((HIDDEN[0], HIDDEN[1]), const),
                pl.BlockSpec((1, HIDDEN[1]), const),
                pl.BlockSpec((HIDDEN[1], HIDDEN[2]), const),
                pl.BlockSpec((1, HIDDEN[2]), const),
                pl.BlockSpec((1, HIDDEN[2]), const),
                pl.BlockSpec((HIDDEN[2], OUT_PAD), const),
                pl.BlockSpec((1, OUT_PAD), const),
                pl.BlockSpec((1, OUT_PAD), const),
            ],
            out_specs=pl.BlockSpec((tb, OUT_PAD), row),
        ),
        compiler_params=pltpu.CompilerParams(
            dimension_semantics=("parallel",),
            vmem_limit_bytes=32 << 20,
        ),
        cost_estimate=cost,
    )(*operands)


@jax.jit
def generator_forward(x, packed):
    """Module-equivalent API: (B, 100) f32 -> (B, 784) f32."""
    out = generator_forward_padded(x, packed)
    return out[:x.shape[0], :N_OUT].astype(jnp.float32)


def init_params(key):
    """torch.nn.Linear default init: U[-1/sqrt(fan_in), +1/sqrt(fan_in)].

    Weights stored (in, out) (transpose of PyTorch's (out, in)); biases (1, out).
    """
    dims = (N_FEATURES,) + HIDDEN + (N_OUT,)
    params = []
    for i in range(4):
        fan_in, fan_out = dims[i], dims[i + 1]
        key, kw, kb = jax.random.split(key, 3)
        bound = 1.0 / np.sqrt(fan_in)
        w = jax.random.uniform(kw, (fan_in, fan_out), jnp.float32, -bound, bound)
        b = jax.random.uniform(kb, (1, fan_out), jnp.float32, -bound, bound)
        params.append((w, b))
    return params


def pack_params(params):
    """Kernel layout: bf16 W1/W2; W3/W4 in both int8(+per-channel scale) and bf16;
    layer-4 output padded 784 -> 896 (zero cols -> tanh(0)=0, sliced off)."""
    (w1, b1), (w2, b2), (w3, b3), (w4, b4) = params
    w4p = jnp.zeros((HIDDEN[2], OUT_PAD), jnp.float32).at[:, :N_OUT].set(w4)
    b4p = jnp.zeros((1, OUT_PAD), jnp.float32).at[:, :N_OUT].set(b4)

    def quant_i8(w):
        s = jnp.maximum(jnp.max(jnp.abs(w), axis=0, keepdims=True) / 127.0, 1e-12)
        wq = jnp.clip(jnp.round(w / s), -127.0, 127.0).astype(jnp.int8)
        return wq, s.astype(jnp.float32)

    w3q, s3 = quant_i8(w3)
    w4q, s4 = quant_i8(w4p)
    return {
        "w1": w1.astype(jnp.bfloat16), "b1": b1,
        "w2": w2.astype(jnp.bfloat16), "b2": b2,
        "b3": b3, "b4": b4p,
        "w3_i8": w3q, "s3": s3,
        "w4_i8": w4q, "s4": s4,
        "w3_bf16": w3.astype(jnp.bfloat16), "ones3": jnp.ones_like(s3),
        "w4_bf16": w4p.astype(jnp.bfloat16), "ones4": jnp.ones_like(s4),
    }


def reference_forward(x, packed, use_int8):
    """Pure-JAX f32 reference using the same quantized weights as the kernel."""
    w1 = packed["w1"].astype(jnp.float32)
    w2 = packed["w2"].astype(jnp.float32)
    if use_int8:
        w3 = packed["w3_i8"].astype(jnp.float32) * packed["s3"]
        w4 = packed["w4_i8"].astype(jnp.float32) * packed["s4"]
    else:
        w3 = packed["w3_bf16"].astype(jnp.float32)
        w4 = packed["w4_bf16"].astype(jnp.float32)
    b1, b2, b3, b4 = packed["b1"], packed["b2"], packed["b3"], packed["b4"]

    h = x.astype(jnp.bfloat16).astype(jnp.float32)
    for w, b in ((w1, b1), (w2, b2), (w3, b3)):
        h = h @ w + b
        h = jnp.where(h > 0, h, 0.2 * h)
    h = jnp.tanh(h @ w4 + b4)
    return h[:, :N_OUT]


if __name__ == "__main__":
    key = jax.random.PRNGKey(0)
    key, kparams = jax.random.split(key)
    params = init_params(kparams)
    packed = pack_params(params)

    kx = key
    # B=2/8: int8 weight path (single tile).  B=300: adaptive tile (tb=80, 4
    # steps).  B=512: bf16 path, tb=128 -> 4 grid steps (2 per TC on v7x).
    for batch in (2, 8, 300, 512):
        kx, kcur = jax.random.split(kx)
        x = jax.random.normal(kcur, (batch, N_FEATURES), jnp.float32)   # latent z
        out = jax.block_until_ready(generator_forward(x, packed))
        assert out.shape == (batch, N_OUT), out.shape
        _, _, use_int8 = _plan(batch)
        ref = reference_forward(x, packed, use_int8)
        # bf16 activations + bf16 output store inside the kernel -> relaxed tol.
        np.testing.assert_allclose(np.asarray(out), np.asarray(ref),
                                   rtol=2e-2, atol=2.5e-2)

    print("KERNEL_OK")
</pallas_src>

<mosaic_0001>
module attributes {stable_mosaic.version = 11 : i64} {
  func.func @generator_kernel(%arg0: i32, %arg1: memref<8x100xf32, #tpu.memory_space<vmem>>, %arg2: memref<100x256xbf16, #tpu.memory_space<vmem>>, %arg3: memref<1x256xf32, #tpu.memory_space<vmem>>, %arg4: memref<256x512xbf16, #tpu.memory_space<vmem>>, %arg5: memref<1x512xf32, #tpu.memory_space<vmem>>, %arg6: memref<512x1024xi8, #tpu.memory_space<vmem>>, %arg7: memref<1x1024xf32, #tpu.memory_space<vmem>>, %arg8: memref<1x1024xf32, #tpu.memory_space<vmem>>, %arg9: memref<1024x896xi8, #tpu.memory_space<vmem>>, %arg10: memref<1x896xf32, #tpu.memory_space<vmem>>, %arg11: memref<1x896xf32, #tpu.memory_space<vmem>>, %arg12: memref<8x896xbf16, #tpu.memory_space<vmem>>) attributes {dimension_semantics = [#tpu.dimension_semantics<parallel>], iteration_bounds = array<i64: 1>, scalar_prefetch = 0 : i64, scratch_operands = 0 : i64, tpu.core_type = #tpu.core_type<tc>, window_params = [{transform_indices = @transform_0, window_bounds = array<i64: 8, 100>}, {pipeline_mode = #tpu.pipeline_mode<synchronous>, transform_indices = @transform_1, window_bounds = array<i64: 100, 256>}, {pipeline_mode = #tpu.pipeline_mode<synchronous>, transform_indices = @transform_2, window_bounds = array<i64: 1, 256>}, {pipeline_mode = #tpu.pipeline_mode<synchronous>, transform_indices = @transform_3, window_bounds = array<i64: 256, 512>}, {pipeline_mode = #tpu.pipeline_mode<synchronous>, transform_indices = @transform_4, window_bounds = array<i64: 1, 512>}, {pipeline_mode = #tpu.pipeline_mode<synchronous>, transform_indices = @transform_5, window_bounds = array<i64: 512, 1024>}, {pipeline_mode = #tpu.pipeline_mode<synchronous>, transform_indices = @transform_6, window_bounds = array<i64: 1, 1024>}, {pipeline_mode = #tpu.pipeline_mode<synchronous>, transform_indices = @transform_7, window_bounds = array<i64: 1, 1024>}, {pipeline_mode = #tpu.pipeline_mode<synchronous>, transform_indices = @transform_8, window_bounds = array<i64: 1024, 896>}, {pipeline_mode = #tpu.pipeline_mode<synchronous>, transform_indices = @transform_9, window_bounds = array<i64: 1, 896>}, {pipeline_mode = #tpu.pipeline_mode<synchronous>, transform_indices = @transform_10, window_bounds = array<i64: 1, 896>}, {transform_indices = @transform_11, window_bounds = array<i64: 8, 896>}]} {
    %c0 = arith.constant 0 : index
    %c0_0 = arith.constant 0 : index
    %0 = vector.load %arg1[%c0, %c0_0] : memref<8x100xf32, #tpu.memory_space<vmem>>, vector<8x100xf32>
    %1 = arith.truncf %0 : vector<8x100xf32> to vector<8x100xbf16>
    %c0_1 = arith.constant 0 : index
    %c0_2 = arith.constant 0 : index
    %2 = vector.load %arg2[%c0_1, %c0_2] : memref<100x256xbf16, #tpu.memory_space<vmem>>, vector<100x256xbf16>
    %cst = arith.constant dense<0.000000e+00> : vector<8x256xf32>
    %3 = tpu.matmul %1, %2, %cst {dimension_numbers = #tpu.dot_dimension_numbers<[1], [0], [0], [1], [0, 0, 1, 1], [], []>} : vector<8x100xbf16>, vector<100x256xbf16>, vector<8x256xf32> -> vector<8x256xf32>
    %c0_3 = arith.constant 0 : index
    %c0_4 = arith.constant 0 : index
    %4 = vector.load %arg3[%c0_3, %c0_4] : memref<1x256xf32, #tpu.memory_space<vmem>>, vector<1x256xf32>
    %5 = vector.broadcast %4 : vector<1x256xf32> to vector<8x256xf32>
    %6 = arith.addf %3, %5 : vector<8x256xf32>
    %cst_5 = arith.constant 0.000000e+00 : f32
    %7 = vector.broadcast %cst_5 : f32 to vector<8x256xf32>
    %8 = arith.cmpf ogt, %6, %7 : vector<8x256xf32>
    %cst_6 = arith.constant 2.000000e-01 : f32
    %9 = vector.broadcast %cst_6 : f32 to vector<8x256xf32>
    %10 = arith.mulf %9, %6 : vector<8x256xf32>
    %11 = arith.select %8, %6, %10 : vector<8x256xi1>, vector<8x256xf32>
    %12 = arith.truncf %11 : vector<8x256xf32> to vector<8x256xbf16>
    %c0_7 = arith.constant 0 : index
    %c0_8 = arith.constant 0 : index
    %13 = vector.load %arg4[%c0_7, %c0_8] : memref<256x512xbf16, #tpu.memory_space<vmem>>, vector<256x512xbf16>
    %cst_9 = arith.constant dense<0.000000e+00> : vector<8x512xf32>
    %14 = tpu.matmul %12, %13, %cst_9 {dimension_numbers = #tpu.dot_dimension_numbers<[1], [0], [0], [1], [0, 0, 1, 1], [], []>} : vector<8x256xbf16>, vector<256x512xbf16>, vector<8x512xf32> -> vector<8x512xf32>
    %c0_10 = arith.constant 0 : index
    %c0_11 = arith.constant 0 : index
    %15 = vector.load %arg5[%c0_10, %c0_11] : memref<1x512xf32, #tpu.memory_space<vmem>>, vector<1x512xf32>
    %16 = vector.broadcast %15 : vector<1x512xf32> to vector<8x512xf32>
    %17 = arith.addf %14, %16 : vector<8x512xf32>
    %cst_12 = arith.constant 0.000000e+00 : f32
    %18 = vector.broadcast %cst_12 : f32 to vector<8x512xf32>
    %19 = arith.cmpf ogt, %17, %18 : vector<8x512xf32>
    %cst_13 = arith.constant 2.000000e-01 : f32
    %20 = vector.broadcast %cst_13 : f32 to vector<8x512xf32>
    %21 = arith.mulf %20, %17 : vector<8x512xf32>
    %22 = arith.select %19, %17, %21 : vector<8x512xi1>, vector<8x512xf32>
    %23 = arith.truncf %22 : vector<8x512xf32> to vector<8x512xbf16>
    %c0_14 = arith.constant 0 : index
    %c0_15 = arith.constant 0 : index
    %24 = vector.load %arg6[%c0_14, %c0_15] : memref<512x1024xi8, #tpu.memory_space<vmem>>, vector<512x1024xi8>
    %25 = arith.sitofp %24 : vector<512x1024xi8> to vector<512x1024xbf16>
    %cst_16 = arith.constant dense<0.000000e+00> : vector<8x1024xf32>
    %26 = tpu.matmul %23, %25, %cst_16 {dimension_numbers = #tpu.dot_dimension_numbers<[1], [0], [0], [1], [0, 0, 1, 1], [], []>} : vector<8x512xbf16>, vector<512x1024xbf16>, vector<8x1024xf32> -> vector<8x1024xf32>
    %c0_17 = arith.constant 0 : index
    %c0_18 = arith.constant 0 : index
    %27 = vector.load %arg7[%c0_17, %c0_18] : memref<1x1024xf32, #tpu.memory_space<vmem>>, vector<1x1024xf32>
    %28 = vector.broadcast %27 : vector<1x1024xf32> to vector<8x1024xf32>
    %29 = arith.mulf %26, %28 : vector<8x1024xf32>
    %c0_19 = arith.constant 0 : index
    %c0_20 = arith.constant 0 : index
    %30 = vector.load %arg8[%c0_19, %c0_20] : memref<1x1024xf32, #tpu.memory_space<vmem>>, vector<1x1024xf32>
    %31 = vector.broadcast %30 : vector<1x1024xf32> to vector<8x1024xf32>
    %32 = arith.addf %29, %31 : vector<8x1024xf32>
    %cst_21 = arith.constant 0.000000e+00 : f32
    %33 = vector.broadcast %cst_21 : f32 to vector<8x1024xf32>
    %34 = arith.cmpf ogt, %32, %33 : vector<8x1024xf32>
    %cst_22 = arith.constant 2.000000e-01 : f32
    %35 = vector.broadcast %cst_22 : f32 to vector<8x1024xf32>
    %36 = arith.mulf %35, %32 : vector<8x1024xf32>
    %37 = arith.select %34, %32, %36 : vector<8x1024xi1>, vector<8x1024xf32>
    %38 = arith.truncf %37 : vector<8x1024xf32> to vector<8x1024xbf16>
    %c0_23 = arith.constant 0 : index
    %c0_24 = arith.constant 0 : index
    %39 = vector.load %arg9[%c0_23, %c0_24] : memref<1024x896xi8, #tpu.memory_space<vmem>>, vector<1024x896xi8>
    %40 = arith.sitofp %39 : vector<1024x896xi8> to vector<1024x896xbf16>
    %cst_25 = arith.constant dense<0.000000e+00> : vector<8x896xf32>
    %41 = tpu.matmul %38, %40, %cst_25 {dimension_numbers = #tpu.dot_dimension_numbers<[1], [0], [0], [1], [0, 0, 1, 1], [], []>} : vector<8x1024xbf16>, vector<1024x896xbf16>, vector<8x896xf32> -> vector<8x896xf32>
    %c0_26 = arith.constant 0 : index
    %c0_27 = arith.constant 0 : index
    %42 = vector.load %arg10[%c0_26, %c0_27] : memref<1x896xf32, #tpu.memory_space<vmem>>, vector<1x896xf32>
    %43 = vector.broadcast %42 : vector<1x896xf32> to vector<8x896xf32>
    %44 = arith.mulf %41, %43 : vector<8x896xf32>
    %c0_28 = arith.constant 0 : index
    %c0_29 = arith.constant 0 : index
    %45 = vector.load %arg11[%c0_28, %c0_29] : memref<1x896xf32, #tpu.memory_space<vmem>>, vector<1x896xf32>
    %46 = vector.broadcast %45 : vector<1x896xf32> to vector<8x896xf32>
    %47 = arith.addf %44, %46 : vector<8x896xf32>
    %48 = math.tanh %47 : vector<8x896xf32>
    %49 = arith.truncf %48 : vector<8x896xf32> to vector<8x896xbf16>
    %c0_30 = arith.constant 0 : index
    %c0_31 = arith.constant 0 : index
    %50 = vector.load %arg12[%c0_30, %c0_31] : memref<8x896xbf16, #tpu.memory_space<vmem>>, vector<8x896xbf16>
    tpu.vector_store %arg12[%c0_30, %c0_31], %49 {strides = array<i32>} : memref<8x896xbf16, #tpu.memory_space<vmem>>, vector<8x896xbf16>,
    return
  }
  func.func @transform_0(%arg0: i32) -> (i32, i32) {
    %c0_i32 = arith.constant 0 : i32
    %c0_i32_0 = arith.constant 0 : i32
    return %arg0, %c0_i32 : i32, i32
  }
  func.func @transform_1(%arg0: i32) -> (i32, i32) {
    %c0_i32 = arith.constant 0 : i32
    %c0_i32_0 = arith.constant 0 : i32
    %c0_i32_1 = arith.constant 0 : i32
    return %c0_i32, %c0_i32_0 : i32, i32
  }
  func.func @transform_2(%arg0: i32) -> (i32, i32) {
    %c0_i32 = arith.constant 0 : i32
    %c0_i32_0 = arith.constant 0 : i32
    %c0_i32_1 = arith.constant 0 : i32
    return %c0_i32, %c0_i32_0 : i32, i32
  }
  func.func @transform_3(%arg0: i32) -> (i32, i32) {
    %c0_i32 = arith.constant 0 : i32
    %c0_i32_0 = arith.constant 0 : i32
    %c0_i32_1 = arith.constant 0 : i32
    return %c0_i32, %c0_i32_0 : i32, i32
  }
  func.func @transform_4(%arg0: i32) -> (i32, i32) {
    %c0_i32 = arith.constant 0 : i32
    %c0_i32_0 = arith.constant 0 : i32
    %c0_i32_1 = arith.constant 0 : i32
    return %c0_i32, %c0_i32_0 : i32, i32
  }
  func.func @transform_5(%arg0: i32) -> (i32, i32) {
    %c0_i32 = arith.constant 0 : i32
    %c0_i32_0 = arith.constant 0 : i32
    %c0_i32_1 = arith.constant 0 : i32
    return %c0_i32, %c0_i32_0 : i32, i32
  }
  func.func @transform_6(%arg0: i32) -> (i32, i32) {
    %c0_i32 = arith.constant 0 : i32
    %c0_i32_0 = arith.constant 0 : i32
    %c0_i32_1 = arith.constant 0 : i32
    return %c0_i32, %c0_i32_0 : i32, i32
  }
  func.func @transform_7(%arg0: i32) -> (i32, i32) {
    %c0_i32 = arith.constant 0 : i32
    %c0_i32_0 = arith.constant 0 : i32
    %c0_i32_1 = arith.constant 0 : i32
    return %c0_i32, %c0_i32_0 : i32, i32
  }
  func.func @transform_8(%arg0: i32) -> (i32, i32) {
    %c0_i32 = arith.constant 0 : i32
    %c0_i32_0 = arith.constant 0 : i32
    %c0_i32_1 = arith.constant 0 : i32
    return %c0_i32, %c0_i32_0 : i32, i32
  }
  func.func @transform_9(%arg0: i32) -> (i32, i32) {
    %c0_i32 = arith.constant 0 : i32
    %c0_i32_0 = arith.constant 0 : i32
    %c0_i32_1 = arith.constant 0 : i32
    return %c0_i32, %c0_i32_0 : i32, i32
  }
  func.func @transform_10(%arg0: i32) -> (i32, i32) {
    %c0_i32 = arith.constant 0 : i32
    %c0_i32_0 = arith.constant 0 : i32
    %c0_i32_1 = arith.constant 0 : i32
    return %c0_i32, %c0_i32_0 : i32, i32
  }
  func.func @transform_11(%arg0: i32) -> (i32, i32) {
    %c0_i32 = arith.constant 0 : i32
    %c0_i32_0 = arith.constant 0 : i32
    return %arg0, %c0_i32 : i32, i32
  }
}

</mosaic_0001>

<bundles_post_ra>
// kernel: generator_forward.1
= control target key start
LH: loop header
LB: loop body
LE: loop exit
PB: predicated region body
PF: predicated region fallthrough
CT: control target
= control target key end

     0   :  { %16 = vsyncpa [#allocation3], 0  ;;  %s3966_s0 = inlined_call_operand.vmem [shape: f32[8,100], index: 0, kind: input, shape index: {}]   ;;  %s3967_s1 = inlined_call_operand.hbm [shape: bf16[100,256], index: 1, kind: input, shape index: {}]   ;;  %s3968_s2 = inlined_call_operand.vmem [shape: f32[1,256], index: 2, kind: input, shape index: {}]   ;;  %s3969_s3 = inlined_call_operand.hbm [shape: bf16[256,512], index: 3, kind: input, shape index: {}]   ;;  %s3970_s4 = inlined_call_operand.hbm [shape: f32[1,512], index: 4, kind: input, shape index: {}]   ;;  %s3971_s5 = inlined_call_operand.hbm [shape: s8[512,1024], index: 5, kind: input, shape index: {}]   ;;  %s3972_s6 = inlined_call_operand.vmem [shape: f32[1,1024], index: 6, kind: input, shape index: {}]   ;;  %s3973_s7 = inlined_call_operand.vmem [shape: f32[1,1024], index: 7, kind: input, shape index: {}]   ;;  %s3974_s8 = inlined_call_operand.hbm [shape: s8[1024,896], index: 8, kind: input, shape index: {}]   ;;  %s3975_s9 = inlined_call_operand.vmem [shape: f32[1,896], index: 9, kind: input, shape index: {}]   ;;  %s3976_s10 = inlined_call_operand.hbm [shape: f32[1,896], index: 10, kind: input, shape index: {}]   ;;  %s3977_s11 = inlined_call_operand.vmem [shape: bf16[8,896], index: 11, kind: output, shape index: {}]  }
   0x1   :  { %17 = vsyncpa [#allocation5], 0 }
   0x2   :  { %18 = vsyncpa [#allocation8], 0 }
   0x3   :  { %19 = vsyncpa [#allocation11], 0  ;;  %s3592_s17 = smov [#allocation4]   ;;  %s3452_s21 = scalar_lea.hbm %s3969_s3, 8192 }
   0x4   :  { %s41_s18 = sshll.u32 %s3592_s17, 4  ;;  %p3453_p0 = scmp.ne.s32.totalorder %s3969_s3, %s3452_s21  ;;  %s42_s18 = int_to_ptr.vmem [resolvable:$true] %s41_s18 }
   0x5   :  { %p3456_p1 = scmp.lt.u32.totalorder %s3452_s21, %s3969_s3 }
   0x7   :  { %p3458_p2 = pnand %p3456_p1, %p3453_p0 }
   0x9   :  { %3461 = shalt.err (!%p3458_p2)
}
   0xa   :  { %s3462_s26 = scalar_lea.vmem %s42_s18, 8192  ;;  %p3467_p4 = scmp.lt.s32.totalorder %s42_s18, %s42_s18 }
   0xb   :  { %p3463_p3 = scmp.ne.s32.totalorder %s42_s18, %s3462_s26  ;;  %p3468_p5 = scmp.lt.s32.totalorder %s3462_s26, %s3462_s26 }
   0xd   :  { %p3469_p6 = por %p3468_p5, %p3467_p4 }
   0xf   :  { %p3470_p7 = pnand %p3469_p6, %p3463_p3 }
  0x11   :  { %3473 = shalt.err (!%p3470_p7)
}
  0x12   :  { %s3593_s27 = smov 256   ;;  %s3594_s28 = smov 16  }
  0x13   :  { %47 = dma.hbm_to_vmem [thread:$0]  %s3969_s3, 8192, %s42_s18, [#allocation5], %s3593_s27, %s3593_s27, %s3594_s28  }
  0x14   :  { %s3595_s12 = smov [#allocation7]   ;;  %s3474_s16 = scalar_lea.hbm %s3971_s5, 16384 }
  0x15   :  { %s63_s13 = sshll.u32 %s3595_s12, 4  ;;  %p3475_p8 = scmp.ne.s32.totalorder %s3971_s5, %s3474_s16  ;;  %s64_s13 = int_to_ptr.vmem [resolvable:$true] %s63_s13 }
  0x16   :  { %p3478_p9 = scmp.lt.u32.totalorder %s3474_s16, %s3971_s5 }
  0x18   :  { %p3480_p10 = pnand %p3478_p9, %p3475_p8 }
  0x1a   :  { %3483 = shalt.err (!%p3480_p10)
}
  0x1b   :  { %s3484_s22 = scalar_lea.vmem %s64_s13, 16384  ;;  %p3489_p12 = scmp.lt.s32.totalorder %s64_s13, %s64_s13 }
  0x1c   :  { %p3485_p11 = scmp.ne.s32.totalorder %s64_s13, %s3484_s22  ;;  %p3490_p13 = scmp.lt.s32.totalorder %s3484_s22, %s3484_s22 }
  0x1e   :  { %p3491_p0 = por %p3490_p13, %p3489_p12 }
  0x20   :  { %p3492_p1 = pnand %p3491_p0, %p3485_p11 }
  0x22   :  { %3495 = shalt.err (!%p3492_p1)
}
  0x23   :  { %s3596_s3 = smov 1024   ;;  %s3597_s18 = smov 64  }
  0x24   :  { %69 = dma.hbm_to_vmem [thread:$0]  %s3971_s5, 16384, %s64_s13, [#allocation8], %s3596_s3, %s3596_s3, %s3597_s18  }
  0x25   :  { %s3598_s25 = smov [#allocation2]   ;;  %s3496_s29 = scalar_lea.hbm %s3967_s1, 1664 }
  0x26   :  { %s27_s26 = sshll.u32 %s3598_s25, 4  ;;  %p3497_p2 = scmp.ne.s32.totalorder %s3967_s1, %s3496_s29  ;;  %s28_s26 = int_to_ptr.vmem [resolvable:$true] %s27_s26 }
  0x27   :  { %p3500_p3 = scmp.lt.u32.totalorder %s3496_s29, %s3967_s1 }
  0x29   :  { %p3502_p4 = pnand %p3500_p3, %p3497_p2 }
  0x2b   :  { %3505 = shalt.err (!%p3502_p4)
}
  0x2c   :  { %s3506_s16 = scalar_lea.vmem %s28_s26, 1664  ;;  %p3511_p6 = scmp.lt.s32.totalorder %s28_s26, %s28_s26 }
  0x2d   :  { %p3507_p5 = scmp.ne.s32.totalorder %s28_s26, %s3506_s16  ;;  %p3512_p7 = scmp.lt.s32.totalorder %s3506_s16, %s3506_s16 }
  0x2f   :  { %p3513_p8 = por %p3512_p7, %p3511_p6 }
  0x31   :  { %p3514_p9 = pnand %p3513_p8, %p3507_p5 }
  0x33   :  { %3517 = shalt.err (!%p3514_p9)
}
  0x34   :  { %s3599_s5 = smov 128   ;;  %s3600_s13 = smov 8  }
  0x35   :  { %33 = dma.hbm_to_vmem [thread:$0]  %s3967_s1, 1664, %s28_s26, [#allocation3], %s3599_s5, %s3599_s5, %s3600_s13  }
  0x36   :  { %s3601_s20 = smov [#allocation6]   ;;  %s3602_s22 = smov [#allocation9]  }
  0x37   :  { %s54_s21 = sshll.u32 %s3601_s20, 4  ;;  %s79_s3 = sshll.u32 %s3602_s22, 4  ;;  %s55_s21 = int_to_ptr.vmem [resolvable:$true] %s54_s21  ;;  %s80_s3 = int_to_ptr.vmem [resolvable:$true] %s79_s3 }
  0x38   :  { %s3518_s24 = scalar_lea.hbm %s3970_s4, 64 }
  0x39   :  { %p3519_p10 = scmp.ne.s32.totalorder %s3970_s4, %s3518_s24  ;;  %p3522_p11 = scmp.lt.u32.totalorder %s3518_s24, %s3970_s4 }
  0x3b   :  { %p3524_p12 = pnand %p3522_p11, %p3519_p10 }
  0x3d   :  { %3527 = shalt.err (!%p3524_p12)
}
  0x3e   :  { %s3528_s1 = scalar_lea.vmem %s55_s21, 64  ;;  %p3533_p0 = scmp.lt.s32.totalorder %s55_s21, %s55_s21 }
  0x3f   :  { %p3529_p13 = scmp.ne.s32.totalorder %s55_s21, %s3528_s1  ;;  %p3534_p1 = scmp.lt.s32.totalorder %s3528_s1, %s3528_s1 }
  0x41   :  { %p3535_p2 = por %p3534_p1, %p3533_p0 }
  0x43   :  { %p3536_p3 = pnand %p3535_p2, %p3529_p13 }
  0x45   :  { %3539 = shalt.err (!%p3536_p3)
}
  0x46   :  { %57 = dma.hbm_to_vmem [thread:$0]  %s3970_s4, 64, %s55_s21, [#allocation5]  }
  0x47   :  { %s3540_s15 = scalar_lea.hbm %s3974_s8, 28672 }
  0x48   :  { %p3541_p4 = scmp.ne.s32.totalorder %s3974_s8, %s3540_s15  ;;  %p3544_p5 = scmp.lt.u32.totalorder %s3540_s15, %s3974_s8 }
  0x4a   :  { %p3546_p6 = pnand %p3544_p5, %p3541_p4 }
  0x4c   :  { %3549 = shalt.err (!%p3546_p6)
}
  0x4d   :  { %s3550_s19 = scalar_lea.vmem %s80_s3, 28672  ;;  %p3555_p8 = scmp.lt.s32.totalorder %s80_s3, %s80_s3 }
  0x4e   :  { %p3551_p7 = scmp.ne.s32.totalorder %s80_s3, %s3550_s19  ;;  %p3556_p9 = scmp.lt.s32.totalorder %s3550_s19, %s3550_s19 }
  0x50   :  { %p3557_p10 = por %p3556_p9, %p3555_p8 }
  0x52   :  { %p3558_p11 = pnand %p3557_p10, %p3551_p7 }
  0x54   :  { %3561 = shalt.err (!%p3558_p11)
}
  0x55   :  { %s3603_s4 = smov 896   ;;  %s3604_s20 = smov 56  }
  0x56   :  { %85 = dma.hbm_to_vmem [thread:$0]  %s3974_s8, 28672, %s80_s3, [#allocation8], %s3603_s4, %s3603_s4, %s3604_s20  }
  0x57   :  { %s3605_s18 = smov [#allocation10]   ;;  %s3562_s27 = scalar_lea.hbm %s3976_s10, 112 }
  0x58   :  { %s94_s23 = sshll.u32 %s3605_s18, 4  ;;  %p3563_p12 = scmp.ne.s32.totalorder %s3976_s10, %s3562_s27  ;;  %s95_s23 = int_to_ptr.vmem [resolvable:$true] %s94_s23 }
  0x59   :  { %p3566_p13 = scmp.lt.u32.totalorder %s3562_s27, %s3976_s10 }
  0x5b   :  { %p3568_p0 = pnand %p3566_p13, %p3563_p12 }
  0x5d   :  { %3571 = shalt.err (!%p3568_p0)
}
  0x5e   :  { %s3572_s30 = scalar_lea.vmem %s95_s23, 112  ;;  %s3576_s8 = scalar_lea.vmem %s95_s23, 128 }
  0x5f   :  { %p3573_p1 = scmp.ne.s32.totalorder %s95_s23, %s3572_s30  ;;  %p3577_p2 = scmp.lt.s32.totalorder %s95_s23, %s95_s23 }
  0x60   :  { %p3578_p3 = scmp.lt.s32.totalorder %s3576_s8, %s3572_s30 }
  0x62   :  { %p3579_p4 = por %p3578_p3, %p3577_p2 }
  0x64   :  { %p3580_p5 = pnand %p3579_p4, %p3573_p1 }
  0x66   :  { %3583 = shalt.err (!%p3580_p5)
}
  0x67   :  { %97 = dma.hbm_to_vmem [thread:$0]  %s3976_s10, 112, %s95_s23, [#allocation11]  }
  0x68   :  { %3584 = dma.done.wait [#allocation3], 1664  }
  0x69   :  { %3585 = vsyncadd [#allocation3], 4294965632 }
  0x6a   :  { %3586 = dma.done.wait [#allocation5], 8256  }
  0x6b   :  { %3587 = vsyncadd [#allocation5], 4294959040 }
  0x6c   :  { %3588 = dma.done.wait [#allocation8], 45056  }
  0x6d   :  { %3589 = vsyncadd [#allocation8], 4294922240 }
  0x6e   :  { %3590 = dma.done.wait [#allocation11], 112  }
  0x6f   :  { %3591 = vsyncadd [#allocation11], 4294967184  ;;  %v3606_v0 = vmov 0   ;;  %v3320_v1 = vld [vmem:[#allocation2 + $0x4] ss:$8 sps:$4 sm:$0xff]   ;;  %vm213_vm0 = vcmask 1041408  }
  0x70   :  { %252 = vmatprep.mubr.bf16.mxu0 %v3606_v0  ;;  %v3322_v2 = vld [vmem:[#allocation2] ss:$8 sps:$4 sm:$0xff]   ;;  %220 = vmatprep.subr.bf16.mxu0 %v3320_v1  ;;  %v3323_v3 = vld [vmem:[#allocation2 + $0x14] ss:$8 sps:$4 sm:$0xff]   ;;  %v3325_v4 = vld [vmem:[#allocation2 + $0x10] ss:$8 sps:$4 sm:$0xff]  }
  0x71   :  { %221 = vmatpush1.bf16.msra.mxu0 %v3322_v2  ;;  %v3326_v5 = vld [vmem:[#allocation2 + $0x24] ss:$8 sps:$4 sm:$0xff]   ;;  %v3328_v6 = vld [vmem:[#allocation2 + $0x20] ss:$8 sps:$4 sm:$0xff]   ;;  %v3329_v7 = vld [vmem:[#allocation2 + $0x34] ss:$8 sps:$4 sm:$0xff]  }
  0x72   :  { %222 = vmatprep.subr.bf16.mxu0 %v3323_v3  ;;  %v3331_v8 = vld [vmem:[#allocation2 + $0x30] ss:$8 sps:$4 sm:$0xff]   ;;  %v3332_v9 = vld [vmem:[#allocation2 + $0x44] ss:$8 sps:$4 sm:$0xff]   ;;  %v3334_v10 = vld [vmem:[#allocation2 + $0x40] ss:$8 sps:$4 sm:$0xff]  }
  0x73   :  { %v3335_v11 = vld [vmem:[#allocation2 + $0x54] ss:$8 sps:$4 sm:$0xff]   ;;  %v131_v12 = vld [vmem:[#allocation2 + $0x60] sm:$0x33]  ;;  %v3337_v13 = vld [vmem:[#allocation2 + $0x50] ss:$8 sps:$4 sm:$0xff]  }
  0x74   :  { %v3090_v14 = vcombine.high %v131_v12, %v131_v12  ;;  %v3089_v15 = vcombine.low %v131_v12, %v131_v12  ;;  %v117_v16 = vld [vmem:[%s3966_s0] sm:$0xff]  ;;  %vm209_vm1 = vcmask 818176   ;;  %v3390_v51 = vld [vmem:[#allocation4 + $0xc] ss:$16 sps:$4 sm:$0xff]  }
  0x75   :  { %223 = vmatpush1.bf16.msra.mxu0 %v3325_v4  ;;  %v3342_v18 = vld [vmem:[#allocation4 + $0x4] ss:$16 sps:$4 sm:$0xff]   ;;  %v118_v19 = vpack.c.bf16 %v117_v16, %v117_v16  ;;  %v3340_v20 = vld [vmem:[#allocation4] ss:$16 sps:$4 sm:$0xff]  }
  0x76   :  { %224 = vmatprep.subr.bf16.mxu0 %v3326_v5  ;;  %v215_v17 = vsel %vm213_vm0, %v3089_v15, 0  ;;  %v3345_v21 = vld [vmem:[#allocation4 + $0x24] ss:$16 sps:$4 sm:$0xff]   ;;  %v3343_v22 = vld [vmem:[#allocation4 + $0x20] ss:$16 sps:$4 sm:$0xff]  }
  0x77   :  { %v3348_v23 = vld [vmem:[#allocation4 + $0x44] ss:$16 sps:$4 sm:$0xff]   ;;  %v3346_v24 = vld [vmem:[#allocation4 + $0x40] ss:$16 sps:$4 sm:$0xff]  }
  0x78   :  { %v3351_v25 = vld [vmem:[#allocation4 + $0x64] ss:$16 sps:$4 sm:$0xff]   ;;  %v3349_v26 = vld [vmem:[#allocation4 + $0x60] ss:$16 sps:$4 sm:$0xff]  }
  0x79   :  { %225 = vmatpush1.bf16.msra.mxu0 %v3328_v6  ;;  %v3354_v27 = vld [vmem:[#allocation4 + $0x84] ss:$16 sps:$4 sm:$0xff]   ;;  %v3352_v28 = vld [vmem:[#allocation4 + $0x80] ss:$16 sps:$4 sm:$0xff]  }
  0x7a   :  { %226 = vmatprep.subr.bf16.mxu0 %v3329_v7  ;;  %v3357_v29 = vld [vmem:[#allocation4 + $0xa4] ss:$16 sps:$4 sm:$0xff]   ;;  %v3355_v30 = vld [vmem:[#allocation4 + $0xa0] ss:$16 sps:$4 sm:$0xff]  }
  0x7b   :  { %v3360_v31 = vld [vmem:[#allocation4 + $0xc4] ss:$16 sps:$4 sm:$0xff]   ;;  %v3358_v32 = vld [vmem:[#allocation4 + $0xc0] ss:$16 sps:$4 sm:$0xff]  }
  0x7c   :  { %v3363_v33 = vld [vmem:[#allocation4 + $0xe4] ss:$16 sps:$4 sm:$0xff]   ;;  %v3361_v34 = vld [vmem:[#allocation4 + $0xe0] ss:$16 sps:$4 sm:$0xff]  }
  0x7d   :  { %227 = vmatpush1.bf16.msra.mxu0 %v3331_v8  ;;  %v3366_v35 = vld [vmem:[#allocation4 + $0x104] ss:$16 sps:$4 sm:$0xff]   ;;  %v3364_v36 = vld [vmem:[#allocation4 + $0x100] ss:$16 sps:$4 sm:$0xff]  }
  0x7e   :  { %228 = vmatprep.subr.bf16.mxu0 %v3332_v9  ;;  %v3369_v37 = vld [vmem:[#allocation4 + $0x124] ss:$16 sps:$4 sm:$0xff]   ;;  %v3367_v38 = vld [vmem:[#allocation4 + $0x120] ss:$16 sps:$4 sm:$0xff]  }
  0x7f   :  { %v3372_v39 = vld [vmem:[#allocation4 + $0x144] ss:$16 sps:$4 sm:$0xff]   ;;  %v3370_v40 = vld [vmem:[#allocation4 + $0x140] ss:$16 sps:$4 sm:$0xff]  }
  0x80   :  { %v3375_v41 = vld [vmem:[#allocation4 + $0x164] ss:$16 sps:$4 sm:$0xff]   ;;  %v3373_v42 = vld [vmem:[#allocation4 + $0x160] ss:$16 sps:$4 sm:$0xff]  }
  0x81   :  { %229 = vmatpush1.bf16.msra.mxu0 %v3334_v10  ;;  %v3378_v43 = vld [vmem:[#allocation4 + $0x184] ss:$16 sps:$4 sm:$0xff]   ;;  %v3376_v44 = vld [vmem:[#allocation4 + $0x180] ss:$16 sps:$4 sm:$0xff]  }
  0x82   :  { %230 = vmatprep.subr.bf16.mxu0 %v3335_v11  ;;  %v3381_v45 = vld [vmem:[#allocation4 + $0x1a4] ss:$16 sps:$4 sm:$0xff]   ;;  %v3379_v46 = vld [vmem:[#allocation4 + $0x1a0] ss:$16 sps:$4 sm:$0xff]  }
  0x83   :  { %v3384_v47 = vld [vmem:[#allocation4 + $0x1c4] ss:$16 sps:$4 sm:$0xff]   ;;  %v3382_v48 = vld [vmem:[#allocation4 + $0x1c0] ss:$16 sps:$4 sm:$0xff]  }
  0x84   :  { %v3387_v49 = vld [vmem:[#allocation4 + $0x1e4] ss:$16 sps:$4 sm:$0xff]   ;;  %v3385_v50 = vld [vmem:[#allocation4 + $0x1e0] ss:$16 sps:$4 sm:$0xff]  }
  0x85   :  { %231 = vmatpush1.bf16.msra.mxu0 %v3337_v13  ;;  %v774_v52 = vld [vmem:[#allocation7 + $0x8] sm:$0xff]  ;;  %v773_v53 = vld [vmem:[#allocation7] sm:$0xff] }
  0x86   :  { %3091 = vmatprep.subr.msk.bf16.mxu0 %vm213_vm0, %v3090_v14  ;;  %v902_v54 = vunpack.c.l.s8.bf16 %v774_v52  ;;  %v910_v55 = vunpack.c.h.s8.bf16 %v774_v52  ;;  %v901_v56 = vunpack.c.l.s8.bf16 %v773_v53  ;;  %v909_v57 = vunpack.c.h.s8.bf16 %v773_v53  ;;  %v782_v58 = vld [vmem:[#allocation7 + $0x48] sm:$0xff]  ;;  %v781_v60 = vld [vmem:[#allocation7 + $0x40] sm:$0xff] }
  0x87   :  { %v918_v59 = vunpack.c.l.s8.bf16 %v782_v58  ;;  %v917_v61 = vunpack.c.l.s8.bf16 %v781_v60  ;;  %v926_v62 = vunpack.c.h.s8.bf16 %v782_v58  ;;  %v925_v63 = vunpack.c.h.s8.bf16 %v781_v60  ;;  %v790_v0 = vld [vmem:[#allocation7 + $0x88] sm:$0xff]  ;;  %v789_v2 = vld [vmem:[#allocation7 + $0x80] sm:$0xff] }
  0x88   :  { %1157 = vmatprep.subr.bf16.mxu1 %v902_v54  ;;  %v934_v1 = vunpack.c.l.s8.bf16 %v790_v0  ;;  %v933_v3 = vunpack.c.l.s8.bf16 %v789_v2  ;;  %v942_v4 = vunpack.c.h.s8.bf16 %v790_v0  ;;  %v941_v5 = vunpack.c.h.s8.bf16 %v789_v2  ;;  %v798_v6 = vld [vmem:[#allocation7 + $0xc8] sm:$0xff]  ;;  %v797_v8 = vld [vmem:[#allocation7 + $0xc0] sm:$0xff] }
  0x89   :  { %233 = vmatpush1.bf16.msra.mxu0 %v215_v17  ;;  %1158 = vmatpush1.bf16.msra.mxu1 %v901_v56  ;;  %v950_v7 = vunpack.c.l.s8.bf16 %v798_v6  ;;  %v949_v9 = vunpack.c.l.s8.bf16 %v797_v8  ;;  %v958_v10 = vunpack.c.h.s8.bf16 %v798_v6  ;;  %v957_v11 = vunpack.c.h.s8.bf16 %v797_v8  ;;  %v806_v12 = vld [vmem:[#allocation7 + $0x108] sm:$0xff]  ;;  %v805_v14 = vld [vmem:[#allocation7 + $0x100] sm:$0xff] }
  0x8a   :  { %675 = vmatprep.subr.bf16.mxu0 %v3342_v18  ;;  %1159 = vmatprep.subr.bf16.mxu1 %v910_v55  ;;  %v966_v13 = vunpack.c.l.s8.bf16 %v806_v12  ;;  %v965_v15 = vunpack.c.l.s8.bf16 %v805_v14  ;;  %v974_v16 = vunpack.c.h.s8.bf16 %v806_v12  ;;  %v973_v17 = vunpack.c.h.s8.bf16 %v805_v14  ;;  %v814_v18 = vld [vmem:[#allocation7 + $0x148] sm:$0xff]  ;;  %v3394_v53 = vld [vmem:[#allocation4 + $0x48] ss:$16 sps:$4 sm:$0xff]  }
  0x8b   :  { %v3396_v52 = vld [vmem:[#allocation4 + $0x4c] ss:$16 sps:$4 sm:$0xff]   ;;  %v3397_v55 = vld [vmem:[#allocation4 + $0x68] ss:$16 sps:$4 sm:$0xff]  }
  0x8c   :  { %3092 = vmatmul.mubr.msk.bf16.vlgmr.msra.gmra.mrb[0].mxu0 %vm209_vm1, %v118_v19  ;;  %v982_v19 = vunpack.c.l.s8.bf16 %v814_v18  ;;  %v3399_v54 = vld [vmem:[#allocation4 + $0x6c] ss:$16 sps:$4 sm:$0xff]  }
  0x8d   :  { %676 = vmatpush1.bf16.msra.mxu0 %v3340_v20  ;;  %1160 = vmatpush1.bf16.msra.mxu1 %v909_v57  ;;  %v813_v20 = vld [vmem:[#allocation7 + $0x140] sm:$0xff]  ;;  %v3402_v56 = vld [vmem:[#allocation4 + $0x8c] ss:$16 sps:$4 sm:$0xff]  }
  0x8e   :  { %677 = vmatprep.subr.bf16.mxu0 %v3345_v21  ;;  %1161 = vmatprep.subr.bf16.mxu1 %v918_v59  ;;  %v134_v21 = vlaneseq  ;;  %v3400_v57 = vld [vmem:[#allocation4 + $0x88] ss:$16 sps:$4 sm:$0xff]   ;;  %v3405_v58 = vld [vmem:[#allocation4 + $0xac] ss:$16 sps:$4 sm:$0xff]  }
  0x8f   :  { %v3403_v59 = vld [vmem:[#allocation4 + $0xa8] ss:$16 sps:$4 sm:$0xff]   ;;  %v3408_v60 = vld [vmem:[#allocation4 + $0xcc] ss:$16 sps:$4 sm:$0xff]  }
  0x90   :  { %v3414_v0 = vld [vmem:[#allocation4 + $0x10c] ss:$16 sps:$4 sm:$0xff]  }
  0x91   :  { %678 = vmatpush1.bf16.msra.mxu0 %v3343_v22  ;;  %1162 = vmatpush1.bf16.msra.mxu1 %v917_v61  ;;  %v981_v22 = vunpack.c.l.s8.bf16 %v813_v20  ;;  %v3406_v61 = vld [vmem:[#allocation4 + $0xc8] ss:$16 sps:$4 sm:$0xff]   ;;  %v3417_v2 = vld [vmem:[#allocation4 + $0x12c] ss:$16 sps:$4 sm:$0xff]  }
  0x92   :  { %679 = vmatprep.subr.bf16.mxu0 %v3348_v23  ;;  %1163 = vmatprep.subr.bf16.mxu1 %v926_v62  ;;  %v990_v23 = vunpack.c.h.s8.bf16 %v814_v18  ;;  %v3411_v62 = vld [vmem:[#allocation4 + $0xec] ss:$16 sps:$4 sm:$0xff]   ;;  %v775_v18 = vld [vmem:[#allocation7 + $0x10] sm:$0xff] }
  0x93   :  { %v3423_v6 = vld [vmem:[#allocation4 + $0x16c] ss:$16 sps:$4 sm:$0xff]  }
  0x94   :  { %v3426_v8 = vld [vmem:[#allocation4 + $0x18c] ss:$16 sps:$4 sm:$0xff]  }
  0x95   :  { %680 = vmatpush1.bf16.msra.mxu0 %v3346_v24  ;;  %1164 = vmatpush1.bf16.msra.mxu1 %v925_v63  ;;  %v3742_v24 = vshrl.u32 %v134_v21, 7  ;;  %v3409_v63 = vld [vmem:[#allocation4 + $0xe8] ss:$16 sps:$4 sm:$0xff]   ;;  %v3432_v12 = vld [vmem:[#allocation4 + $0x1cc] ss:$16 sps:$4 sm:$0xff]  }
  0x96   :  { %681 = vmatprep.subr.bf16.mxu0 %v3351_v25  ;;  %1165 = vmatprep.subr.bf16.mxu1 %v934_v1  ;;  %v989_v25 = vunpack.c.h.s8.bf16 %v813_v20  ;;  %v3412_v1 = vld [vmem:[#allocation4 + $0x108] ss:$16 sps:$4 sm:$0xff]   ;;  %v3435_v14 = vld [vmem:[#allocation4 + $0x1ec] ss:$16 sps:$4 sm:$0xff]  }
  0x97   :  { %v784_v21 = vld [vmem:[#allocation7 + $0x58] sm:$0xff] }
  0x99   :  { %682 = vmatpush1.bf16.msra.mxu0 %v3349_v26  ;;  %1166 = vmatpush1.bf16.msra.mxu1 %v933_v3  ;;  %v822_v26 = vld [vmem:[#allocation7 + $0x188] sm:$0xff]  ;;  %v3415_v3 = vld [vmem:[#allocation4 + $0x128] ss:$16 sps:$4 sm:$0xff]  }
  0x9a   :  { %683 = vmatprep.subr.bf16.mxu0 %v3354_v27  ;;  %1167 = vmatprep.subr.bf16.mxu1 %v942_v4  ;;  %v998_v27 = vunpack.c.l.s8.bf16 %v822_v26  ;;  %v3420_v4 = vld [vmem:[#allocation4 + $0x14c] ss:$16 sps:$4 sm:$0xff]  }
  0x9d   :  { %684 = vmatpush1.bf16.msra.mxu0 %v3352_v28  ;;  %1168 = vmatpush1.bf16.msra.mxu1 %v941_v5  ;;  %v821_v28 = vld [vmem:[#allocation7 + $0x180] sm:$0xff] }
  0x9e   :  { %685 = vmatprep.subr.bf16.mxu0 %v3357_v29  ;;  %1169 = vmatprep.subr.bf16.mxu1 %v950_v7  ;;  %v3745_v29 = vsub.s32 0, %v3742_v24  ;;  %v3418_v5 = vld [vmem:[#allocation4 + $0x148] ss:$16 sps:$4 sm:$0xff]  }
  0x9f   :  { %v3421_v7 = vld [vmem:[#allocation4 + $0x168] ss:$16 sps:$4 sm:$0xff]  }
  0xa1   :  { %686 = vmatpush1.bf16.msra.mxu0 %v3355_v30  ;;  %1170 = vmatpush1.bf16.msra.mxu1 %v949_v9  ;;  %v132_v30 = vld [vmem:[%s3968_s2] sm:$0x3]  ;;  %v3424_v9 = vld [vmem:[#allocation4 + $0x188] ss:$16 sps:$4 sm:$0xff]  }
  0xa2   :  { %687 = vmatprep.subr.bf16.mxu0 %v3360_v31  ;;  %1171 = vmatprep.subr.bf16.mxu1 %v958_v10  ;;  %v3751_v31 = vsub.s32 1, %v3742_v24  ;;  %v3429_v10 = vld [vmem:[#allocation4 + $0x1ac] ss:$16 sps:$4 sm:$0xff]  }
  0xa5   :  { %688 = vmatpush1.bf16.msra.mxu0 %v3358_v32  ;;  %1172 = vmatpush1.bf16.msra.mxu1 %v957_v11  ;;  %v997_v32 = vunpack.c.l.s8.bf16 %v821_v28  ;;  %v3427_v11 = vld [vmem:[#allocation4 + $0x1a8] ss:$16 sps:$4 sm:$0xff]  }
  0xa6   :  { %689 = vmatprep.subr.bf16.mxu0 %v3363_v33  ;;  %1173 = vmatprep.subr.bf16.mxu1 %v966_v13  ;;  %v1006_v33 = vunpack.c.h.s8.bf16 %v822_v26  ;;  %v3430_v13 = vld [vmem:[#allocation4 + $0x1c8] ss:$16 sps:$4 sm:$0xff]  }
  0xa9   :  { %690 = vmatpush1.bf16.msra.mxu0 %v3361_v34  ;;  %1174 = vmatpush1.bf16.msra.mxu1 %v965_v15  ;;  %v137_v34 = vrot.slane %v132_v30, %v3745_v29  ;;  %v776_v15 = vld [vmem:[#allocation7 + $0x18] sm:$0xff] }
  0xaa   :  { %691 = vmatprep.subr.bf16.mxu0 %v3366_v35  ;;  %1175 = vmatprep.subr.bf16.mxu1 %v974_v16  ;;  %v141_v35 = vrot.slane %v132_v30, %v3751_v31  ;;  %v3433_v16 = vld [vmem:[#allocation4 + $0x1e8] ss:$16 sps:$4 sm:$0xff]   ;;  %v912_v20 = vunpack.c.h.s8.bf16 %v776_v15 }
  0xad   :  { %692 = vmatpush1.bf16.msra.mxu0 %v3364_v36  ;;  %1176 = vmatpush1.bf16.msra.mxu1 %v973_v17  ;;  %v1005_v36 = vunpack.c.h.s8.bf16 %v821_v28  ;;  %v904_v17 = vunpack.c.l.s8.bf16 %v776_v15  ;;  %v792_v28 = vld [vmem:[#allocation7 + $0x98] sm:$0xff] }
  0xae   :  { %693 = vmatprep.subr.bf16.mxu0 %v3369_v37  ;;  %1177 = vmatprep.subr.bf16.mxu1 %v982_v19  ;;  %v903_v19 = vunpack.c.l.s8.bf16 %v775_v18 }
  0xb1   :  { %694 = vmatpush1.bf16.msra.mxu0 %v3367_v38  ;;  %1178 = vmatpush1.bf16.msra.mxu1 %v981_v22  ;;  %v911_v22 = vunpack.c.h.s8.bf16 %v775_v18 }
  0xb2   :  { %695 = vmatprep.subr.bf16.mxu0 %v3372_v39  ;;  %1179 = vmatprep.subr.bf16.mxu1 %v990_v23  ;;  %v920_v23 = vunpack.c.l.s8.bf16 %v784_v21 }
  0xb5   :  { %696 = vmatpush1.bf16.msra.mxu0 %v3370_v40  ;;  %1180 = vmatpush1.bf16.msra.mxu1 %v989_v25  ;;  %v783_v25 = vld [vmem:[#allocation7 + $0x50] sm:$0xff] }
  0xb6   :  { %697 = vmatprep.subr.bf16.mxu0 %v3375_v41  ;;  %1181 = vmatprep.subr.bf16.mxu1 %v998_v27  ;;  %v919_v26 = vunpack.c.l.s8.bf16 %v783_v25  ;;  %v928_v27 = vunpack.c.h.s8.bf16 %v784_v21  ;;  %v927_v30 = vunpack.c.h.s8.bf16 %v783_v25  ;;  %v837_v25 = vld [vmem:[#allocation7 + $0x200] sm:$0xff] }
  0xb9   :  { %698 = vmatpush1.bf16.msra.mxu0 %v3373_v42  ;;  %1182 = vmatpush1.bf16.msra.mxu1 %v997_v32  ;;  %v936_v32 = vunpack.c.l.s8.bf16 %v792_v28 }
  0xba   :  { %699 = vmatprep.subr.bf16.mxu0 %v3378_v43  ;;  %1183 = vmatprep.subr.bf16.mxu1 %v1006_v33  ;;  %v791_v33 = vld [vmem:[#allocation7 + $0x90] sm:$0xff] }
  0xbd   :  { %700 = vmatpush1.bf16.msra.mxu0 %v3376_v44  ;;  %1184 = vmatpush1.bf16.msra.mxu1 %v1005_v36  ;;  %v800_v36 = vld [vmem:[#allocation7 + $0xd8] sm:$0xff] }
  0xbe   :  { %701 = vmatprep.subr.bf16.mxu0 %v3381_v45 }
  0xc1   :  { %702 = vmatpush1.bf16.msra.mxu0 %v3379_v46 }
  0xc2   :  { %703 = vmatprep.subr.bf16.mxu0 %v3384_v47 }
  0xc5   :  { %704 = vmatpush1.bf16.msra.mxu0 %v3382_v48  ;;  %v3388_v48 = vld [vmem:[#allocation4 + $0x8] ss:$16 sps:$4 sm:$0xff]  }
  0xc6   :  { %705 = vmatprep.subr.bf16.mxu0 %v3387_v49 }
  0xc9   :  { %706 = vmatpush1.bf16.msra.mxu0 %v3385_v50  ;;  %v3393_v50 = vld [vmem:[#allocation4 + $0x2c] ss:$16 sps:$4 sm:$0xff]  }
  0xca   :  { %716 = vmatprep.subr.bf16.mxu0 %v3390_v51  ;;  %v3391_v51 = vld [vmem:[#allocation4 + $0x28] ss:$16 sps:$4 sm:$0xff]  }
 0x15f   :  { %v254_v37 = vpop.f32.mrb[0].mxu0 }
 0x160   :  { %v255_v38 = vadd.f32 %v254_v37, %v137_v34  ;;  %v256_v39 = vpop.f32.mrb[1].mxu0  ;;  %v935_v34 = vunpack.c.l.s8.bf16 %v791_v33  ;;  %v943_v37 = vunpack.c.h.s8.bf16 %v791_v33 }
 0x161   :  { %v257_v40 = vadd.f32 %v256_v39, %v141_v35  ;;  %v258_v41 = vpop.f32.mrb[2].mxu0  ;;  %v944_v35 = vunpack.c.h.s8.bf16 %v792_v28  ;;  %v799_v39 = vld [vmem:[#allocation7 + $0xd0] sm:$0xff] }
 0x162   :  { %vm261_vm2 = vcmp.gt.f32.partialorder %v255_v38, 0.0  ;;  %v263_v42 = vmul.f32 0.2, %v255_v38  ;;  %v259_v43 = vpop.f32.mrb[3].mxu0 }
 0x163   :  { %vm262_vm3 = vcmp.gt.f32.partialorder %v257_v40, 0.0  ;;  %v264_v44 = vmul.f32 0.2, %v257_v40 }
 0x164   :  { %v265_v45 = vsel %vm261_vm2, %v255_v38, %v263_v42  ;;  %v952_v38 = vunpack.c.l.s8.bf16 %v800_v36  ;;  %v829_v42 = vld [vmem:[#allocation7 + $0x1c0] sm:$0xff] }
 0x165   :  { %v266_v46 = vsel %vm262_vm3, %v257_v40, %v264_v44  ;;  %v3755_v49 = vpack.c.bf16 %v265_v45, %v265_v45  ;;  %v830_v40 = vld [vmem:[#allocation7 + $0x1c8] sm:$0xff]  ;;  %v1013_v43 = vunpack.c.l.s8.bf16 %v829_v42  ;;  %v951_v44 = vunpack.c.l.s8.bf16 %v799_v39 }
 0x166   :  { %v268_v47 = vpack.c.bf16 %v266_v46, %v266_v46  ;;  %v1014_v41 = vunpack.c.l.s8.bf16 %v830_v40  ;;  %v960_v45 = vunpack.c.h.s8.bf16 %v800_v36  ;;  %v808_v46 = vld [vmem:[#allocation7 + $0x118] sm:$0xff] }
 0x168   :  { %707 = vmatprep.mubr.bf16.mxu0 %v268_v47  ;;  %1185 = vmatprep.subr.bf16.mxu1 %v1014_v41 }
 0x169   :  { %708 = vmatmul.mubr.bf16.vlgmr.msra.gmra.mrb[4].mxu0 %v3755_v49  ;;  %1186 = vmatpush1.bf16.msra.mxu1 %v1013_v43  ;;  %v845_v43 = vld [vmem:[#allocation7 + $0x240] sm:$0xff] }
 0x16a   :  { %717 = vmatpush1.bf16.msra.mxu0 %v3388_v48  ;;  %748 = vmatprep.mubr.bf16.mxu0 %v268_v47  ;;  %v1022_v47 = vunpack.c.h.s8.bf16 %v830_v40  ;;  %v1021_v48 = vunpack.c.h.s8.bf16 %v829_v42 }
 0x16b   :  { %718 = vmatprep.subr.bf16.mxu0 %v3393_v50  ;;  %v968_v50 = vunpack.c.l.s8.bf16 %v808_v46 }
 0x16c   :  { %1187 = vmatprep.subr.bf16.mxu1 %v1022_v47 }
 0x16d   :  { %1188 = vmatpush1.bf16.msra.mxu1 %v1021_v48 }
 0x16e   :  { %719 = vmatpush1.bf16.msra.mxu0 %v3391_v51  ;;  %v807_v51 = vld [vmem:[#allocation7 + $0x110] sm:$0xff] }
 0x16f   :  { %720 = vmatprep.subr.bf16.mxu0 %v3396_v52  ;;  %v3759_v52 = vld [vmem:[#allocation7 + $0x208] sm:$0xff] }
 0x172   :  { %721 = vmatpush1.bf16.msra.mxu0 %v3394_v53  ;;  %v1030_v53 = vunpack.c.l.s8.bf16 %v3759_v52 }
 0x173   :  { %722 = vmatprep.subr.bf16.mxu0 %v3399_v54  ;;  %v967_v54 = vunpack.c.l.s8.bf16 %v807_v51 }
 0x174   :  { %1198 = vmatprep.subr.bf16.mxu1 %v1030_v53 }
 0x176   :  { %723 = vmatpush1.bf16.msra.mxu0 %v3397_v55  ;;  %v976_v55 = vunpack.c.h.s8.bf16 %v808_v46 }
 0x177   :  { %724 = vmatprep.subr.bf16.mxu0 %v3402_v56  ;;  %v816_v56 = vld [vmem:[#allocation7 + $0x158] sm:$0xff] }
 0x17a   :  { %725 = vmatpush1.bf16.msra.mxu0 %v3400_v57  ;;  %v975_v57 = vunpack.c.h.s8.bf16 %v807_v51  ;;  %v1053_v51 = vunpack.c.h.s8.bf16 %v845_v43 }
 0x17b   :  { %726 = vmatprep.subr.bf16.mxu0 %v3405_v58  ;;  %v984_v58 = vunpack.c.l.s8.bf16 %v816_v56 }
 0x17e   :  { %727 = vmatpush1.bf16.msra.mxu0 %v3403_v59  ;;  %v815_v59 = vld [vmem:[#allocation7 + $0x150] sm:$0xff] }
 0x17f   :  { %728 = vmatprep.subr.bf16.mxu0 %v3408_v60  ;;  %v983_v60 = vunpack.c.l.s8.bf16 %v815_v59 }
 0x182   :  { %729 = vmatpush1.bf16.msra.mxu0 %v3406_v61  ;;  %v992_v61 = vunpack.c.h.s8.bf16 %v816_v56  ;;  %v855_v56 = vld [vmem:[#allocation7 + $0x290] sm:$0xff] }
 0x183   :  { %730 = vmatprep.subr.bf16.mxu0 %v3411_v62  ;;  %v824_v62 = vld [vmem:[#allocation7 + $0x198] sm:$0xff] }
 0x186   :  { %731 = vmatpush1.bf16.msra.mxu0 %v3409_v63  ;;  %v991_v63 = vunpack.c.h.s8.bf16 %v815_v59 }
 0x187   :  { %732 = vmatprep.subr.bf16.mxu0 %v3414_v0  ;;  %v1000_v0 = vunpack.c.l.s8.bf16 %v824_v62 }
 0x18a   :  { %733 = vmatpush1.bf16.msra.mxu0 %v3412_v1  ;;  %v823_v1 = vld [vmem:[#allocation7 + $0x190] sm:$0xff] }
 0x18b   :  { %734 = vmatprep.subr.bf16.mxu0 %v3417_v2  ;;  %v999_v2 = vunpack.c.l.s8.bf16 %v823_v1 }
 0x18e   :  { %735 = vmatpush1.bf16.msra.mxu0 %v3415_v3  ;;  %v1008_v3 = vunpack.c.h.s8.bf16 %v824_v62  ;;  %v864_v62 = vld [vmem:[#allocation7 + $0x2d8] sm:$0xff] }
 0x18f   :  { %736 = vmatprep.subr.bf16.mxu0 %v3420_v4  ;;  %v832_v4 = vld [vmem:[#allocation7 + $0x1d8] sm:$0xff] }
 0x192   :  { %737 = vmatpush1.bf16.msra.mxu0 %v3418_v5  ;;  %v1007_v5 = vunpack.c.h.s8.bf16 %v823_v1 }
 0x193   :  { %738 = vmatprep.subr.bf16.mxu0 %v3423_v6  ;;  %v1016_v6 = vunpack.c.l.s8.bf16 %v832_v4 }
 0x196   :  { %739 = vmatpush1.bf16.msra.mxu0 %v3421_v7  ;;  %v831_v7 = vld [vmem:[#allocation7 + $0x1d0] sm:$0xff] }
 0x197   :  { %740 = vmatprep.subr.bf16.mxu0 %v3426_v8  ;;  %v1015_v8 = vunpack.c.l.s8.bf16 %v831_v7 }
 0x19a   :  { %741 = vmatpush1.bf16.msra.mxu0 %v3424_v9  ;;  %v1024_v9 = vunpack.c.h.s8.bf16 %v832_v4  ;;  %v863_v4 = vld [vmem:[#allocation7 + $0x2d0] sm:$0xff] }
 0x19b   :  { %742 = vmatprep.subr.bf16.mxu0 %v3429_v10  ;;  %v840_v10 = vld [vmem:[#allocation7 + $0x218] sm:$0xff] }
 0x19c   :  { %v1040_v36 = vunpack.c.h.s8.bf16 %v840_v10 }
 0x19e   :  { %743 = vmatpush1.bf16.msra.mxu0 %v3427_v11  ;;  %v1023_v11 = vunpack.c.h.s8.bf16 %v831_v7 }
 0x19f   :  { %744 = vmatprep.subr.bf16.mxu0 %v3432_v12  ;;  %v1032_v12 = vunpack.c.l.s8.bf16 %v840_v10  ;;  %v872_v10 = vld [vmem:[#allocation7 + $0x318] sm:$0xff] }
 0x1a2   :  { %745 = vmatpush1.bf16.msra.mxu0 %v3430_v13  ;;  %v3762_v13 = vld [vmem:[#allocation6] sm:$0xf] }
 0x1a3   :  { %746 = vmatprep.subr.bf16.mxu0 %v3435_v14  ;;  %v338_v14 = vrot.slane %v3762_v13, %v3745_v29  ;;  %v342_v15 = vrot.slane %v3762_v13, %v3751_v31 }
 0x1a6   :  { %747 = vmatpush1.bf16.msra.mxu0 %v3433_v16 }
 0x1a7   :  { %1239 = vmatprep.subr.bf16.mxu0 %v904_v17 }
 0x1a9   :  { %749 = vmatmul.mubr.bf16.vlgmr.msra.gmra.mrb[8].mxu0 %v3755_v49  ;;  %v959_v49 = vunpack.c.h.s8.bf16 %v799_v39  ;;  %v1037_v39 = vunpack.c.h.s8.bf16 %v837_v25 }
 0x1aa   :  { %1240 = vmatpush1.bf16.msra.mxu0 %v903_v19 }
 0x1ab   :  { %1241 = vmatprep.subr.bf16.mxu0 %v912_v20 }
 0x1ae   :  { %1242 = vmatpush1.bf16.msra.mxu0 %v911_v22 }
 0x1af   :  { %1243 = vmatprep.subr.bf16.mxu0 %v920_v23 }
 0x1b2   :  { %1244 = vmatpush1.bf16.msra.mxu0 %v919_v26  ;;  %v839_v26 = vld [vmem:[#allocation7 + $0x210] sm:$0xff] }
 0x1b3   :  { %1245 = vmatprep.subr.bf16.mxu0 %v928_v27  ;;  %v1031_v33 = vunpack.c.l.s8.bf16 %v839_v26  ;;  %v1039_v40 = vunpack.c.h.s8.bf16 %v839_v26 }
 0x1b6   :  { %1246 = vmatpush1.bf16.msra.mxu0 %v927_v30 }
 0x1b7   :  { %1247 = vmatprep.subr.bf16.mxu0 %v936_v32  ;;  %v1029_v32 = vunpack.c.l.s8.bf16 %v837_v25 }
 0x1ba   :  { %1248 = vmatpush1.bf16.msra.mxu0 %v935_v34 }
 0x1bb   :  { %1249 = vmatprep.subr.bf16.mxu0 %v944_v35  ;;  %v1038_v35 = vunpack.c.h.s8.bf16 %v3759_v52 }
 0x1be   :  { %1250 = vmatpush1.bf16.msra.mxu0 %v943_v37  ;;  %v846_v37 = vld [vmem:[#allocation7 + $0x248] sm:$0xff] }
 0x1bf   :  { %1251 = vmatprep.subr.bf16.mxu0 %v952_v38  ;;  %v848_v38 = vld [vmem:[#allocation7 + $0x258] sm:$0xff]  ;;  %v1046_v41 = vunpack.c.l.s8.bf16 %v846_v37  ;;  %v1054_v47 = vunpack.c.h.s8.bf16 %v846_v37 }
 0x1c0   :  { %v1048_v42 = vunpack.c.l.s8.bf16 %v848_v38  ;;  %v1056_v48 = vunpack.c.h.s8.bf16 %v848_v38 }
 0x1c2   :  { %1252 = vmatpush1.bf16.msra.mxu0 %v951_v44  ;;  %v847_v44 = vld [vmem:[#allocation7 + $0x250] sm:$0xff] }
 0x1c3   :  { %1253 = vmatprep.subr.bf16.mxu0 %v960_v45  ;;  %v1045_v45 = vunpack.c.l.s8.bf16 %v845_v43  ;;  %v1047_v46 = vunpack.c.l.s8.bf16 %v847_v44  ;;  %v1055_v52 = vunpack.c.h.s8.bf16 %v847_v44 }
 0x1c6   :  { %1254 = vmatpush1.bf16.msra.mxu0 %v959_v49  ;;  %v854_v49 = vld [vmem:[#allocation7 + $0x288] sm:$0xff] }
 0x1c7   :  { %1255 = vmatprep.subr.bf16.mxu0 %v968_v50  ;;  %v856_v50 = vld [vmem:[#allocation7 + $0x298] sm:$0xff]  ;;  %v1062_v53 = vunpack.c.l.s8.bf16 %v854_v49  ;;  %v1070_v59 = vunpack.c.h.s8.bf16 %v854_v49 }
 0x1ca   :  { %1256 = vmatpush1.bf16.msra.mxu0 %v967_v54  ;;  %v1064_v54 = vunpack.c.l.s8.bf16 %v856_v50 }
 0x1cb   :  { %1257 = vmatprep.subr.bf16.mxu0 %v976_v55  ;;  %v853_v55 = vld [vmem:[#allocation7 + $0x280] sm:$0xff] }
 0x1ce   :  { %1258 = vmatpush1.bf16.msra.mxu0 %v975_v57  ;;  %v1061_v57 = vunpack.c.l.s8.bf16 %v853_v55 }
 0x1cf   :  { %1259 = vmatprep.subr.bf16.mxu0 %v984_v58  ;;  %v1063_v58 = vunpack.c.l.s8.bf16 %v855_v56 }
 0x1d2   :  { %1260 = vmatpush1.bf16.msra.mxu0 %v983_v60  ;;  %v1072_v60 = vunpack.c.h.s8.bf16 %v856_v50 }
 0x1d3   :  { %1261 = vmatprep.subr.bf16.mxu0 %v992_v61  ;;  %v862_v61 = vld [vmem:[#allocation7 + $0x2c8] sm:$0xff] }
 0x1d4   :  { %v1078_v1 = vunpack.c.l.s8.bf16 %v862_v61  ;;  %v1086_v7 = vunpack.c.h.s8.bf16 %v862_v61 }
 0x1d6   :  { %1262 = vmatpush1.bf16.msra.mxu0 %v991_v63  ;;  %v1069_v63 = vunpack.c.h.s8.bf16 %v853_v55 }
 0x1d7   :  { %1263 = vmatprep.subr.bf16.mxu0 %v1000_v0  ;;  %v1071_v0 = vunpack.c.h.s8.bf16 %v855_v56 }
 0x1da   :  { %1264 = vmatpush1.bf16.msra.mxu0 %v999_v2  ;;  %v1080_v2 = vunpack.c.l.s8.bf16 %v864_v62 }
 0x1db   :  { %1265 = vmatprep.subr.bf16.mxu0 %v1008_v3  ;;  %v861_v3 = vld [vmem:[#allocation7 + $0x2c0] sm:$0xff] }
 0x1de   :  { %1266 = vmatpush1.bf16.msra.mxu0 %v1007_v5  ;;  %v1077_v5 = vunpack.c.l.s8.bf16 %v861_v3 }
 0x1df   :  { %1267 = vmatprep.subr.bf16.mxu0 %v1016_v6  ;;  %v1079_v6 = vunpack.c.l.s8.bf16 %v863_v4 }
 0x1e2   :  { %1268 = vmatpush1.bf16.msra.mxu0 %v1015_v8  ;;  %v1088_v8 = vunpack.c.h.s8.bf16 %v864_v62 }
 0x1e3   :  { %1269 = vmatprep.subr.bf16.mxu0 %v1024_v9  ;;  %v870_v9 = vld [vmem:[#allocation7 + $0x308] sm:$0xff] }
 0x1e6   :  { %1270 = vmatpush1.bf16.msra.mxu0 %v1023_v11  ;;  %v1085_v11 = vunpack.c.h.s8.bf16 %v861_v3 }
 0x1e7   :  { %1280 = vmatprep.subr.bf16.mxu0 %v1032_v12  ;;  %v1087_v12 = vunpack.c.h.s8.bf16 %v863_v4 }
 0x23c   :  { %v709_v16 = vpop.f32.mrb[4].mxu0 }
 0x23d   :  { %v710_v17 = vadd.f32 %v709_v16, %v338_v14  ;;  %v711_v18 = vpop.f32.mrb[5].mxu0  ;;  %v1094_v14 = vunpack.c.l.s8.bf16 %v870_v9  ;;  %v869_v16 = vld [vmem:[#allocation7 + $0x300] sm:$0xff] }
 0x23e   :  { %v712_v19 = vadd.f32 %v711_v18, %v342_v15  ;;  %v713_v20 = vpop.f32.mrb[6].mxu0  ;;  %v1096_v15 = vunpack.c.l.s8.bf16 %v872_v10  ;;  %v1093_v18 = vunpack.c.l.s8.bf16 %v869_v16  ;;  %v1101_v25 = vunpack.c.h.s8.bf16 %v869_v16 }
 0x23f   :  { %vm757_vm4 = vcmp.gt.f32.partialorder %v710_v17, 0.0  ;;  %v761_v21 = vmul.f32 0.2, %v710_v17  ;;  %v714_v22 = vpop.f32.mrb[7].mxu0  ;;  %v1102_v20 = vunpack.c.h.s8.bf16 %v870_v9 }
 0x240   :  { %vm758_vm5 = vcmp.gt.f32.partialorder %v712_v19, 0.0  ;;  %v762_v23 = vmul.f32 0.2, %v712_v19  ;;  %v878_v22 = vld [vmem:[#allocation7 + $0x348] sm:$0xff] }
 0x241   :  { %v765_v27 = vsel %vm757_vm4, %v710_v17, %v761_v21  ;;  %v871_v17 = vld [vmem:[#allocation7 + $0x310] sm:$0xff]  ;;  %v1104_v21 = vunpack.c.h.s8.bf16 %v872_v10  ;;  %v1118_v37 = vunpack.c.h.s8.bf16 %v878_v22 }
 0x242   :  { %v766_v28 = vsel %vm758_vm5, %v712_v19, %v762_v23  ;;  %v3770_v34 = vpack.c.bf16 %v765_v27, %v765_v27  ;;  %v1095_v19 = vunpack.c.l.s8.bf16 %v871_v17  ;;  %v880_v23 = vld [vmem:[#allocation7 + $0x358] sm:$0xff]  ;;  %v1103_v26 = vunpack.c.h.s8.bf16 %v871_v17  ;;  %v777_v17 = vld [vmem:[#allocation7 + $0x20] sm:$0xff] }
 0x243   :  { %v3768_v30 = vpack.c.bf16 %v766_v28, %v766_v28  ;;  %v1110_v27 = vunpack.c.l.s8.bf16 %v878_v22  ;;  %v1112_v28 = vunpack.c.l.s8.bf16 %v880_v23  ;;  %v1120_v38 = vunpack.c.h.s8.bf16 %v880_v23 }
 0x244   :  { %v905_v22 = vunpack.c.l.s8.bf16 %v777_v17 }
 0x245   :  { %1189 = vmatprep.mubr.bf16.mxu1 %v3768_v30  ;;  %1271 = vmatprep.mubr.bf16.mxu0 %v3768_v30 }
 0x246   :  { %1190 = vmatmul.mubr.bf16.vlgmr.msra.gmra.mrb[0].mxu1 %v3770_v34  ;;  %1272 = vmatmul.mubr.bf16.vlgmr.msra.gmra.mrb[12].mxu0 %v3770_v34 }
 0x247   :  { %1199 = vmatpush1.bf16.msra.mxu1 %v1029_v32  ;;  %1281 = vmatpush1.bf16.msra.mxu0 %v1031_v33  ;;  %v877_v32 = vld [vmem:[#allocation7 + $0x340] sm:$0xff]  ;;  %v879_v33 = vld [vmem:[#allocation7 + $0x350] sm:$0xff] }
 0x248   :  { %1200 = vmatprep.subr.bf16.mxu1 %v1038_v35  ;;  %1282 = vmatprep.subr.bf16.mxu0 %v1040_v36  ;;  %v1109_v35 = vunpack.c.l.s8.bf16 %v877_v32  ;;  %v1111_v36 = vunpack.c.l.s8.bf16 %v879_v33 }
 0x24b   :  { %1201 = vmatpush1.bf16.msra.mxu1 %v1037_v39  ;;  %1283 = vmatpush1.bf16.msra.mxu0 %v1039_v40  ;;  %v886_v39 = vld [vmem:[#allocation7 + $0x388] sm:$0xff]  ;;  %v888_v40 = vld [vmem:[#allocation7 + $0x398] sm:$0xff] }
 0x24c   :  { %1202 = vmatprep.subr.bf16.mxu1 %v1046_v41  ;;  %1284 = vmatprep.subr.bf16.mxu0 %v1048_v42  ;;  %v1117_v41 = vunpack.c.h.s8.bf16 %v877_v32  ;;  %v1119_v42 = vunpack.c.h.s8.bf16 %v879_v33  ;;  %v1126_v43 = vunpack.c.l.s8.bf16 %v886_v39  ;;  %v1128_v44 = vunpack.c.l.s8.bf16 %v888_v40  ;;  %v788_v32 = vld [vmem:[#allocation7 + $0x78] sm:$0xff] }
 0x24d   :  { %v1134_v49 = vunpack.c.h.s8.bf16 %v886_v39  ;;  %v1136_v50 = vunpack.c.h.s8.bf16 %v888_v40  ;;  %v913_v33 = vunpack.c.h.s8.bf16 %v777_v17  ;;  %v787_v39 = vld [vmem:[#allocation7 + $0x70] sm:$0xff]  ;;  %v818_v17 = vld [vmem:[#allocation7 + $0x168] sm:$0xff] }
 0x24f   :  { %1203 = vmatpush1.bf16.msra.mxu1 %v1045_v45  ;;  %1285 = vmatpush1.bf16.msra.mxu0 %v1047_v46  ;;  %v885_v45 = vld [vmem:[#allocation7 + $0x380] sm:$0xff]  ;;  %v887_v46 = vld [vmem:[#allocation7 + $0x390] sm:$0xff] }
 0x250   :  { %1204 = vmatprep.subr.bf16.mxu1 %v1054_v47  ;;  %1286 = vmatprep.subr.bf16.mxu0 %v1056_v48  ;;  %v1125_v47 = vunpack.c.l.s8.bf16 %v885_v45  ;;  %v1127_v48 = vunpack.c.l.s8.bf16 %v887_v46  ;;  %v1133_v55 = vunpack.c.h.s8.bf16 %v885_v45  ;;  %v1135_v56 = vunpack.c.h.s8.bf16 %v887_v46  ;;  %v796_v45 = vld [vmem:[#allocation7 + $0xb8] sm:$0xff] }
 0x253   :  { %1205 = vmatpush1.bf16.msra.mxu1 %v1053_v51  ;;  %1287 = vmatpush1.bf16.msra.mxu0 %v1055_v52  ;;  %v3778_v51 = vsub.s32 2, %v3742_v24  ;;  %v894_v52 = vld [vmem:[#allocation7 + $0x3c8] sm:$0xff] }
 0x254   :  { %1206 = vmatprep.subr.bf16.mxu1 %v1062_v53  ;;  %1288 = vmatprep.subr.bf16.mxu0 %v1064_v54  ;;  %v896_v53 = vld [vmem:[#allocation7 + $0x3d8] sm:$0xff]  ;;  %v3781_v54 = vsub.s32 3, %v3742_v24 }
 0x255   :  { %v346_v61 = vrot.slane %v3762_v13, %v3778_v51  ;;  %v1152_v3 = vunpack.c.h.s8.bf16 %v896_v53 }
 0x256   :  { %v350_v62 = vrot.slane %v3762_v13, %v3781_v54 }
 0x257   :  { %1207 = vmatpush1.bf16.msra.mxu1 %v1061_v57  ;;  %1289 = vmatpush1.bf16.msra.mxu0 %v1063_v58  ;;  %v1142_v57 = vunpack.c.l.s8.bf16 %v894_v52  ;;  %v1144_v58 = vunpack.c.l.s8.bf16 %v896_v53 }
 0x258   :  { %1208 = vmatprep.subr.bf16.mxu1 %v1070_v59  ;;  %1290 = vmatprep.subr.bf16.mxu0 %v1072_v60  ;;  %v893_v59 = vld [vmem:[#allocation7 + $0x3c0] sm:$0xff]  ;;  %v895_v60 = vld [vmem:[#allocation7 + $0x3d0] sm:$0xff] }
 0x259   :  { %v1149_v13 = vunpack.c.h.s8.bf16 %v893_v59 }
 0x25b   :  { %1209 = vmatpush1.bf16.msra.mxu1 %v1069_v63  ;;  %1291 = vmatpush1.bf16.msra.mxu0 %v1071_v0  ;;  %v1141_v63 = vunpack.c.l.s8.bf16 %v893_v59  ;;  %v1143_v0 = vunpack.c.l.s8.bf16 %v895_v60 }
 0x25c   :  { %1210 = vmatprep.subr.bf16.mxu1 %v1078_v1  ;;  %1292 = vmatprep.subr.bf16.mxu0 %v1080_v2  ;;  %v1150_v2 = vunpack.c.h.s8.bf16 %v894_v52 }
 0x25f   :  { %1211 = vmatpush1.bf16.msra.mxu1 %v1077_v5  ;;  %1293 = vmatpush1.bf16.msra.mxu0 %v1079_v6  ;;  %v778_v6 = vld [vmem:[#allocation7 + $0x28] sm:$0xff] }
 0x260   :  { %1212 = vmatprep.subr.bf16.mxu1 %v1086_v7  ;;  %1294 = vmatprep.subr.bf16.mxu0 %v1088_v8  ;;  %v780_v7 = vld [vmem:[#allocation7 + $0x38] sm:$0xff] }
 0x261   :  { %v908_v16 = vunpack.c.l.s8.bf16 %v780_v7 }
 0x263   :  { %1213 = vmatpush1.bf16.msra.mxu1 %v1085_v11  ;;  %1295 = vmatpush1.bf16.msra.mxu0 %v1087_v12  ;;  %v1151_v12 = vunpack.c.h.s8.bf16 %v895_v60 }
 0x264   :  { %1214 = vmatprep.subr.bf16.mxu1 %v1094_v14  ;;  %1296 = vmatprep.subr.bf16.mxu0 %v1096_v15  ;;  %v906_v15 = vunpack.c.l.s8.bf16 %v778_v6 }
 0x267   :  { %1215 = vmatpush1.bf16.msra.mxu1 %v1093_v18  ;;  %1297 = vmatpush1.bf16.msra.mxu0 %v1095_v19  ;;  %v779_v19 = vld [vmem:[#allocation7 + $0x30] sm:$0xff] }
 0x268   :  { %1216 = vmatprep.subr.bf16.mxu1 %v1102_v20  ;;  %1298 = vmatprep.subr.bf16.mxu0 %v1104_v21 }
 0x26b   :  { %1217 = vmatpush1.bf16.msra.mxu1 %v1101_v25  ;;  %1299 = vmatpush1.bf16.msra.mxu0 %v1103_v26  ;;  %v907_v25 = vunpack.c.l.s8.bf16 %v779_v19  ;;  %v914_v26 = vunpack.c.h.s8.bf16 %v778_v6  ;;  %v812_v6 = vld [vmem:[#allocation7 + $0x138] sm:$0xff] }
 0x26c   :  { %1218 = vmatprep.subr.bf16.mxu1 %v1110_v27  ;;  %1300 = vmatprep.subr.bf16.mxu0 %v1112_v28  ;;  %v916_v27 = vunpack.c.h.s8.bf16 %v780_v7  ;;  %v786_v28 = vld [vmem:[#allocation7 + $0x68] sm:$0xff] }
 0x26f   :  { %1219 = vmatpush1.bf16.msra.mxu1 %v1109_v35  ;;  %1301 = vmatpush1.bf16.msra.mxu0 %v1111_v36  ;;  %v915_v35 = vunpack.c.h.s8.bf16 %v779_v19  ;;  %v922_v36 = vunpack.c.l.s8.bf16 %v786_v28 }
 0x270   :  { %1220 = vmatprep.subr.bf16.mxu1 %v1118_v37  ;;  %1302 = vmatprep.subr.bf16.mxu0 %v1120_v38  ;;  %v785_v37 = vld [vmem:[#allocation7 + $0x60] sm:$0xff]  ;;  %v924_v38 = vunpack.c.l.s8.bf16 %v788_v32 }
 0x271   :  { %v921_v40 = vunpack.c.l.s8.bf16 %v785_v37  ;;  %v929_v46 = vunpack.c.h.s8.bf16 %v785_v37  ;;  %v828_v37 = vld [vmem:[#allocation7 + $0x1b8] sm:$0xff] }
 0x273   :  { %1221 = vmatpush1.bf16.msra.mxu1 %v1117_v41  ;;  %1303 = vmatpush1.bf16.msra.mxu0 %v1119_v42  ;;  %v923_v41 = vunpack.c.l.s8.bf16 %v787_v39  ;;  %v930_v42 = vunpack.c.h.s8.bf16 %v786_v28 }
 0x274   :  { %1222 = vmatprep.subr.bf16.mxu1 %v1126_v43  ;;  %1304 = vmatprep.subr.bf16.mxu0 %v1128_v44  ;;  %v932_v43 = vunpack.c.h.s8.bf16 %v788_v32  ;;  %v794_v44 = vld [vmem:[#allocation7 + $0xa8] sm:$0xff] }
 0x277   :  { %1223 = vmatpush1.bf16.msra.mxu1 %v1125_v47  ;;  %1305 = vmatpush1.bf16.msra.mxu0 %v1127_v48  ;;  %v938_v47 = vunpack.c.l.s8.bf16 %v794_v44  ;;  %v793_v48 = vld [vmem:[#allocation7 + $0xa0] sm:$0xff] }
 0x278   :  { %1224 = vmatprep.subr.bf16.mxu1 %v1134_v49  ;;  %1306 = vmatprep.subr.bf16.mxu0 %v1136_v50  ;;  %v940_v49 = vunpack.c.l.s8.bf16 %v796_v45  ;;  %v795_v50 = vld [vmem:[#allocation7 + $0xb0] sm:$0xff]  ;;  %v937_v52 = vunpack.c.l.s8.bf16 %v793_v48  ;;  %v945_v59 = vunpack.c.h.s8.bf16 %v793_v48  ;;  %v836_v48 = vld [vmem:[#allocation7 + $0x1f8] sm:$0xff] }
 0x279   :  { %v939_v53 = vunpack.c.l.s8.bf16 %v795_v50  ;;  %v947_v60 = vunpack.c.h.s8.bf16 %v795_v50 }
 0x27b   :  { %1225 = vmatpush1.bf16.msra.mxu1 %v1133_v55  ;;  %1307 = vmatpush1.bf16.msra.mxu0 %v1135_v56  ;;  %v946_v55 = vunpack.c.h.s8.bf16 %v794_v44  ;;  %v948_v56 = vunpack.c.h.s8.bf16 %v796_v45 }
 0x27c   :  { %v750_v1 = vpop.f32.mrb[8].mxu0  ;;  %1226 = vmatprep.subr.bf16.mxu1 %v1142_v57  ;;  %1308 = vmatprep.subr.bf16.mxu0 %v1144_v58  ;;  %v802_v57 = vld [vmem:[#allocation7 + $0xe8] sm:$0xff]  ;;  %v804_v58 = vld [vmem:[#allocation7 + $0xf8] sm:$0xff] }
 0x27d   :  { %v751_v4 = vadd.f32 %v750_v1, %v346_v61  ;;  %v752_v5 = vpop.f32.mrb[9].mxu0  ;;  %v954_v61 = vunpack.c.l.s8.bf16 %v802_v57 }
 0x27e   :  { %v753_v8 = vadd.f32 %v752_v5, %v350_v62  ;;  %v754_v9 = vpop.f32.mrb[10].mxu0  ;;  %v801_v62 = vld [vmem:[#allocation7 + $0xe0] sm:$0xff]  ;;  %v810_v5 = vld [vmem:[#allocation7 + $0x128] sm:$0xff] }
 0x27f   :  { %vm759_vm6 = vcmp.gt.f32.partialorder %v751_v4, 0.0  ;;  %v763_v10 = vmul.f32 0.2, %v751_v4  ;;  %v755_v11 = vpop.f32.mrb[11].mxu0  ;;  %1227 = vmatpush1.bf16.msra.mxu1 %v1141_v63  ;;  %1309 = vmatpush1.bf16.msra.mxu0 %v1143_v0  ;;  %v956_v63 = vunpack.c.l.s8.bf16 %v804_v58  ;;  %v803_v0 = vld [vmem:[#allocation7 + $0xf0] sm:$0xff]  ;;  %v953_v1 = vunpack.c.l.s8.bf16 %v801_v62 }
 0x280   :  { %vm760_vm7 = vcmp.gt.f32.partialorder %v753_v8, 0.0  ;;  %v764_v14 = vmul.f32 0.2, %v753_v8  ;;  %1228 = vmatprep.subr.bf16.mxu1 %v1150_v2  ;;  %1310 = vmatprep.subr.bf16.mxu0 %v1152_v3  ;;  %v955_v2 = vunpack.c.l.s8.bf16 %v803_v0  ;;  %v962_v3 = vunpack.c.h.s8.bf16 %v802_v57 }
 0x281   :  { %v767_v18 = vsel %vm759_vm6, %v751_v4, %v763_v10  ;;  %v964_v4 = vunpack.c.h.s8.bf16 %v804_v58  ;;  %v961_v7 = vunpack.c.h.s8.bf16 %v801_v62  ;;  %v970_v9 = vunpack.c.l.s8.bf16 %v810_v5  ;;  %v809_v10 = vld [vmem:[#allocation7 + $0x120] sm:$0xff]  ;;  %v844_v62 = vld [vmem:[#allocation7 + $0x238] sm:$0xff] }
 0x282   :  { %v768_v20 = vsel %vm760_vm7, %v753_v8, %v764_v14  ;;  %v3789_v23 = vpack.c.bf16 %v767_v18, %v767_v18  ;;  %v963_v8 = vunpack.c.h.s8.bf16 %v803_v0  ;;  %v972_v11 = vunpack.c.l.s8.bf16 %v812_v6  ;;  %v820_v18 = vld [vmem:[#allocation7 + $0x178] sm:$0xff] }
 0x283   :  { %v3787_v21 = vpack.c.bf16 %v768_v20, %v768_v20  ;;  %1229 = vmatpush1.bf16.msra.mxu1 %v1149_v13  ;;  %1311 = vmatpush1.bf16.msra.mxu0 %v1151_v12  ;;  %v811_v13 = vld [vmem:[#allocation7 + $0x130] sm:$0xff]  ;;  %v969_v12 = vunpack.c.l.s8.bf16 %v809_v10  ;;  %v977_v19 = vunpack.c.h.s8.bf16 %v809_v10  ;;  %v852_v10 = vld [vmem:[#allocation7 + $0x278] sm:$0xff] }
 0x284   :  { %1321 = vmatprep.subr.bf16.mxu1 %v906_v15  ;;  %1403 = vmatprep.subr.bf16.mxu0 %v908_v16  ;;  %v971_v14 = vunpack.c.l.s8.bf16 %v811_v13  ;;  %v978_v15 = vunpack.c.h.s8.bf16 %v810_v5  ;;  %v980_v16 = vunpack.c.h.s8.bf16 %v812_v6  ;;  %v979_v20 = vunpack.c.h.s8.bf16 %v811_v13 }
 0x285   :  { %1230 = vmatprep.mubr.bf16.mxu1 %v3787_v21  ;;  %1312 = vmatprep.mubr.bf16.mxu0 %v3787_v21 }
 0x286   :  { %1231 = vmatmul.mubr.bf16.vlgmr.msra.gmra.mrb[0].mxu1 %v3789_v23  ;;  %1313 = vmatmul.mubr.bf16.vlgmr.msra.gmra.mrb[12].mxu0 %v3789_v23 }
 0x287   :  { %1322 = vmatpush1.bf16.msra.mxu1 %v905_v22  ;;  %1353 = vmatprep.mubr.bf16.mxu1 %v3768_v30  ;;  %v986_v22 = vunpack.c.l.s8.bf16 %v818_v17 }
 0x288   :  { %1404 = vmatpush1.bf16.msra.mxu0 %v907_v25  ;;  %1435 = vmatprep.mubr.bf16.mxu0 %v3768_v30  ;;  %v931_v30 = vunpack.c.h.s8.bf16 %v787_v39  ;;  %v817_v25 = vld [vmem:[#allocation7 + $0x160] sm:$0xff] }
 0x289   :  { %1323 = vmatprep.subr.bf16.mxu1 %v914_v26  ;;  %1405 = vmatprep.subr.bf16.mxu0 %v916_v27  ;;  %v988_v26 = vunpack.c.l.s8.bf16 %v820_v18  ;;  %v819_v27 = vld [vmem:[#allocation7 + $0x170] sm:$0xff]  ;;  %v985_v28 = vunpack.c.l.s8.bf16 %v817_v25 }
 0x28a   :  { %v987_v32 = vunpack.c.l.s8.bf16 %v819_v27  ;;  %v995_v39 = vunpack.c.h.s8.bf16 %v819_v27  ;;  %v857_v27 = vld [vmem:[#allocation7 + $0x2a0] sm:$0xff] }
 0x28b   :  { %1324 = vmatpush1.bf16.msra.mxu1 %v913_v33  ;;  %v994_v33 = vunpack.c.h.s8.bf16 %v818_v17 }
 0x28c   :  { %1406 = vmatpush1.bf16.msra.mxu0 %v915_v35  ;;  %1325 = vmatprep.subr.bf16.mxu1 %v922_v36  ;;  %v996_v35 = vunpack.c.h.s8.bf16 %v820_v18  ;;  %v826_v36 = vld [vmem:[#allocation7 + $0x1a8] sm:$0xff] }
 0x28d   :  { %1407 = vmatprep.subr.bf16.mxu0 %v924_v38  ;;  %v993_v38 = vunpack.c.h.s8.bf16 %v817_v25 }
 0x28f   :  { %1326 = vmatpush1.bf16.msra.mxu1 %v921_v40  ;;  %v1002_v40 = vunpack.c.l.s8.bf16 %v826_v36 }
 0x290   :  { %1408 = vmatpush1.bf16.msra.mxu0 %v923_v41  ;;  %1327 = vmatprep.subr.bf16.mxu1 %v930_v42  ;;  %v825_v41 = vld [vmem:[#allocation7 + $0x1a0] sm:$0xff]  ;;  %v1004_v42 = vunpack.c.l.s8.bf16 %v828_v37 }
 0x291   :  { %1409 = vmatprep.subr.bf16.mxu0 %v932_v43  ;;  %v827_v43 = vld [vmem:[#allocation7 + $0x1b0] sm:$0xff]  ;;  %v1001_v44 = vunpack.c.l.s8.bf16 %v825_v41 }
 0x292   :  { %v1003_v45 = vunpack.c.l.s8.bf16 %v827_v43  ;;  %v1011_v50 = vunpack.c.h.s8.bf16 %v827_v43  ;;  %v865_v43 = vld [vmem:[#allocation7 + $0x2e0] sm:$0xff] }
 0x293   :  { %1328 = vmatpush1.bf16.msra.mxu1 %v929_v46  ;;  %v1010_v46 = vunpack.c.h.s8.bf16 %v826_v36 }
 0x294   :  { %1410 = vmatpush1.bf16.msra.mxu0 %v931_v30  ;;  %1329 = vmatprep.subr.bf16.mxu1 %v938_v47  ;;  %v1012_v30 = vunpack.c.h.s8.bf16 %v828_v37  ;;  %v834_v47 = vld [vmem:[#allocation7 + $0x1e8] sm:$0xff] }
 0x295   :  { %1411 = vmatprep.subr.bf16.mxu0 %v940_v49  ;;  %v1009_v49 = vunpack.c.h.s8.bf16 %v825_v41 }
 0x297   :  { %1330 = vmatpush1.bf16.msra.mxu1 %v937_v52  ;;  %v1018_v52 = vunpack.c.l.s8.bf16 %v834_v47 }
 0x298   :  { %1412 = vmatpush1.bf16.msra.mxu0 %v939_v53  ;;  %1331 = vmatprep.subr.bf16.mxu1 %v946_v55  ;;  %v833_v53 = vld [vmem:[#allocation7 + $0x1e0] sm:$0xff]  ;;  %v1020_v55 = vunpack.c.l.s8.bf16 %v836_v48 }
 0x299   :  { %1413 = vmatprep.subr.bf16.mxu0 %v948_v56  ;;  %v835_v56 = vld [vmem:[#allocation7 + $0x1f0] sm:$0xff]  ;;  %v1017_v57 = vunpack.c.l.s8.bf16 %v833_v53 }
 0x29a   :  { %v1019_v58 = vunpack.c.l.s8.bf16 %v835_v56  ;;  %v1027_v0 = vunpack.c.h.s8.bf16 %v835_v56  ;;  %v873_v56 = vld [vmem:[#allocation7 + $0x320] sm:$0xff] }
 0x29b   :  { %1332 = vmatpush1.bf16.msra.mxu1 %v945_v59  ;;  %v1026_v59 = vunpack.c.h.s8.bf16 %v834_v47 }
 0x29c   :  { %1414 = vmatpush1.bf16.msra.mxu0 %v947_v60  ;;  %1333 = vmatprep.subr.bf16.mxu1 %v954_v61  ;;  %v1028_v60 = vunpack.c.h.s8.bf16 %v836_v48  ;;  %v842_v61 = vld [vmem:[#allocation7 + $0x228] sm:$0xff] }
 0x29d   :  { %1415 = vmatprep.subr.bf16.mxu0 %v956_v63  ;;  %v1025_v63 = vunpack.c.h.s8.bf16 %v833_v53 }
 0x29f   :  { %1334 = vmatpush1.bf16.msra.mxu1 %v953_v1  ;;  %v1034_v1 = vunpack.c.l.s8.bf16 %v842_v61 }
 0x2a0   :  { %1416 = vmatpush1.bf16.msra.mxu0 %v955_v2  ;;  %1335 = vmatprep.subr.bf16.mxu1 %v962_v3  ;;  %v841_v2 = vld [vmem:[#allocation7 + $0x220] sm:$0xff]  ;;  %v1036_v3 = vunpack.c.l.s8.bf16 %v844_v62 }
 0x2a1   :  { %1417 = vmatprep.subr.bf16.mxu0 %v964_v4  ;;  %v843_v4 = vld [vmem:[#allocation7 + $0x230] sm:$0xff]  ;;  %v1033_v5 = vunpack.c.l.s8.bf16 %v841_v2 }
 0x2a2   :  { %v1035_v6 = vunpack.c.l.s8.bf16 %v843_v4  ;;  %v1043_v13 = vunpack.c.h.s8.bf16 %v843_v4  ;;  %v881_v4 = vld [vmem:[#allocation7 + $0x360] sm:$0xff] }
 0x2a3   :  { %1336 = vmatpush1.bf16.msra.mxu1 %v961_v7  ;;  %v1042_v7 = vunpack.c.h.s8.bf16 %v842_v61 }
 0x2a4   :  { %1418 = vmatpush1.bf16.msra.mxu0 %v963_v8  ;;  %1337 = vmatprep.subr.bf16.mxu1 %v970_v9  ;;  %v850_v8 = vld [vmem:[#allocation7 + $0x268] sm:$0xff]  ;;  %v1044_v9 = vunpack.c.h.s8.bf16 %v844_v62 }
 0x2a5   :  { %1419 = vmatprep.subr.bf16.mxu0 %v972_v11  ;;  %v1041_v11 = vunpack.c.h.s8.bf16 %v841_v2 }
 0x2a7   :  { %1338 = vmatpush1.bf16.msra.mxu1 %v969_v12  ;;  %v1050_v12 = vunpack.c.l.s8.bf16 %v850_v8 }
 0x2a8   :  { %1420 = vmatpush1.bf16.msra.mxu0 %v971_v14  ;;  %1339 = vmatprep.subr.bf16.mxu1 %v978_v15  ;;  %v849_v14 = vld [vmem:[#allocation7 + $0x260] sm:$0xff]  ;;  %v1052_v15 = vunpack.c.l.s8.bf16 %v852_v10 }
 0x2a9   :  { %1421 = vmatprep.subr.bf16.mxu0 %v980_v16  ;;  %v851_v16 = vld [vmem:[#allocation7 + $0x270] sm:$0xff]  ;;  %v1049_v17 = vunpack.c.l.s8.bf16 %v849_v14  ;;  %v1057_v25 = vunpack.c.h.s8.bf16 %v849_v14 }
 0x2aa   :  { %v1051_v18 = vunpack.c.l.s8.bf16 %v851_v16 }
 0x2ab   :  { %1340 = vmatpush1.bf16.msra.mxu1 %v977_v19  ;;  %v1060_v19 = vunpack.c.h.s8.bf16 %v852_v10 }
 0x2ac   :  { %1422 = vmatpush1.bf16.msra.mxu0 %v979_v20  ;;  %1341 = vmatprep.subr.bf16.mxu1 %v986_v22  ;;  %v858_v20 = vld [vmem:[#allocation7 + $0x2a8] sm:$0xff]  ;;  %v860_v22 = vld [vmem:[#allocation7 + $0x2b8] sm:$0xff] }
 0x2ad   :  { %1423 = vmatprep.subr.bf16.mxu0 %v988_v26  ;;  %v1059_v26 = vunpack.c.h.s8.bf16 %v851_v16  ;;  %v1074_v36 = vunpack.c.h.s8.bf16 %v858_v20  ;;  %v1076_v37 = vunpack.c.h.s8.bf16 %v860_v22  ;;  %v889_v16 = vld [vmem:[#allocation7 + $0x3a0] sm:$0xff] }
 0x2af   :  { %1342 = vmatpush1.bf16.msra.mxu1 %v985_v28  ;;  %v1068_v28 = vunpack.c.l.s8.bf16 %v860_v22 }
 0x2b0   :  { %1424 = vmatpush1.bf16.msra.mxu0 %v987_v32  ;;  %1343 = vmatprep.subr.bf16.mxu1 %v994_v33  ;;  %v859_v32 = vld [vmem:[#allocation7 + $0x2b0] sm:$0xff]  ;;  %v1065_v33 = vunpack.c.l.s8.bf16 %v857_v27 }
 0x2b1   :  { %1425 = vmatprep.subr.bf16.mxu0 %v996_v35  ;;  %v1067_v35 = vunpack.c.l.s8.bf16 %v859_v32  ;;  %v1075_v41 = vunpack.c.h.s8.bf16 %v859_v32  ;;  %v897_v32 = vld [vmem:[#allocation7 + $0x3e0] sm:$0xff] }
 0x2b3   :  { %1344 = vmatpush1.bf16.msra.mxu1 %v993_v38  ;;  %v866_v38 = vld [vmem:[#allocation7 + $0x2e8] sm:$0xff] }
 0x2b4   :  { %1426 = vmatpush1.bf16.msra.mxu0 %v995_v39  ;;  %1345 = vmatprep.subr.bf16.mxu1 %v1002_v40  ;;  %v868_v39 = vld [vmem:[#allocation7 + $0x2f8] sm:$0xff]  ;;  %v1073_v40 = vunpack.c.h.s8.bf16 %v857_v27  ;;  %v1090_v47 = vunpack.c.h.s8.bf16 %v866_v38 }
 0x2b5   :  { %1427 = vmatprep.subr.bf16.mxu0 %v1004_v42  ;;  %v1082_v42 = vunpack.c.l.s8.bf16 %v866_v38  ;;  %v1092_v48 = vunpack.c.h.s8.bf16 %v868_v39 }
 0x2b7   :  { %1346 = vmatpush1.bf16.msra.mxu1 %v1001_v44  ;;  %v1084_v44 = vunpack.c.l.s8.bf16 %v868_v39 }
 0x2b8   :  { %1428 = vmatpush1.bf16.msra.mxu0 %v1003_v45  ;;  %1347 = vmatprep.subr.bf16.mxu1 %v1010_v46  ;;  %v867_v45 = vld [vmem:[#allocation7 + $0x2f0] sm:$0xff]  ;;  %v1081_v46 = vunpack.c.l.s8.bf16 %v865_v43 }
 0x2b9   :  { %1429 = vmatprep.subr.bf16.mxu0 %v1012_v30  ;;  %v1083_v30 = vunpack.c.l.s8.bf16 %v867_v45  ;;  %v1091_v53 = vunpack.c.h.s8.bf16 %v867_v45  ;;  %v1617_v45 = vld [vmem:[#allocation9] sm:$0xff] }
 0x2bb   :  { %1348 = vmatpush1.bf16.msra.mxu1 %v1009_v49  ;;  %v874_v49 = vld [vmem:[#allocation7 + $0x328] sm:$0xff] }
 0x2bc   :  { %1430 = vmatpush1.bf16.msra.mxu0 %v1011_v50  ;;  %1349 = vmatprep.subr.bf16.mxu1 %v1018_v52  ;;  %v876_v50 = vld [vmem:[#allocation7 + $0x338] sm:$0xff]  ;;  %v1089_v52 = vunpack.c.h.s8.bf16 %v865_v43  ;;  %v1106_v61 = vunpack.c.h.s8.bf16 %v874_v49 }
 0x2bd   :  { %1431 = vmatprep.subr.bf16.mxu0 %v1020_v55  ;;  %v1098_v55 = vunpack.c.l.s8.bf16 %v874_v49  ;;  %v1108_v62 = vunpack.c.h.s8.bf16 %v876_v50 }
 0x2bf   :  { %1350 = vmatpush1.bf16.msra.mxu1 %v1017_v57  ;;  %v1100_v57 = vunpack.c.l.s8.bf16 %v876_v50 }
 0x2c0   :  { %1432 = vmatpush1.bf16.msra.mxu0 %v1019_v58  ;;  %1351 = vmatprep.subr.bf16.mxu1 %v1026_v59  ;;  %v875_v58 = vld [vmem:[#allocation7 + $0x330] sm:$0xff]  ;;  %v1097_v59 = vunpack.c.l.s8.bf16 %v873_v56 }
 0x2c1   :  { %1433 = vmatprep.subr.bf16.mxu0 %v1028_v60  ;;  %v1099_v60 = vunpack.c.l.s8.bf16 %v875_v58  ;;  %v1107_v2 = vunpack.c.h.s8.bf16 %v875_v58  ;;  %v1624_v58 = vld [vmem:[#allocation9 + $0x38] sm:$0xff] }
 0x2c3   :  { %1352 = vmatpush1.bf16.msra.mxu1 %v1025_v63  ;;  %v882_v63 = vld [vmem:[#allocation7 + $0x368] sm:$0xff] }
 0x2c4   :  { %1434 = vmatpush1.bf16.msra.mxu0 %v1027_v0  ;;  %1362 = vmatprep.subr.bf16.mxu1 %v1034_v1  ;;  %v884_v0 = vld [vmem:[#allocation7 + $0x378] sm:$0xff]  ;;  %v1105_v1 = vunpack.c.h.s8.bf16 %v873_v56 }
 0x2c5   :  { %1444 = vmatprep.subr.bf16.mxu0 %v1036_v3  ;;  %v1114_v3 = vunpack.c.l.s8.bf16 %v882_v63  ;;  %v1124_v10 = vunpack.c.h.s8.bf16 %v884_v0 }
 0x2c6   :  { %1354 = vmatmul.mubr.bf16.vlgmr.msra.gmra.mrb[4].mxu1 %v3770_v34 }
 0x2c7   :  { %1436 = vmatmul.mubr.bf16.vlgmr.msra.gmra.mrb[16].mxu0 %v3770_v34  ;;  %1363 = vmatpush1.bf16.msra.mxu1 %v1033_v5  ;;  %v1058_v34 = vunpack.c.h.s8.bf16 %v850_v8  ;;  %v1116_v5 = vunpack.c.l.s8.bf16 %v884_v0 }
 0x2c8   :  { %1394 = vmatprep.mubr.bf16.mxu1 %v3787_v21  ;;  %1445 = vmatpush1.bf16.msra.mxu0 %v1035_v6  ;;  %v883_v6 = vld [vmem:[#allocation7 + $0x370] sm:$0xff] }
 0x2c9   :  { %1476 = vmatprep.mubr.bf16.mxu0 %v3787_v21  ;;  %1364 = vmatprep.subr.bf16.mxu1 %v1042_v7  ;;  %v1066_v21 = vunpack.c.l.s8.bf16 %v858_v20  ;;  %v1113_v7 = vunpack.c.l.s8.bf16 %v881_v4  ;;  %v1115_v8 = vunpack.c.l.s8.bf16 %v883_v6  ;;  %v1123_v14 = vunpack.c.h.s8.bf16 %v883_v6 }
 0x2ca   :  { %1446 = vmatprep.subr.bf16.mxu0 %v1044_v9  ;;  %v1122_v9 = vunpack.c.h.s8.bf16 %v882_v63 }
 0x2cb   :  { %1365 = vmatpush1.bf16.msra.mxu1 %v1041_v11  ;;  %v890_v11 = vld [vmem:[#allocation7 + $0x3a8] sm:$0xff] }
 0x2cc   :  { %1447 = vmatpush1.bf16.msra.mxu0 %v1043_v13  ;;  %1366 = vmatprep.subr.bf16.mxu1 %v1050_v12  ;;  %v892_v13 = vld [vmem:[#allocation7 + $0x3b8] sm:$0xff]  ;;  %v1121_v12 = vunpack.c.h.s8.bf16 %v881_v4  ;;  %v1138_v20 = vunpack.c.h.s8.bf16 %v890_v11 }
 0x2cd   :  { %1448 = vmatprep.subr.bf16.mxu0 %v1052_v15  ;;  %v1130_v15 = vunpack.c.l.s8.bf16 %v890_v11  ;;  %v1140_v22 = vunpack.c.h.s8.bf16 %v892_v13 }
 0x2cf   :  { %1367 = vmatpush1.bf16.msra.mxu1 %v1049_v17  ;;  %v1132_v17 = vunpack.c.l.s8.bf16 %v892_v13  ;;  %v1639_v13 = vld [vmem:[#allocation9 + $0xb0] sm:$0xff] }
 0x2d0   :  { %1449 = vmatpush1.bf16.msra.mxu0 %v1051_v18  ;;  %1368 = vmatprep.subr.bf16.mxu1 %v1058_v34  ;;  %v891_v18 = vld [vmem:[#allocation7 + $0x3b0] sm:$0xff]  ;;  %v1129_v34 = vunpack.c.l.s8.bf16 %v889_v16 }
 0x2d1   :  { %1450 = vmatprep.subr.bf16.mxu0 %v1060_v19  ;;  %v1131_v19 = vunpack.c.l.s8.bf16 %v891_v18  ;;  %v1139_v27 = vunpack.c.h.s8.bf16 %v891_v18 }
 0x2d3   :  { %1369 = vmatpush1.bf16.msra.mxu1 %v1057_v25  ;;  %v898_v25 = vld [vmem:[#allocation7 + $0x3e8] sm:$0xff] }
 0x2d4   :  { %1451 = vmatpush1.bf16.msra.mxu0 %v1059_v26  ;;  %1370 = vmatprep.subr.bf16.mxu1 %v1066_v21  ;;  %v900_v26 = vld [vmem:[#allocation7 + $0x3f8] sm:$0xff]  ;;  %v1137_v21 = vunpack.c.h.s8.bf16 %v889_v16  ;;  %v1154_v38 = vunpack.c.h.s8.bf16 %v898_v25  ;;  %v1884_v16 = vunpack.c.l.s8.bf16 %v1639_v13 }
 0x2d5   :  { %1452 = vmatprep.subr.bf16.mxu0 %v1068_v28  ;;  %v1146_v28 = vunpack.c.l.s8.bf16 %v898_v25  ;;  %v1156_v39 = vunpack.c.h.s8.bf16 %v900_v26 }
 0x2d7   :  { %1371 = vmatpush1.bf16.msra.mxu1 %v1065_v33  ;;  %v1148_v33 = vunpack.c.l.s8.bf16 %v900_v26  ;;  %v1646_v26 = vld [vmem:[#allocation9 + $0xe8] sm:$0xff] }
 0x2d8   :  { %1453 = vmatpush1.bf16.msra.mxu0 %v1067_v35  ;;  %1372 = vmatprep.subr.bf16.mxu1 %v1074_v36  ;;  %v899_v35 = vld [vmem:[#allocation7 + $0x3f0] sm:$0xff]  ;;  %v1145_v36 = vunpack.c.l.s8.bf16 %v897_v32 }
 0x2d9   :  { %1454 = vmatprep.subr.bf16.mxu0 %v1076_v37  ;;  %v1147_v37 = vunpack.c.l.s8.bf16 %v899_v35  ;;  %v1155_v43 = vunpack.c.h.s8.bf16 %v899_v35 }
 0x2db   :  { %1373 = vmatpush1.bf16.msra.mxu1 %v1073_v40  ;;  %v1618_v40 = vld [vmem:[#allocation9 + $0x8] sm:$0xff] }
 0x2dc   :  { %1455 = vmatpush1.bf16.msra.mxu0 %v1075_v41  ;;  %1374 = vmatprep.subr.bf16.mxu1 %v1082_v42  ;;  %v1620_v41 = vld [vmem:[#allocation9 + $0x18] sm:$0xff]  ;;  %v1153_v42 = vunpack.c.h.s8.bf16 %v897_v32  ;;  %v1849_v49 = vunpack.c.h.s8.bf16 %v1618_v40  ;;  %v1898_v32 = vunpack.c.l.s8.bf16 %v1646_v26 }
 0x2dd   :  { %1456 = vmatprep.subr.bf16.mxu0 %v1084_v44  ;;  %v1842_v44 = vunpack.c.l.s8.bf16 %v1618_v40  ;;  %v1851_v50 = vunpack.c.h.s8.bf16 %v1620_v41 }
 0x2df   :  { %1375 = vmatpush1.bf16.msra.mxu1 %v1081_v46  ;;  %v1844_v46 = vunpack.c.l.s8.bf16 %v1620_v41  ;;  %v1653_v41 = vld [vmem:[#allocation9 + $0x120] sm:$0xff] }
 0x2e0   :  { %1457 = vmatpush1.bf16.msra.mxu0 %v1083_v30  ;;  %1376 = vmatprep.subr.bf16.mxu1 %v1090_v47  ;;  %v1619_v30 = vld [vmem:[#allocation9 + $0x10] sm:$0xff]  ;;  %v1841_v47 = vunpack.c.l.s8.bf16 %v1617_v45 }
 0x2e1   :  { %1458 = vmatprep.subr.bf16.mxu0 %v1092_v48  ;;  %v1843_v48 = vunpack.c.l.s8.bf16 %v1619_v30  ;;  %v1850_v56 = vunpack.c.h.s8.bf16 %v1619_v30 }
 0x2e3   :  { %1377 = vmatpush1.bf16.msra.mxu1 %v1089_v52  ;;  %v1625_v52 = vld [vmem:[#allocation9 + $0x40] sm:$0xff] }
 0x2e4   :  { %1459 = vmatpush1.bf16.msra.mxu0 %v1091_v53  ;;  %1378 = vmatprep.subr.bf16.mxu1 %v1098_v55  ;;  %v1627_v53 = vld [vmem:[#allocation9 + $0x50] sm:$0xff]  ;;  %v1848_v55 = vunpack.c.h.s8.bf16 %v1617_v45  ;;  %v1863_v63 = vunpack.c.h.s8.bf16 %v1625_v52  ;;  %v1912_v45 = vunpack.c.l.s8.bf16 %v1653_v41 }
 0x2e5   :  { %1460 = vmatprep.subr.bf16.mxu0 %v1100_v57  ;;  %v1856_v57 = vunpack.c.l.s8.bf16 %v1625_v52  ;;  %v1865_v0 = vunpack.c.h.s8.bf16 %v1627_v53 }
 0x2e7   :  { %1379 = vmatpush1.bf16.msra.mxu1 %v1097_v59  ;;  %v1858_v59 = vunpack.c.l.s8.bf16 %v1627_v53  ;;  %v1660_v53 = vld [vmem:[#allocation9 + $0x158] sm:$0xff] }
 0x2e8   :  { %1461 = vmatpush1.bf16.msra.mxu0 %v1099_v60  ;;  %1380 = vmatprep.subr.bf16.mxu1 %v1106_v61  ;;  %v1626_v60 = vld [vmem:[#allocation9 + $0x48] sm:$0xff]  ;;  %v1855_v61 = vunpack.c.l.s8.bf16 %v1624_v58 }
 0x2e9   :  { %1462 = vmatprep.subr.bf16.mxu0 %v1108_v62  ;;  %v1857_v62 = vunpack.c.l.s8.bf16 %v1626_v60 }
 0x2eb   :  { %1381 = vmatpush1.bf16.msra.mxu1 %v1105_v1  ;;  %v1632_v1 = vld [vmem:[#allocation9 + $0x78] sm:$0xff] }
 0x2ec   :  { %1463 = vmatpush1.bf16.msra.mxu0 %v1107_v2  ;;  %1382 = vmatprep.subr.bf16.mxu1 %v1114_v3  ;;  %v1862_v2 = vunpack.c.h.s8.bf16 %v1624_v58  ;;  %v1864_v3 = vunpack.c.h.s8.bf16 %v1626_v60  ;;  %v1870_v4 = vunpack.c.l.s8.bf16 %v1632_v1  ;;  %v1926_v58 = vunpack.c.l.s8.bf16 %v1660_v53 }
 0x2ed   :  { %1464 = vmatprep.subr.bf16.mxu0 %v1116_v5  ;;  %v1631_v5 = vld [vmem:[#allocation9 + $0x70] sm:$0xff] }
 0x2ef   :  { %1383 = vmatpush1.bf16.msra.mxu1 %v1113_v7  ;;  %v1633_v7 = vld [vmem:[#allocation9 + $0x80] sm:$0xff] }
 0x2f0   :  { %1465 = vmatpush1.bf16.msra.mxu0 %v1115_v8  ;;  %1384 = vmatprep.subr.bf16.mxu1 %v1122_v9  ;;  %v1869_v8 = vunpack.c.l.s8.bf16 %v1631_v5  ;;  %v1871_v9 = vunpack.c.l.s8.bf16 %v1633_v7 }
 0x2f1   :  { %1466 = vmatprep.subr.bf16.mxu0 %v1124_v10  ;;  %v1877_v10 = vunpack.c.h.s8.bf16 %v1632_v1 }
 0x2f3   :  { %1385 = vmatpush1.bf16.msra.mxu1 %v1121_v12  ;;  %v1641_v12 = vld [vmem:[#allocation9 + $0xc0] sm:$0xff] }
 0x2f4   :  { %1467 = vmatpush1.bf16.msra.mxu0 %v1123_v14  ;;  %1386 = vmatprep.subr.bf16.mxu1 %v1130_v15  ;;  %v1876_v14 = vunpack.c.h.s8.bf16 %v1631_v5  ;;  %v1878_v15 = vunpack.c.h.s8.bf16 %v1633_v7  ;;  %v1886_v18 = vunpack.c.l.s8.bf16 %v1641_v12  ;;  %v1893_v25 = vunpack.c.h.s8.bf16 %v1641_v12  ;;  %v3803_v12 = vld [vmem:[#allocation9 + $0x1c8] sm:$0xff] }
 0x2f5   :  { %1468 = vmatprep.subr.bf16.mxu0 %v1132_v17  ;;  %v1638_v17 = vld [vmem:[#allocation9 + $0xa8] sm:$0xff] }
 0x2f7   :  { %1387 = vmatpush1.bf16.msra.mxu1 %v1129_v34  ;;  %v1640_v34 = vld [vmem:[#allocation9 + $0xb8] sm:$0xff] }
 0x2f8   :  { %1469 = vmatpush1.bf16.msra.mxu0 %v1131_v19  ;;  %1388 = vmatprep.subr.bf16.mxu1 %v1138_v20  ;;  %v1883_v19 = vunpack.c.l.s8.bf16 %v1638_v17  ;;  %v1885_v20 = vunpack.c.l.s8.bf16 %v1640_v34 }
 0x2f9   :  { %1470 = vmatprep.subr.bf16.mxu0 %v1140_v22  ;;  %v1891_v22 = vunpack.c.h.s8.bf16 %v1639_v13 }
 0x2fb   :  { %1389 = vmatpush1.bf16.msra.mxu1 %v1137_v21  ;;  %v1648_v21 = vld [vmem:[#allocation9 + $0xf8] sm:$0xff] }
 0x2fc   :  { %1471 = vmatpush1.bf16.msra.mxu0 %v1139_v27  ;;  %1390 = vmatprep.subr.bf16.mxu1 %v1146_v28  ;;  %v1890_v27 = vunpack.c.h.s8.bf16 %v1638_v17  ;;  %v1892_v28 = vunpack.c.h.s8.bf16 %v1640_v34  ;;  %v1900_v35 = vunpack.c.l.s8.bf16 %v1648_v21  ;;  %v1907_v40 = vunpack.c.h.s8.bf16 %v1648_v21  ;;  %v3812_v34 = vld [vmem:[%s3972_s6] sm:$0xff] }
 0x2fd   :  { %1472 = vmatprep.subr.bf16.mxu0 %v1148_v33  ;;  %v1645_v33 = vld [vmem:[#allocation9 + $0xe0] sm:$0xff]  ;;  %v1954_v17 = vunpack.c.l.s8.bf16 %v3803_v12 }
 0x2ff   :  { %1391 = vmatpush1.bf16.msra.mxu1 %v1145_v36  ;;  %v1647_v36 = vld [vmem:[#allocation9 + $0xf0] sm:$0xff] }
 0x300   :  { %1473 = vmatpush1.bf16.msra.mxu0 %v1147_v37  ;;  %1392 = vmatprep.subr.bf16.mxu1 %v1154_v38  ;;  %v1897_v37 = vunpack.c.l.s8.bf16 %v1645_v33  ;;  %v1899_v38 = vunpack.c.l.s8.bf16 %v1647_v36 }
 0x301   :  { %1474 = vmatprep.subr.bf16.mxu0 %v1156_v39  ;;  %v1905_v39 = vunpack.c.h.s8.bf16 %v1646_v26 }
 0x303   :  { %1393 = vmatpush1.bf16.msra.mxu1 %v1153_v42  ;;  %v1655_v42 = vld [vmem:[#allocation9 + $0x130] sm:$0xff] }
 0x304   :  { %1475 = vmatpush1.bf16.msra.mxu0 %v1155_v43  ;;  %2289 = vmatprep.subr.bf16.mxu1 %v1842_v44  ;;  %v1904_v43 = vunpack.c.h.s8.bf16 %v1645_v33  ;;  %v1906_v44 = vunpack.c.h.s8.bf16 %v1647_v36  ;;  %v1914_v30 = vunpack.c.l.s8.bf16 %v1655_v42  ;;  %v1921_v52 = vunpack.c.h.s8.bf16 %v1655_v42 }
 0x305   :  { %2453 = vmatprep.subr.bf16.mxu0 %v1844_v46  ;;  %v1652_v46 = vld [vmem:[#allocation9 + $0x118] sm:$0xff] }
 0x306   :  { %1395 = vmatmul.mubr.bf16.vlgmr.msra.gmra.mrb[4].mxu1 %v3789_v23 }
 0x307   :  { %1477 = vmatmul.mubr.bf16.vlgmr.msra.gmra.mrb[16].mxu0 %v3789_v23  ;;  %2290 = vmatpush1.bf16.msra.mxu1 %v1841_v47  ;;  %v1634_v23 = vld [vmem:[#allocation9 + $0x88] sm:$0xff] }
 0x308   :  { %2454 = vmatpush1.bf16.msra.mxu0 %v1843_v48  ;;  %2291 = vmatprep.subr.bf16.mxu1 %v1849_v49  ;;  %v1872_v6 = vunpack.c.l.s8.bf16 %v1634_v23  ;;  %v1879_v11 = vunpack.c.h.s8.bf16 %v1634_v23  ;;  %v1654_v47 = vld [vmem:[#allocation9 + $0x128] sm:$0xff]  ;;  %v1911_v48 = vunpack.c.l.s8.bf16 %v1652_v46  ;;  %v1667_v23 = vld [vmem:[#allocation9 + $0x190] sm:$0xff] }
 0x309   :  { %2455 = vmatprep.subr.bf16.mxu0 %v1851_v50  ;;  %v1913_v49 = vunpack.c.l.s8.bf16 %v1654_v47  ;;  %v1919_v50 = vunpack.c.h.s8.bf16 %v1653_v41  ;;  %v1940_v5 = vunpack.c.l.s8.bf16 %v1667_v23 }
 0x30b   :  { %2292 = vmatpush1.bf16.msra.mxu1 %v1848_v55  ;;  %v1662_v55 = vld [vmem:[#allocation9 + $0x168] sm:$0xff] }
 0x30c   :  { %2456 = vmatpush1.bf16.msra.mxu0 %v1850_v56  ;;  %2293 = vmatprep.subr.bf16.mxu1 %v1856_v57  ;;  %v1918_v56 = vunpack.c.h.s8.bf16 %v1652_v46  ;;  %v1920_v57 = vunpack.c.h.s8.bf16 %v1654_v47  ;;  %v1928_v60 = vunpack.c.l.s8.bf16 %v1662_v55  ;;  %v1935_v1 = vunpack.c.h.s8.bf16 %v1662_v55  ;;  %v1675_v47 = vld [vmem:[#allocation9 + $0x1d0] sm:$0xff] }
 0x30d   :  { %2457 = vmatprep.subr.bf16.mxu0 %v1858_v59  ;;  %v1659_v59 = vld [vmem:[#allocation9 + $0x150] sm:$0xff] }
 0x30f   :  { %2294 = vmatpush1.bf16.msra.mxu1 %v1855_v61  ;;  %v1661_v61 = vld [vmem:[#allocation9 + $0x160] sm:$0xff] }
 0x310   :  { %2458 = vmatpush1.bf16.msra.mxu0 %v1857_v62  ;;  %2295 = vmatprep.subr.bf16.mxu1 %v1863_v63  ;;  %v1925_v62 = vunpack.c.l.s8.bf16 %v1659_v59  ;;  %v1927_v63 = vunpack.c.l.s8.bf16 %v1661_v61 }
 0x311   :  { %2459 = vmatprep.subr.bf16.mxu0 %v1865_v0  ;;  %v1933_v0 = vunpack.c.h.s8.bf16 %v1660_v53 }
 0x313   :  { %2296 = vmatpush1.bf16.msra.mxu1 %v1862_v2  ;;  %v1669_v2 = vld [vmem:[#allocation9 + $0x1a0] sm:$0xff] }
 0x314   :  { %2460 = vmatpush1.bf16.msra.mxu0 %v1864_v3  ;;  %2297 = vmatprep.subr.bf16.mxu1 %v1870_v4  ;;  %v1932_v3 = vunpack.c.h.s8.bf16 %v1659_v59  ;;  %v1934_v4 = vunpack.c.h.s8.bf16 %v1661_v61  ;;  %v1942_v7 = vunpack.c.l.s8.bf16 %v1669_v2  ;;  %v1949_v13 = vunpack.c.h.s8.bf16 %v1669_v2  ;;  %v1681_v61 = vld [vmem:[#allocation9 + $0x200] sm:$0xff] }
 0x315   :  { %2461 = vmatprep.subr.bf16.mxu0 %v1872_v6  ;;  %v1666_v6 = vld [vmem:[#allocation9 + $0x188] sm:$0xff]  ;;  %v1961_v59 = vunpack.c.h.s8.bf16 %v3803_v12 }
 0x317   :  { %2298 = vmatpush1.bf16.msra.mxu1 %v1869_v8  ;;  %v1668_v8 = vld [vmem:[#allocation9 + $0x198] sm:$0xff] }
 0x318   :  { %2462 = vmatpush1.bf16.msra.mxu0 %v1871_v9  ;;  %2299 = vmatprep.subr.bf16.mxu1 %v1877_v10  ;;  %v1939_v9 = vunpack.c.l.s8.bf16 %v1666_v6  ;;  %v1941_v10 = vunpack.c.l.s8.bf16 %v1668_v8 }
 0x319   :  { %2463 = vmatprep.subr.bf16.mxu0 %v1879_v11  ;;  %v1947_v11 = vunpack.c.h.s8.bf16 %v1667_v23  ;;  %v1968_v23 = vunpack.c.l.s8.bf16 %v1681_v61 }
 0x31b   :  { %2300 = vmatpush1.bf16.msra.mxu1 %v1876_v14  ;;  %v3805_v14 = vld [vmem:[#allocation9 + $0x1d8] sm:$0xff] }
 0x31c   :  { %2464 = vmatpush1.bf16.msra.mxu0 %v1878_v15  ;;  %2301 = vmatprep.subr.bf16.mxu1 %v1884_v16  ;;  %v1946_v15 = vunpack.c.h.s8.bf16 %v1666_v6  ;;  %v1948_v16 = vunpack.c.h.s8.bf16 %v1668_v8 }
 0x31d   :  { %2465 = vmatprep.subr.bf16.mxu0 %v1886_v18  ;;  %v1956_v18 = vunpack.c.l.s8.bf16 %v3805_v14 }
 0x31f   :  { %2302 = vmatpush1.bf16.msra.mxu1 %v1883_v19  ;;  %v3817_v19 = vld [vmem:[%s3973_s7] sm:$0xff] }
 0x320   :  { %2466 = vmatpush1.bf16.msra.mxu0 %v1885_v20  ;;  %2303 = vmatprep.subr.bf16.mxu1 %v1891_v22  ;;  %v1490_v20 = vrot.slane %v3812_v34, %v3745_v29  ;;  %v1494_v22 = vrot.slane %v3812_v34, %v3751_v31  ;;  %v1540_v26 = vrot.slane %v3817_v19, %v3745_v29 }
 0x321   :  { %2467 = vmatprep.subr.bf16.mxu0 %v1893_v25  ;;  %v1502_v25 = vrot.slane %v3812_v34, %v3781_v54 }
 0x323   :  { %2304 = vmatpush1.bf16.msra.mxu1 %v1890_v27 }
 0x324   :  { %2468 = vmatpush1.bf16.msra.mxu0 %v1892_v28  ;;  %2305 = vmatprep.subr.bf16.mxu1 %v1898_v32  ;;  %v1544_v28 = vrot.slane %v3817_v19, %v3751_v31  ;;  %v1552_v32 = vrot.slane %v3817_v19, %v3781_v54 }
 0x325   :  { %2469 = vmatprep.subr.bf16.mxu0 %v1900_v35 }
 0x327   :  { %2306 = vmatpush1.bf16.msra.mxu1 %v1897_v37 }
 0x328   :  { %2470 = vmatpush1.bf16.msra.mxu0 %v1899_v38  ;;  %2307 = vmatprep.subr.bf16.mxu1 %v1905_v39 }
 0x329   :  { %2471 = vmatprep.subr.bf16.mxu0 %v1907_v40 }
 0x32b   :  { %2308 = vmatpush1.bf16.msra.mxu1 %v1904_v43 }
 0x32c   :  { %2472 = vmatpush1.bf16.msra.mxu0 %v1906_v44  ;;  %2309 = vmatprep.subr.bf16.mxu1 %v1912_v45 }
 0x32d   :  { %2473 = vmatprep.subr.bf16.mxu0 %v1914_v30  ;;  %v1673_v30 = vld [vmem:[#allocation9 + $0x1c0] sm:$0xff] }
 0x32f   :  { %2310 = vmatpush1.bf16.msra.mxu1 %v1911_v48 }
 0x330   :  { %2474 = vmatpush1.bf16.msra.mxu0 %v1913_v49  ;;  %2311 = vmatprep.subr.bf16.mxu1 %v1919_v50 }
 0x331   :  { %2475 = vmatprep.subr.bf16.mxu0 %v1921_v52 }
 0x333   :  { %2312 = vmatpush1.bf16.msra.mxu1 %v1918_v56  ;;  %v1953_v56 = vunpack.c.l.s8.bf16 %v1673_v30 }
 0x334   :  { %2476 = vmatpush1.bf16.msra.mxu0 %v1920_v57  ;;  %2313 = vmatprep.subr.bf16.mxu1 %v1926_v58  ;;  %v1955_v57 = vunpack.c.l.s8.bf16 %v1675_v47 }
 0x335   :  { %2477 = vmatprep.subr.bf16.mxu0 %v1928_v60  ;;  %v1963_v60 = vunpack.c.h.s8.bf16 %v3805_v14 }
 0x337   :  { %2314 = vmatpush1.bf16.msra.mxu1 %v1925_v62  ;;  %v1683_v62 = vld [vmem:[#allocation9 + $0x210] sm:$0xff] }
 0x338   :  { %2478 = vmatpush1.bf16.msra.mxu0 %v1927_v63  ;;  %2315 = vmatprep.subr.bf16.mxu1 %v1933_v0  ;;  %v1960_v0 = vunpack.c.h.s8.bf16 %v1673_v30  ;;  %v1970_v2 = vunpack.c.l.s8.bf16 %v1683_v62  ;;  %v1977_v8 = vunpack.c.h.s8.bf16 %v1683_v62  ;;  %v1701_v30 = vld [vmem:[#allocation9 + $0x2a0] sm:$0xff]  ;;  %v1708_v62 = vld [vmem:[#allocation9 + $0x2d8] sm:$0xff] }
 0x339   :  { %2479 = vmatprep.subr.bf16.mxu0 %v1935_v1  ;;  %v1962_v1 = vunpack.c.h.s8.bf16 %v1675_v47  ;;  %v1703_v47 = vld [vmem:[#allocation9 + $0x2b0] sm:$0xff] }
 0x33b   :  { %2316 = vmatpush1.bf16.msra.mxu1 %v1932_v3  ;;  %v1680_v3 = vld [vmem:[#allocation9 + $0x1f8] sm:$0xff] }
 0x33c   :  { %2480 = vmatpush1.bf16.msra.mxu0 %v1934_v4  ;;  %2317 = vmatprep.subr.bf16.mxu1 %v1940_v5  ;;  %v1682_v4 = vld [vmem:[#allocation9 + $0x208] sm:$0xff]  ;;  %v1967_v5 = vunpack.c.l.s8.bf16 %v1680_v3 }
 0x33d   :  { %2481 = vmatprep.subr.bf16.mxu0 %v1942_v7  ;;  %v1969_v6 = vunpack.c.l.s8.bf16 %v1682_v4  ;;  %v1975_v7 = vunpack.c.h.s8.bf16 %v1681_v61 }
 0x33f   :  { %2318 = vmatpush1.bf16.msra.mxu1 %v1939_v9  ;;  %v1688_v9 = vld [vmem:[#allocation9 + $0x238] sm:$0xff] }
 0x340   :  { %2482 = vmatpush1.bf16.msra.mxu0 %v1941_v10  ;;  %2319 = vmatprep.subr.bf16.mxu1 %v1947_v11  ;;  %v1690_v10 = vld [vmem:[#allocation9 + $0x248] sm:$0xff]  ;;  %v1974_v11 = vunpack.c.h.s8.bf16 %v1680_v3  ;;  %v1982_v12 = vunpack.c.l.s8.bf16 %v1688_v9 }
 0x341   :  { %2483 = vmatprep.subr.bf16.mxu0 %v1949_v13  ;;  %v1976_v13 = vunpack.c.h.s8.bf16 %v1682_v4  ;;  %v1984_v14 = vunpack.c.l.s8.bf16 %v1690_v10  ;;  %v1716_v4 = vld [vmem:[#allocation9 + $0x318] sm:$0xff] }
 0x343   :  { %2320 = vmatpush1.bf16.msra.mxu1 %v1946_v15  ;;  %v1687_v15 = vld [vmem:[#allocation9 + $0x230] sm:$0xff] }
 0x344   :  { %2484 = vmatpush1.bf16.msra.mxu0 %v1948_v16  ;;  %2330 = vmatprep.subr.bf16.mxu1 %v1954_v17  ;;  %v1689_v16 = vld [vmem:[#allocation9 + $0x240] sm:$0xff]  ;;  %v1981_v17 = vunpack.c.l.s8.bf16 %v1687_v15 }
 0x345   :  { %2494 = vmatprep.subr.bf16.mxu0 %v1956_v18  ;;  %v1983_v18 = vunpack.c.l.s8.bf16 %v1689_v16 }
 0x359   :  { %v1232_v21 = vpop.f32.mrb[0].mxu1  ;;  %v3827_v27 = vpop.f32.mrb[12].mxu0 }
 0x35a   :  { %v1527_v33 = vmul.f32 %v1490_v20, %v1232_v21  ;;  %v1234_v35 = vpop.f32.mrb[1].mxu1  ;;  %v1316_v36 = vpop.f32.mrb[13].mxu0  ;;  %v1989_v20 = vunpack.c.h.s8.bf16 %v1688_v9  ;;  %v1988_v21 = vunpack.c.h.s8.bf16 %v1687_v15  ;;  %v2045_v15 = vunpack.c.h.s8.bf16 %v1716_v4 }
 0x35b   :  { %v1528_v37 = vmul.f32 %v1494_v22, %v1234_v35  ;;  %v1530_v38 = vmul.f32 %v1502_v25, %v1316_v36  ;;  %v1236_v39 = vpop.f32.mrb[2].mxu1  ;;  %v1318_v40 = vpop.f32.mrb[14].mxu0  ;;  %v1991_v22 = vunpack.c.h.s8.bf16 %v1690_v10  ;;  %v1695_v25 = vld [vmem:[#allocation9 + $0x270] sm:$0xff]  ;;  %v1694_v35 = vld [vmem:[#allocation9 + $0x268] sm:$0xff]  ;;  %v1696_v36 = vld [vmem:[#allocation9 + $0x278] sm:$0xff] }
 0x35c   :  { %v1577_v41 = vadd.f32 %v1540_v26, %v1527_v33  ;;  %v1237_v42 = vpop.f32.mrb[3].mxu1  ;;  %v1319_v43 = vpop.f32.mrb[15].mxu0  ;;  %v1697_v26 = vld [vmem:[#allocation9 + $0x280] sm:$0xff]  ;;  %v2003_v39 = vunpack.c.h.s8.bf16 %v1695_v25  ;;  %v1715_v10 = vld [vmem:[#allocation9 + $0x310] sm:$0xff] }
 0x35d   :  { %v1578_v44 = vadd.f32 %v1544_v28, %v1528_v37  ;;  %v1580_v45 = vadd.f32 %v1552_v32, %v1530_v38  ;;  %v1990_v28 = vunpack.c.h.s8.bf16 %v1689_v16  ;;  %v1996_v32 = vunpack.c.l.s8.bf16 %v1695_v25  ;;  %v1704_v42 = vld [vmem:[#allocation9 + $0x2b8] sm:$0xff] }
 0x35e   :  { %vm1585_vm8 = vcmp.gt.f32.partialorder %v1577_v41, 0.0  ;;  %v1593_v46 = vmul.f32 0.2, %v1577_v41  ;;  %v1998_v33 = vunpack.c.l.s8.bf16 %v1697_v26  ;;  %v1995_v37 = vunpack.c.l.s8.bf16 %v1694_v35 }
 0x35f   :  { %vm1586_vm9 = vcmp.gt.f32.partialorder %v1578_v44, 0.0  ;;  %v1594_v48 = vmul.f32 0.2, %v1578_v44  ;;  %vm1588_vm10 = vcmp.gt.f32.partialorder %v1580_v45, 0.0  ;;  %v1596_v49 = vmul.f32 0.2, %v1580_v45 }
 0x360   :  { %v1601_v50 = vsel %vm1585_vm8, %v1577_v41, %v1593_v46  ;;  %v1997_v38 = vunpack.c.l.s8.bf16 %v1696_v36  ;;  %v2005_v40 = vunpack.c.h.s8.bf16 %v1697_v26  ;;  %v1702_v41 = vld [vmem:[#allocation9 + $0x2a8] sm:$0xff]  ;;  %v2002_v43 = vunpack.c.h.s8.bf16 %v1694_v35 }
 0x361   :  { %v1602_v52 = vsel %vm1586_vm9, %v1578_v44, %v1594_v48  ;;  %v1604_v55 = vsel %vm1588_vm10, %v1580_v45, %v1596_v49  ;;  %v3835_v58 = vpack.c.bf16 %v1601_v50, %v1601_v50  ;;  %v2004_v44 = vunpack.c.h.s8.bf16 %v1696_v36 }
 0x362   :  { %v3833_v53 = vpack.c.bf16 %v1602_v52, %v1602_v52  ;;  %v3841_v63 = vpack.c.bf16 %v1604_v55, %v1604_v55  ;;  %v2010_v45 = vunpack.c.l.s8.bf16 %v1702_v41  ;;  %v2012_v46 = vunpack.c.l.s8.bf16 %v1704_v42  ;;  %v1709_v55 = vld [vmem:[#allocation9 + $0x2e0] sm:$0xff] }
 0x363   :  { %v2009_v48 = vunpack.c.l.s8.bf16 %v1701_v30  ;;  %v2011_v49 = vunpack.c.l.s8.bf16 %v1703_v47  ;;  %v2017_v50 = vunpack.c.h.s8.bf16 %v1702_v41  ;;  %v2019_v52 = vunpack.c.h.s8.bf16 %v1704_v42  ;;  %v1732_v41 = vld [vmem:[#allocation9 + $0x398] sm:$0xff] }
 0x364   :  { %2321 = vmatprep.mubr.bf16.mxu1 %v3833_v53  ;;  %2485 = vmatprep.mubr.bf16.mxu0 %v3833_v53  ;;  %v2044_v25 = vunpack.c.h.s8.bf16 %v1715_v10 }
 0x365   :  { %2322 = vmatmul.mubr.bf16.vlgmr.msra.gmra.mrb[8].mxu1 %v3835_v58  ;;  %2486 = vmatmul.mubr.bf16.vlgmr.msra.gmra.mrb[20].mxu0 %v3835_v58 }
 0x366   :  { %2331 = vmatpush1.bf16.msra.mxu1 %v1953_v56  ;;  %2495 = vmatpush1.bf16.msra.mxu0 %v1955_v57  ;;  %v1711_v56 = vld [vmem:[#allocation9 + $0x2f0] sm:$0xff]  ;;  %v2016_v57 = vunpack.c.h.s8.bf16 %v1701_v30 }
 0x367   :  { %2362 = vmatprep.mubr.bf16.mxu1 %v3841_v63  ;;  %2526 = vmatprep.mubr.bf16.mxu0 %v3841_v63  ;;  %v2026_v61 = vunpack.c.l.s8.bf16 %v1711_v56  ;;  %v2033_v3 = vunpack.c.h.s8.bf16 %v1711_v56  ;;  %v1731_v30 = vld [vmem:[#allocation9 + $0x390] sm:$0xff]  ;;  %v1737_v56 = vld [vmem:[#allocation9 + $0x3c0] sm:$0xff] }
 0x368   :  { %2332 = vmatprep.subr.bf16.mxu1 %v1961_v59  ;;  %2496 = vmatprep.subr.bf16.mxu0 %v1963_v60  ;;  %v2018_v59 = vunpack.c.h.s8.bf16 %v1703_v47  ;;  %v2024_v60 = vunpack.c.l.s8.bf16 %v1709_v55 }
 0x36a   :  { %2333 = vmatpush1.bf16.msra.mxu1 %v1960_v0  ;;  %2497 = vmatpush1.bf16.msra.mxu0 %v1962_v1  ;;  %v1710_v0 = vld [vmem:[#allocation9 + $0x2e8] sm:$0xff]  ;;  %v2023_v1 = vunpack.c.l.s8.bf16 %v1708_v62 }
 0x36b   :  { %2334 = vmatprep.subr.bf16.mxu1 %v1968_v23  ;;  %2498 = vmatprep.subr.bf16.mxu0 %v1970_v2  ;;  %v2025_v23 = vunpack.c.l.s8.bf16 %v1710_v0  ;;  %v2031_v2 = vunpack.c.h.s8.bf16 %v1709_v55  ;;  %v2075_v55 = vunpack.c.h.s8.bf16 %v1732_v41 }
 0x36e   :  { %2335 = vmatpush1.bf16.msra.mxu1 %v1967_v5  ;;  %2499 = vmatpush1.bf16.msra.mxu0 %v1969_v6  ;;  %v1718_v5 = vld [vmem:[#allocation9 + $0x328] sm:$0xff]  ;;  %v2030_v6 = vunpack.c.h.s8.bf16 %v1708_v62 }
 0x36f   :  { %2336 = vmatprep.subr.bf16.mxu1 %v1975_v7  ;;  %2500 = vmatprep.subr.bf16.mxu0 %v1977_v8  ;;  %v2032_v7 = vunpack.c.h.s8.bf16 %v1710_v0  ;;  %v2038_v8 = vunpack.c.l.s8.bf16 %v1716_v4  ;;  %v2040_v9 = vunpack.c.l.s8.bf16 %v1718_v5  ;;  %v2047_v16 = vunpack.c.h.s8.bf16 %v1718_v5  ;;  %v1736_v0 = vld [vmem:[#allocation9 + $0x3b8] sm:$0xff] }
 0x370   :  { %v1744_v5 = vld [vmem:[#allocation9 + $0x3f8] sm:$0xff] }
 0x372   :  { %2337 = vmatpush1.bf16.msra.mxu1 %v1974_v11  ;;  %2501 = vmatpush1.bf16.msra.mxu0 %v1976_v13  ;;  %v1717_v11 = vld [vmem:[#allocation9 + $0x320] sm:$0xff]  ;;  %v1498_v13 = vrot.slane %v3812_v34, %v3778_v51 }
 0x373   :  { %2338 = vmatprep.subr.bf16.mxu1 %v1982_v12  ;;  %2502 = vmatprep.subr.bf16.mxu0 %v1984_v14  ;;  %v2037_v12 = vunpack.c.l.s8.bf16 %v1715_v10  ;;  %v2039_v14 = vunpack.c.l.s8.bf16 %v1717_v11  ;;  %v2046_v26 = vunpack.c.h.s8.bf16 %v1717_v11  ;;  %v1743_v11 = vld [vmem:[#allocation9 + $0x3f0] sm:$0xff] }
 0x376   :  { %2339 = vmatpush1.bf16.msra.mxu1 %v1981_v17  ;;  %2503 = vmatpush1.bf16.msra.mxu0 %v1983_v18  ;;  %v1529_v17 = vmul.f32 %v1498_v13, %v3827_v27  ;;  %v1548_v18 = vrot.slane %v3817_v19, %v3778_v51  ;;  %v1745_v13 = vld [vmem:[#allocation9 + $0x400] sm:$0xff] }
 0x377   :  { %2340 = vmatprep.subr.bf16.mxu1 %v1989_v20  ;;  %2504 = vmatprep.subr.bf16.mxu0 %v1991_v22  ;;  %v1723_v20 = vld [vmem:[#allocation9 + $0x350] sm:$0xff]  ;;  %v1725_v22 = vld [vmem:[#allocation9 + $0x360] sm:$0xff] }
 0x378   :  { %v1579_v35 = vadd.f32 %v1548_v18, %v1529_v17  ;;  %v1751_v17 = vld [vmem:[#allocation9 + $0x430] sm:$0xff]  ;;  %v1753_v18 = vld [vmem:[#allocation9 + $0x440] sm:$0xff] }
 0x37a   :  { %2341 = vmatpush1.bf16.msra.mxu1 %v1988_v21  ;;  %2505 = vmatpush1.bf16.msra.mxu0 %v1990_v28  ;;  %v2052_v21 = vunpack.c.l.s8.bf16 %v1723_v20  ;;  %v2054_v28 = vunpack.c.l.s8.bf16 %v1725_v22  ;;  %vm1587_vm11 = vcmp.gt.f32.partialorder %v1579_v35, 0.0 }
 0x37b   :  { %2342 = vmatprep.subr.bf16.mxu1 %v1996_v32  ;;  %2506 = vmatprep.subr.bf16.mxu0 %v1998_v33  ;;  %v1722_v32 = vld [vmem:[#allocation9 + $0x348] sm:$0xff]  ;;  %v1724_v33 = vld [vmem:[#allocation9 + $0x358] sm:$0xff] }
 0x37c   :  { %v2051_v36 = vunpack.c.l.s8.bf16 %v1722_v32  ;;  %v2053_v27 = vunpack.c.l.s8.bf16 %v1724_v33  ;;  %v2058_v42 = vunpack.c.h.s8.bf16 %v1722_v32 }
 0x37e   :  { %2343 = vmatpush1.bf16.msra.mxu1 %v1995_v37  ;;  %2507 = vmatpush1.bf16.msra.mxu0 %v1997_v38  ;;  %v2059_v37 = vunpack.c.h.s8.bf16 %v1723_v20  ;;  %v2061_v38 = vunpack.c.h.s8.bf16 %v1725_v22  ;;  %v2100_v20 = vunpack.c.h.s8.bf16 %v1743_v11  ;;  %v2102_v22 = vunpack.c.h.s8.bf16 %v1745_v13 }
 0x37f   :  { %2344 = vmatprep.subr.bf16.mxu1 %v2003_v39  ;;  %2508 = vmatprep.subr.bf16.mxu0 %v2005_v40  ;;  %v1595_v39 = vmul.f32 0.2, %v1579_v35  ;;  %v1730_v40 = vld [vmem:[#allocation9 + $0x388] sm:$0xff] }
 0x381   :  { %v1603_v47 = vsel %vm1587_vm11, %v1579_v35, %v1595_v39  ;;  %v2115_v35 = vunpack.c.h.s8.bf16 %v1751_v17 }
 0x382   :  { %2345 = vmatpush1.bf16.msra.mxu1 %v2002_v43  ;;  %2509 = vmatpush1.bf16.msra.mxu0 %v2004_v44  ;;  %v2060_v43 = vunpack.c.h.s8.bf16 %v1724_v33  ;;  %v2066_v44 = vunpack.c.l.s8.bf16 %v1730_v40 }
 0x383   :  { %2346 = vmatprep.subr.bf16.mxu1 %v2010_v45  ;;  %2510 = vmatprep.subr.bf16.mxu0 %v2012_v46  ;;  %v2068_v45 = vunpack.c.l.s8.bf16 %v1732_v41  ;;  %v1729_v46 = vld [vmem:[#allocation9 + $0x380] sm:$0xff] }
 0x386   :  { %2347 = vmatpush1.bf16.msra.mxu1 %v2009_v48  ;;  %2511 = vmatpush1.bf16.msra.mxu0 %v2011_v49  ;;  %v2065_v48 = vunpack.c.l.s8.bf16 %v1729_v46  ;;  %v2067_v49 = vunpack.c.l.s8.bf16 %v1731_v30 }
 0x387   :  { %2348 = vmatprep.subr.bf16.mxu1 %v2017_v50  ;;  %2512 = vmatprep.subr.bf16.mxu0 %v2019_v52  ;;  %v3852_v50 = vpack.c.bf16 %v1603_v47, %v1603_v47  ;;  %v2073_v52 = vunpack.c.h.s8.bf16 %v1730_v40  ;;  %v1765_v47 = vld [vmem:[#allocation9 + $0x4a0] sm:$0xff] }
 0x38a   :  { %2349 = vmatpush1.bf16.msra.mxu1 %v2016_v57  ;;  %2513 = vmatpush1.bf16.msra.mxu0 %v2018_v59  ;;  %v1739_v57 = vld [vmem:[#allocation9 + $0x3d0] sm:$0xff]  ;;  %v2072_v59 = vunpack.c.h.s8.bf16 %v1729_v46 }
 0x38b   :  { %2350 = vmatprep.subr.bf16.mxu1 %v2024_v60  ;;  %2514 = vmatprep.subr.bf16.mxu0 %v2026_v61  ;;  %v2074_v60 = vunpack.c.h.s8.bf16 %v1731_v30  ;;  %v2080_v61 = vunpack.c.l.s8.bf16 %v1737_v56  ;;  %v2082_v62 = vunpack.c.l.s8.bf16 %v1739_v57  ;;  %v2089_v4 = vunpack.c.h.s8.bf16 %v1739_v57  ;;  %v1764_v57 = vld [vmem:[#allocation9 + $0x498] sm:$0xff] }
 0x38e   :  { %2351 = vmatpush1.bf16.msra.mxu1 %v2023_v1  ;;  %2515 = vmatpush1.bf16.msra.mxu0 %v2025_v23  ;;  %v1738_v1 = vld [vmem:[#allocation9 + $0x3c8] sm:$0xff]  ;;  %v2079_v23 = vunpack.c.l.s8.bf16 %v1736_v0 }
 0x38f   :  { %2352 = vmatprep.subr.bf16.mxu1 %v2031_v2  ;;  %2516 = vmatprep.subr.bf16.mxu0 %v2033_v3  ;;  %v2081_v2 = vunpack.c.l.s8.bf16 %v1738_v1  ;;  %v2087_v3 = vunpack.c.h.s8.bf16 %v1737_v56 }
 0x392   :  { %2353 = vmatpush1.bf16.msra.mxu1 %v2030_v6  ;;  %2517 = vmatpush1.bf16.msra.mxu0 %v2032_v7  ;;  %v1746_v6 = vld [vmem:[#allocation9 + $0x408] sm:$0xff]  ;;  %v2086_v7 = vunpack.c.h.s8.bf16 %v1736_v0 }
 0x393   :  { %2354 = vmatprep.subr.bf16.mxu1 %v2038_v8  ;;  %2518 = vmatprep.subr.bf16.mxu0 %v2040_v9  ;;  %v2088_v8 = vunpack.c.h.s8.bf16 %v1738_v1  ;;  %v2094_v9 = vunpack.c.l.s8.bf16 %v1744_v5  ;;  %v2096_v10 = vunpack.c.l.s8.bf16 %v1746_v6  ;;  %v1772_v1 = vld [vmem:[#allocation9 + $0x4d8] sm:$0xff] }
 0x396   :  { %2355 = vmatpush1.bf16.msra.mxu1 %v2037_v12  ;;  %2519 = vmatpush1.bf16.msra.mxu0 %v2039_v14  ;;  %v2093_v12 = vunpack.c.l.s8.bf16 %v1743_v11  ;;  %v2095_v14 = vunpack.c.l.s8.bf16 %v1745_v13  ;;  %v2157_v11 = vunpack.c.h.s8.bf16 %v1772_v1 }
 0x397   :  { %2356 = vmatprep.subr.bf16.mxu1 %v2045_v15  ;;  %2520 = vmatprep.subr.bf16.mxu0 %v2047_v16  ;;  %v2101_v15 = vunpack.c.h.s8.bf16 %v1744_v5  ;;  %v2103_v16 = vunpack.c.h.s8.bf16 %v1746_v6  ;;  %v1771_v6 = vld [vmem:[#allocation9 + $0x4d0] sm:$0xff] }
 0x39a   :  { %2357 = vmatpush1.bf16.msra.mxu1 %v2044_v25  ;;  %2521 = vmatpush1.bf16.msra.mxu0 %v2046_v26  ;;  %v2108_v25 = vunpack.c.l.s8.bf16 %v1751_v17  ;;  %v2110_v26 = vunpack.c.l.s8.bf16 %v1753_v18 }
 0x39b   :  { %2358 = vmatprep.subr.bf16.mxu1 %v2052_v21  ;;  %2522 = vmatprep.subr.bf16.mxu0 %v2054_v28  ;;  %v1750_v21 = vld [vmem:[#allocation9 + $0x428] sm:$0xff]  ;;  %v1752_v28 = vld [vmem:[#allocation9 + $0x438] sm:$0xff] }
 0x39c   :  { %v2107_v32 = vunpack.c.l.s8.bf16 %v1750_v21  ;;  %v2109_v33 = vunpack.c.l.s8.bf16 %v1752_v28  ;;  %v2116_v39 = vunpack.c.h.s8.bf16 %v1752_v28  ;;  %v1780_v28 = vld [vmem:[#allocation9 + $0x518] sm:$0xff] }
 0x39e   :  { %2359 = vmatpush1.bf16.msra.mxu1 %v2051_v36  ;;  %2523 = vmatpush1.bf16.msra.mxu0 %v2053_v27  ;;  %v2117_v36 = vunpack.c.h.s8.bf16 %v1753_v18  ;;  %v1758_v27 = vld [vmem:[#allocation9 + $0x468] sm:$0xff]  ;;  %v2156_v18 = vunpack.c.h.s8.bf16 %v1771_v6 }
 0x39f   :  { %2360 = vmatprep.subr.bf16.mxu1 %v2059_v37  ;;  %2524 = vmatprep.subr.bf16.mxu0 %v2061_v38  ;;  %v1760_v37 = vld [vmem:[#allocation9 + $0x478] sm:$0xff]  ;;  %v2114_v38 = vunpack.c.h.s8.bf16 %v1750_v21  ;;  %v2122_v40 = vunpack.c.l.s8.bf16 %v1758_v27  ;;  %v2129_v46 = vunpack.c.h.s8.bf16 %v1758_v27  ;;  %v1778_v21 = vld [vmem:[#allocation9 + $0x508] sm:$0xff] }
 0x3a0   :  { %v2124_v41 = vunpack.c.l.s8.bf16 %v1760_v37  ;;  %v2131_v30 = vunpack.c.h.s8.bf16 %v1760_v37 }
 0x3a2   :  { %2361 = vmatpush1.bf16.msra.mxu1 %v2058_v42  ;;  %2525 = vmatpush1.bf16.msra.mxu0 %v2060_v43  ;;  %v1757_v42 = vld [vmem:[#allocation9 + $0x460] sm:$0xff]  ;;  %v1759_v43 = vld [vmem:[#allocation9 + $0x470] sm:$0xff] }
 0x3a3   :  { %2371 = vmatprep.subr.bf16.mxu1 %v2066_v44  ;;  %2535 = vmatprep.subr.bf16.mxu0 %v2068_v45  ;;  %v2121_v44 = vunpack.c.l.s8.bf16 %v1757_v42  ;;  %v2123_v45 = vunpack.c.l.s8.bf16 %v1759_v43 }
 0x3a5   :  { %2363 = vmatmul.mubr.bf16.vlgmr.msra.gmra.mrb[8].mxu1 %v3852_v50  ;;  %2527 = vmatmul.mubr.bf16.vlgmr.msra.gmra.mrb[20].mxu0 %v3852_v50 }
 0x3a6   :  { %2372 = vmatpush1.bf16.msra.mxu1 %v2065_v48  ;;  %2536 = vmatpush1.bf16.msra.mxu0 %v2067_v49  ;;  %v1767_v48 = vld [vmem:[#allocation9 + $0x4b0] sm:$0xff]  ;;  %v2128_v49 = vunpack.c.h.s8.bf16 %v1757_v42 }
 0x3a7   :  { %2373 = vmatprep.subr.bf16.mxu1 %v2073_v52  ;;  %2537 = vmatprep.subr.bf16.mxu0 %v2075_v55  ;;  %v2130_v52 = vunpack.c.h.s8.bf16 %v1759_v43  ;;  %v2136_v55 = vunpack.c.l.s8.bf16 %v1765_v47  ;;  %v2138_v56 = vunpack.c.l.s8.bf16 %v1767_v48  ;;  %v2145_v0 = vunpack.c.h.s8.bf16 %v1767_v48 }
 0x3aa   :  { %2374 = vmatpush1.bf16.msra.mxu1 %v2072_v59  ;;  %2538 = vmatpush1.bf16.msra.mxu0 %v2074_v60  ;;  %v1766_v59 = vld [vmem:[#allocation9 + $0x4a8] sm:$0xff]  ;;  %v2135_v60 = vunpack.c.l.s8.bf16 %v1764_v57 }
 0x3ab   :  { %2375 = vmatprep.subr.bf16.mxu1 %v2080_v61  ;;  %2539 = vmatprep.subr.bf16.mxu0 %v2082_v62  ;;  %v2137_v61 = vunpack.c.l.s8.bf16 %v1766_v59  ;;  %v2143_v62 = vunpack.c.h.s8.bf16 %v1765_v47 }
 0x3ae   :  { %2376 = vmatpush1.bf16.msra.mxu1 %v2079_v23  ;;  %2540 = vmatpush1.bf16.msra.mxu0 %v2081_v2  ;;  %v1774_v23 = vld [vmem:[#allocation9 + $0x4e8] sm:$0xff]  ;;  %v2142_v2 = vunpack.c.h.s8.bf16 %v1764_v57  ;;  %v2170_v57 = vunpack.c.h.s8.bf16 %v1778_v21 }
 0x3af   :  { %2377 = vmatprep.subr.bf16.mxu1 %v2087_v3  ;;  %2541 = vmatprep.subr.bf16.mxu0 %v2089_v4  ;;  %v2144_v3 = vunpack.c.h.s8.bf16 %v1766_v59  ;;  %v2150_v4 = vunpack.c.l.s8.bf16 %v1772_v1  ;;  %v2152_v5 = vunpack.c.l.s8.bf16 %v1774_v23  ;;  %v2159_v13 = vunpack.c.h.s8.bf16 %v1774_v23  ;;  %v1785_v1 = vld [vmem:[#allocation9 + $0x540] sm:$0xff]  ;;  %v1787_v23 = vld [vmem:[#allocation9 + $0x550] sm:$0xff] }
 0x3b2   :  { %2378 = vmatpush1.bf16.msra.mxu1 %v2086_v7  ;;  %2542 = vmatpush1.bf16.msra.mxu0 %v2088_v8  ;;  %v1773_v7 = vld [vmem:[#allocation9 + $0x4e0] sm:$0xff]  ;;  %v2149_v8 = vunpack.c.l.s8.bf16 %v1771_v6 }
 0x3b3   :  { %2379 = vmatprep.subr.bf16.mxu1 %v2094_v9  ;;  %2543 = vmatprep.subr.bf16.mxu0 %v2096_v10  ;;  %v2151_v9 = vunpack.c.l.s8.bf16 %v1773_v7  ;;  %v3857_v10 = vsub.s32 4, %v3742_v24 }
 0x3b5   :  { %v1506_v17 = vrot.slane %v3812_v34, %v3857_v10 }
 0x3b6   :  { %2380 = vmatpush1.bf16.msra.mxu1 %v2093_v12  ;;  %2544 = vmatpush1.bf16.msra.mxu0 %v2095_v14  ;;  %v3860_v12 = vsub.s32 5, %v3742_v24  ;;  %v1517_v14 = vsub.s32 7, %v3742_v24 }
 0x3b7   :  { %2381 = vmatprep.subr.bf16.mxu1 %v2101_v15  ;;  %2545 = vmatprep.subr.bf16.mxu0 %v2103_v16  ;;  %v1779_v15 = vld [vmem:[#allocation9 + $0x510] sm:$0xff]  ;;  %v1781_v16 = vld [vmem:[#allocation9 + $0x520] sm:$0xff] }
 0x3ba   :  { %2382 = vmatpush1.bf16.msra.mxu1 %v2100_v20  ;;  %2546 = vmatpush1.bf16.msra.mxu0 %v2102_v22  ;;  %v2158_v20 = vunpack.c.h.s8.bf16 %v1773_v7  ;;  %v1510_v22 = vrot.slane %v3812_v34, %v3860_v12  ;;  %v2177_v7 = vunpack.c.l.s8.bf16 %v1785_v1 }
 0x3bb   :  { %2383 = vmatprep.subr.bf16.mxu1 %v2108_v25  ;;  %2547 = vmatprep.subr.bf16.mxu0 %v2110_v26  ;;  %v2164_v25 = vunpack.c.l.s8.bf16 %v1779_v15  ;;  %v2166_v26 = vunpack.c.l.s8.bf16 %v1781_v16 }
 0x3be   :  { %2384 = vmatpush1.bf16.msra.mxu1 %v2107_v32  ;;  %2548 = vmatpush1.bf16.msra.mxu0 %v2109_v33  ;;  %v1556_v32 = vrot.slane %v3817_v19, %v3857_v10  ;;  %v1518_v33 = vrot.slane %v3812_v34, %v1517_v14  ;;  %v2171_v34 = vunpack.c.h.s8.bf16 %v1779_v15  ;;  %v1795_v15 = vld [vmem:[#allocation9 + $0x590] sm:$0xff] }
 0x3bf   :  { %2385 = vmatprep.subr.bf16.mxu1 %v2115_v35  ;;  %2549 = vmatprep.subr.bf16.mxu0 %v2117_v36  ;;  %v1560_v36 = vrot.slane %v3817_v19, %v3860_v12 }
 0x3c2   :  { %2386 = vmatpush1.bf16.msra.mxu1 %v2114_v38  ;;  %2550 = vmatpush1.bf16.msra.mxu0 %v2116_v39  ;;  %v1568_v39 = vrot.slane %v3817_v19, %v1517_v14  ;;  %v1793_v14 = vld [vmem:[#allocation9 + $0x580] sm:$0xff] }
 0x3c3   :  { %2387 = vmatprep.subr.bf16.mxu1 %v2122_v40  ;;  %2551 = vmatprep.subr.bf16.mxu0 %v2124_v41  ;;  %v2163_v40 = vunpack.c.l.s8.bf16 %v1778_v21  ;;  %v2165_v41 = vunpack.c.l.s8.bf16 %v1780_v28 }
 0x3c6   :  { %2388 = vmatpush1.bf16.msra.mxu1 %v2121_v44  ;;  %2552 = vmatpush1.bf16.msra.mxu0 %v2123_v45  ;;  %v2173_v45 = vunpack.c.h.s8.bf16 %v1781_v16 }
 0x3c7   :  { %2389 = vmatprep.subr.bf16.mxu1 %v2129_v46  ;;  %2553 = vmatprep.subr.bf16.mxu0 %v2131_v30 }
 0x3ca   :  { %2390 = vmatpush1.bf16.msra.mxu1 %v2128_v49  ;;  %2554 = vmatpush1.bf16.msra.mxu0 %v2130_v52  ;;  %v1786_v49 = vld [vmem:[#allocation9 + $0x548] sm:$0xff]  ;;  %v1788_v52 = vld [vmem:[#allocation9 + $0x558] sm:$0xff] }
 0x3cb   :  { %2391 = vmatprep.subr.bf16.mxu1 %v2136_v55  ;;  %2555 = vmatprep.subr.bf16.mxu0 %v2138_v56 }
 0x3ce   :  { %2392 = vmatpush1.bf16.msra.mxu1 %v2135_v60  ;;  %2556 = vmatpush1.bf16.msra.mxu0 %v2137_v61  ;;  %v2172_v60 = vunpack.c.h.s8.bf16 %v1780_v28 }
 0x3cf   :  { %2393 = vmatprep.subr.bf16.mxu1 %v2143_v62  ;;  %2557 = vmatprep.subr.bf16.mxu0 %v2145_v0  ;;  %v2178_v62 = vunpack.c.l.s8.bf16 %v1786_v49  ;;  %v2180_v0 = vunpack.c.l.s8.bf16 %v1788_v52 }
 0x3d2   :  { %2394 = vmatpush1.bf16.msra.mxu1 %v2142_v2  ;;  %2558 = vmatpush1.bf16.msra.mxu0 %v2144_v3 }
 0x3d3   :  { %2395 = vmatprep.subr.bf16.mxu1 %v2150_v4  ;;  %2559 = vmatprep.subr.bf16.mxu0 %v2152_v5 }
 0x3d6   :  { %2396 = vmatpush1.bf16.msra.mxu1 %v2149_v8  ;;  %2560 = vmatpush1.bf16.msra.mxu0 %v2151_v9  ;;  %v2179_v8 = vunpack.c.l.s8.bf16 %v1787_v23 }
 0x3d7   :  { %2397 = vmatprep.subr.bf16.mxu1 %v2157_v11  ;;  %2561 = vmatprep.subr.bf16.mxu0 %v2159_v13  ;;  %v2185_v11 = vunpack.c.h.s8.bf16 %v1786_v49  ;;  %v2187_v13 = vunpack.c.h.s8.bf16 %v1788_v52 }
 0x3d9   :  { %v1396_v35 = vpop.f32.mrb[4].mxu1 }
 0x3da   :  { %v1531_v27 = vmul.f32 %v1506_v17, %v1396_v35  ;;  %v3872_v37 = vpop.f32.mrb[16].mxu0  ;;  %2398 = vmatpush1.bf16.msra.mxu1 %v2156_v18  ;;  %2562 = vmatpush1.bf16.msra.mxu0 %v2158_v20  ;;  %v1398_v38 = vpop.f32.mrb[5].mxu1  ;;  %v2184_v17 = vunpack.c.h.s8.bf16 %v1785_v1  ;;  %v2186_v18 = vunpack.c.h.s8.bf16 %v1787_v23  ;;  %v2192_v20 = vunpack.c.l.s8.bf16 %v1793_v14  ;;  %v1800_v35 = vld [vmem:[#allocation9 + $0x5b8] sm:$0xff] }
 0x3db   :  { %v1532_v42 = vmul.f32 %v1510_v22, %v1398_v38  ;;  %v1480_v43 = vpop.f32.mrb[17].mxu0  ;;  %v1400_v44 = vpop.f32.mrb[6].mxu1  ;;  %2399 = vmatprep.subr.bf16.mxu1 %v2164_v25  ;;  %2563 = vmatprep.subr.bf16.mxu0 %v2166_v26  ;;  %v2194_v22 = vunpack.c.l.s8.bf16 %v1795_v15  ;;  %v1792_v25 = vld [vmem:[#allocation9 + $0x578] sm:$0xff]  ;;  %v1794_v26 = vld [vmem:[#allocation9 + $0x588] sm:$0xff] }
 0x3dc   :  { %v1581_v46 = vadd.f32 %v1556_v32, %v1531_v27  ;;  %v1534_v30 = vmul.f32 %v1518_v33, %v1480_v43  ;;  %v1482_v47 = vpop.f32.mrb[18].mxu0  ;;  %v1401_v48 = vpop.f32.mrb[7].mxu1  ;;  %v2191_v21 = vunpack.c.l.s8.bf16 %v1792_v25  ;;  %v2193_v28 = vunpack.c.l.s8.bf16 %v1794_v26 }
 0x3dd   :  { %v1582_v55 = vadd.f32 %v1560_v36, %v1532_v42  ;;  %v1483_v56 = vpop.f32.mrb[19].mxu0  ;;  %v2199_v32 = vunpack.c.h.s8.bf16 %v1793_v14  ;;  %v2201_v33 = vunpack.c.h.s8.bf16 %v1795_v15  ;;  %v1802_v36 = vld [vmem:[#allocation9 + $0x5c8] sm:$0xff]  ;;  %v2198_v27 = vunpack.c.h.s8.bf16 %v1792_v25  ;;  %v1801_v42 = vld [vmem:[#allocation9 + $0x5c0] sm:$0xff]  ;;  %v1823_v14 = vld [vmem:[#allocation9 + $0x670] sm:$0xff] }
 0x3de   :  { %vm1589_vm12 = vcmp.gt.f32.partialorder %v1581_v46, 0.0  ;;  %v1597_v19 = vmul.f32 0.2, %v1581_v46  ;;  %v1584_v59 = vadd.f32 %v1568_v39, %v1534_v30  ;;  %2400 = vmatpush1.bf16.msra.mxu1 %v2163_v40  ;;  %2564 = vmatpush1.bf16.msra.mxu0 %v2165_v41  ;;  %v2200_v38 = vunpack.c.h.s8.bf16 %v1794_v26  ;;  %v1799_v41 = vld [vmem:[#allocation9 + $0x5b0] sm:$0xff]  ;;  %v1809_v30 = vld [vmem:[#allocation9 + $0x600] sm:$0xff]  ;;  %v1808_v56 = vld [vmem:[#allocation9 + $0x5f8] sm:$0xff] }
 0x3df   :  { %vm1590_vm13 = vcmp.gt.f32.partialorder %v1582_v55, 0.0  ;;  %v1598_v61 = vmul.f32 0.2, %v1582_v55  ;;  %2401 = vmatprep.subr.bf16.mxu1 %v2171_v34  ;;  %2565 = vmatprep.subr.bf16.mxu0 %v2173_v45  ;;  %v2206_v39 = vunpack.c.l.s8.bf16 %v1800_v35  ;;  %v2208_v40 = vunpack.c.l.s8.bf16 %v1802_v36  ;;  %v1822_v25 = vld [vmem:[#allocation9 + $0x668] sm:$0xff] }
 0x3e0   :  { %v1605_v2 = vsel %vm1589_vm12, %v1581_v46, %v1597_v19  ;;  %vm1592_vm14 = vcmp.gt.f32.partialorder %v1584_v59, 0.0  ;;  %v1600_v3 = vmul.f32 0.2, %v1584_v59  ;;  %v2205_v43 = vunpack.c.l.s8.bf16 %v1799_v41  ;;  %v1807_v46 = vld [vmem:[#allocation9 + $0x5f0] sm:$0xff] }
 0x3e1   :  { %v1606_v4 = vsel %vm1590_vm13, %v1582_v55, %v1598_v61  ;;  %v3877_v9 = vpack.c.bf16 %v1605_v2, %v1605_v2  ;;  %v2207_v44 = vunpack.c.l.s8.bf16 %v1801_v42  ;;  %v2213_v34 = vunpack.c.h.s8.bf16 %v1800_v35  ;;  %v1806_v55 = vld [vmem:[#allocation9 + $0x5e8] sm:$0xff]  ;;  %v1828_v35 = vld [vmem:[#allocation9 + $0x698] sm:$0xff] }
 0x3e2   :  { %v3875_v5 = vpack.c.bf16 %v1606_v4, %v1606_v4  ;;  %v1608_v6 = vsel %vm1592_vm14, %v1584_v59, %v1600_v3  ;;  %2402 = vmatpush1.bf16.msra.mxu1 %v2170_v57  ;;  %2566 = vmatpush1.bf16.msra.mxu0 %v2172_v60  ;;  %v2215_v45 = vunpack.c.h.s8.bf16 %v1802_v36  ;;  %v2212_v47 = vunpack.c.h.s8.bf16 %v1799_v41  ;;  %v1814_v61 = vld [vmem:[#allocation9 + $0x628] sm:$0xff]  ;;  %v1813_v3 = vld [vmem:[#allocation9 + $0x620] sm:$0xff]  ;;  %v1815_v4 = vld [vmem:[#allocation9 + $0x630] sm:$0xff] }
 0x3e3   :  { %2412 = vmatprep.subr.bf16.mxu1 %v2178_v62  ;;  %2576 = vmatprep.subr.bf16.mxu0 %v2180_v0  ;;  %v3881_v16 = vpack.c.bf16 %v1608_v6, %v1608_v6  ;;  %v2214_v48 = vunpack.c.h.s8.bf16 %v1801_v42  ;;  %v2220_v49 = vunpack.c.l.s8.bf16 %v1807_v46  ;;  %v2222_v52 = vunpack.c.l.s8.bf16 %v1809_v30  ;;  %v1816_v62 = vld [vmem:[#allocation9 + $0x638] sm:$0xff]  ;;  %v1830_v36 = vld [vmem:[#allocation9 + $0x6a8] sm:$0xff]  ;;  %v1827_v41 = vld [vmem:[#allocation9 + $0x690] sm:$0xff] }
 0x3e4   :  { %2403 = vmatprep.mubr.bf16.mxu1 %v3875_v5  ;;  %2567 = vmatprep.mubr.bf16.mxu0 %v3875_v5  ;;  %v2219_v57 = vunpack.c.l.s8.bf16 %v1806_v55  ;;  %v2221_v19 = vunpack.c.l.s8.bf16 %v1808_v56  ;;  %v2227_v59 = vunpack.c.h.s8.bf16 %v1807_v46  ;;  %v2229_v60 = vunpack.c.h.s8.bf16 %v1809_v30  ;;  %v1829_v42 = vld [vmem:[#allocation9 + $0x6a0] sm:$0xff] }
 0x3e5   :  { %2404 = vmatmul.mubr.bf16.vlgmr.msra.gmra.mrb[8].mxu1 %v3877_v9  ;;  %2568 = vmatmul.mubr.bf16.vlgmr.msra.gmra.mrb[20].mxu0 %v3877_v9  ;;  %v2226_v0 = vunpack.c.h.s8.bf16 %v1806_v55  ;;  %v2228_v1 = vunpack.c.h.s8.bf16 %v1808_v56  ;;  %v2234_v23 = vunpack.c.l.s8.bf16 %v1814_v61  ;;  %v2236_v2 = vunpack.c.l.s8.bf16 %v1816_v62 }
 0x3e6   :  { %2413 = vmatpush1.bf16.msra.mxu1 %v2177_v7  ;;  %2577 = vmatpush1.bf16.msra.mxu0 %v2179_v8  ;;  %v2233_v6 = vunpack.c.l.s8.bf16 %v1813_v3  ;;  %v2235_v7 = vunpack.c.l.s8.bf16 %v1815_v4  ;;  %v2241_v8 = vunpack.c.h.s8.bf16 %v1814_v61  ;;  %v2240_v15 = vunpack.c.h.s8.bf16 %v1813_v3  ;;  %v1651_v3 = vld [vmem:[#allocation9 + $0x110] sm:$0xff] }
 0x3e7   :  { %2444 = vmatprep.mubr.bf16.mxu1 %v3881_v16  ;;  %2608 = vmatprep.mubr.bf16.mxu0 %v3881_v16  ;;  %v2271_v46 = vunpack.c.h.s8.bf16 %v1830_v36  ;;  %v2268_v55 = vunpack.c.h.s8.bf16 %v1827_v41  ;;  %v2270_v56 = vunpack.c.h.s8.bf16 %v1829_v42 }
 0x3e8   :  { %2414 = vmatprep.subr.bf16.mxu1 %v2185_v11  ;;  %2578 = vmatprep.subr.bf16.mxu0 %v2187_v13  ;;  %v2243_v11 = vunpack.c.h.s8.bf16 %v1816_v62  ;;  %v1821_v13 = vld [vmem:[#allocation9 + $0x660] sm:$0xff] }
 0x3ea   :  { %2415 = vmatpush1.bf16.msra.mxu1 %v2184_v17  ;;  %2579 = vmatpush1.bf16.msra.mxu0 %v2186_v18  ;;  %v2242_v17 = vunpack.c.h.s8.bf16 %v1815_v4  ;;  %v2248_v18 = vunpack.c.l.s8.bf16 %v1821_v13 }
 0x3eb   :  { %2416 = vmatprep.subr.bf16.mxu1 %v2192_v20  ;;  %2580 = vmatprep.subr.bf16.mxu0 %v2194_v22  ;;  %v2250_v20 = vunpack.c.l.s8.bf16 %v1823_v14  ;;  %v1820_v22 = vld [vmem:[#allocation9 + $0x658] sm:$0xff] }
 0x3ec   :  { %v2247_v26 = vunpack.c.l.s8.bf16 %v1820_v22 }
 0x3ee   :  { %2417 = vmatpush1.bf16.msra.mxu1 %v2191_v21  ;;  %2581 = vmatpush1.bf16.msra.mxu0 %v2193_v28  ;;  %v2249_v21 = vunpack.c.l.s8.bf16 %v1822_v25  ;;  %v2255_v28 = vunpack.c.h.s8.bf16 %v1821_v13 }
 0x3ef   :  { %2418 = vmatprep.subr.bf16.mxu1 %v2199_v32  ;;  %2582 = vmatprep.subr.bf16.mxu0 %v2201_v33  ;;  %v2257_v32 = vunpack.c.h.s8.bf16 %v1823_v14  ;;  %v3888_v33 = vsub.s32 6, %v3742_v24  ;;  %v2261_v24 = vunpack.c.l.s8.bf16 %v1827_v41  ;;  %v1623_v14 = vld [vmem:[#allocation9 + $0x30] sm:$0xff] }
 0x3f2   :  { %2419 = vmatpush1.bf16.msra.mxu1 %v2198_v27  ;;  %2583 = vmatpush1.bf16.msra.mxu0 %v2200_v38  ;;  %v2254_v27 = vunpack.c.h.s8.bf16 %v1820_v22  ;;  %v2256_v38 = vunpack.c.h.s8.bf16 %v1822_v25  ;;  %v1910_v22 = vunpack.c.h.s8.bf16 %v1651_v3  ;;  %v1629_v25 = vld [vmem:[#allocation9 + $0x60] sm:$0xff] }
 0x3f3   :  { %2420 = vmatprep.subr.bf16.mxu1 %v2206_v39  ;;  %2584 = vmatprep.subr.bf16.mxu0 %v2208_v40  ;;  %v2262_v39 = vunpack.c.l.s8.bf16 %v1828_v35  ;;  %v2264_v40 = vunpack.c.l.s8.bf16 %v1830_v36 }
 0x3f6   :  { %2421 = vmatpush1.bf16.msra.mxu1 %v2205_v43  ;;  %2585 = vmatpush1.bf16.msra.mxu0 %v2207_v44  ;;  %v3450_v43 = vld [vmem:[%s3972_s6] sm:$0xff] }
 0x3f7   :  { %2422 = vmatprep.subr.bf16.mxu1 %v2213_v34  ;;  %2586 = vmatprep.subr.bf16.mxu0 %v2215_v45  ;;  %v1514_v44 = vrot.slane %v3450_v43, %v3888_v33  ;;  %v2263_v34 = vunpack.c.l.s8.bf16 %v1829_v42  ;;  %v2269_v45 = vunpack.c.h.s8.bf16 %v1828_v35  ;;  %v1628_v35 = vld [vmem:[#allocation9 + $0x58] sm:$0xff]  ;;  %v1665_v43 = vld [vmem:[#allocation9 + $0x180] sm:$0xff] }
 0x3f8   :  { %v1636_v42 = vld [vmem:[#allocation9 + $0x98] sm:$0xff] }
 0x3f9   :  { %v1533_v30 = vmul.f32 %v1514_v44, %v3872_v37  ;;  %v1866_v44 = vunpack.c.h.s8.bf16 %v1628_v35 }
 0x3fa   :  { %2423 = vmatpush1.bf16.msra.mxu1 %v2212_v47  ;;  %2587 = vmatpush1.bf16.msra.mxu0 %v2214_v48  ;;  %v3451_v47 = vld [vmem:[%s3973_s7] sm:$0xff] }
 0x3fb   :  { %2424 = vmatprep.subr.bf16.mxu1 %v2220_v49  ;;  %2588 = vmatprep.subr.bf16.mxu0 %v2222_v52  ;;  %v1564_v48 = vrot.slane %v3451_v47, %v3888_v33  ;;  %v1835_v49 = vld [vmem:[#allocation9 + $0x6d0] sm:$0xff]  ;;  %v1837_v52 = vld [vmem:[#allocation9 + $0x6e0] sm:$0xff] }
 0x3fd   :  { %v1583_v61 = vadd.f32 %v1564_v48, %v1533_v30  ;;  %v1881_v48 = vunpack.c.h.s8.bf16 %v1636_v42 }
 0x3fe   :  { %2425 = vmatpush1.bf16.msra.mxu1 %v2219_v57  ;;  %2589 = vmatpush1.bf16.msra.mxu0 %v2221_v19  ;;  %v2276_v57 = vunpack.c.l.s8.bf16 %v1835_v49  ;;  %v2278_v19 = vunpack.c.l.s8.bf16 %v1837_v52 }
 0x3ff   :  { %2426 = vmatprep.subr.bf16.mxu1 %v2227_v59  ;;  %2590 = vmatprep.subr.bf16.mxu0 %v2229_v60  ;;  %v1834_v59 = vld [vmem:[#allocation9 + $0x6c8] sm:$0xff]  ;;  %v1836_v60 = vld [vmem:[#allocation9 + $0x6d8] sm:$0xff]  ;;  %vm1591_vm15 = vcmp.gt.f32.partialorder %v1583_v61, 0.0 }
 0x400   :  { %v2275_v37 = vunpack.c.l.s8.bf16 %v1834_v59  ;;  %v2277_v62 = vunpack.c.l.s8.bf16 %v1836_v60  ;;  %v2282_v4 = vunpack.c.h.s8.bf16 %v1834_v59  ;;  %v1642_v59 = vld [vmem:[#allocation9 + $0xc8] sm:$0xff] }
 0x402   :  { %2427 = vmatpush1.bf16.msra.mxu1 %v2226_v0  ;;  %2591 = vmatpush1.bf16.msra.mxu0 %v2228_v1  ;;  %v2283_v0 = vunpack.c.h.s8.bf16 %v1835_v49  ;;  %v2285_v1 = vunpack.c.h.s8.bf16 %v1837_v52  ;;  %v1938_v49 = vunpack.c.h.s8.bf16 %v1665_v43  ;;  %v1643_v52 = vld [vmem:[#allocation9 + $0xd0] sm:$0xff] }
 0x403   :  { %2428 = vmatprep.subr.bf16.mxu1 %v2234_v23  ;;  %2592 = vmatprep.subr.bf16.mxu0 %v2236_v2  ;;  %v1599_v23 = vmul.f32 0.2, %v1583_v61  ;;  %v1622_v2 = vld [vmem:[#allocation9 + $0x28] sm:$0xff] }
 0x405   :  { %v1607_v13 = vsel %vm1591_vm15, %v1583_v61, %v1599_v23  ;;  %v1644_v61 = vld [vmem:[#allocation9 + $0xd8] sm:$0xff]  ;;  %v1650_v23 = vld [vmem:[#allocation9 + $0x108] sm:$0xff] }
 0x406   :  { %2429 = vmatpush1.bf16.msra.mxu1 %v2233_v6  ;;  %2593 = vmatpush1.bf16.msra.mxu0 %v2235_v7  ;;  %v2284_v6 = vunpack.c.h.s8.bf16 %v1836_v60  ;;  %v1846_v7 = vunpack.c.l.s8.bf16 %v1622_v2 }
 0x407   :  { %2430 = vmatprep.subr.bf16.mxu1 %v2241_v8  ;;  %2594 = vmatprep.subr.bf16.mxu0 %v2243_v11  ;;  %v1903_v8 = vunpack.c.l.s8.bf16 %v1651_v3  ;;  %v1621_v11 = vld [vmem:[#allocation9 + $0x20] sm:$0xff]  ;;  %v1894_v3 = vunpack.c.h.s8.bf16 %v1642_v59 }
 0x40a   :  { %2431 = vmatpush1.bf16.msra.mxu1 %v2240_v15  ;;  %2595 = vmatpush1.bf16.msra.mxu0 %v2242_v17  ;;  %v1845_v15 = vunpack.c.l.s8.bf16 %v1621_v11  ;;  %v3899_v17 = vpack.c.bf16 %v1607_v13, %v1607_v13 }
 0x40b   :  { %2432 = vmatprep.subr.bf16.mxu1 %v2248_v18  ;;  %2596 = vmatprep.subr.bf16.mxu0 %v2250_v20  ;;  %v1847_v18 = vunpack.c.l.s8.bf16 %v1623_v14  ;;  %v1853_v20 = vunpack.c.h.s8.bf16 %v1622_v2  ;;  %v1707_v2 = vld [vmem:[#allocation9 + $0x2d0] sm:$0xff] }
 0x40e   :  { %2433 = vmatpush1.bf16.msra.mxu1 %v2247_v26  ;;  %2597 = vmatpush1.bf16.msra.mxu0 %v2249_v21  ;;  %v1658_v26 = vld [vmem:[#allocation9 + $0x148] sm:$0xff]  ;;  %v1852_v21 = vunpack.c.h.s8.bf16 %v1621_v11  ;;  %v1679_v11 = vld [vmem:[#allocation9 + $0x1f0] sm:$0xff] }
 0x40f   :  { %2434 = vmatprep.subr.bf16.mxu1 %v2255_v28  ;;  %2598 = vmatprep.subr.bf16.mxu0 %v2257_v32  ;;  %v1854_v28 = vunpack.c.h.s8.bf16 %v1623_v14  ;;  %v1860_v32 = vunpack.c.l.s8.bf16 %v1629_v25  ;;  %v1917_v36 = vunpack.c.l.s8.bf16 %v1658_v26  ;;  %v1924_v41 = vunpack.c.h.s8.bf16 %v1658_v26 }
 0x410   :  { %v1959_v14 = vunpack.c.l.s8.bf16 %v1679_v11  ;;  %v1966_v26 = vunpack.c.h.s8.bf16 %v1679_v11 }
 0x412   :  { %2435 = vmatpush1.bf16.msra.mxu1 %v2254_v27  ;;  %2599 = vmatpush1.bf16.msra.mxu0 %v2256_v38  ;;  %v1630_v27 = vld [vmem:[#allocation9 + $0x68] sm:$0xff]  ;;  %v1859_v38 = vunpack.c.l.s8.bf16 %v1628_v35 }
 0x413   :  { %2436 = vmatprep.subr.bf16.mxu1 %v2262_v39  ;;  %2600 = vmatprep.subr.bf16.mxu0 %v2264_v40  ;;  %v1861_v39 = vunpack.c.l.s8.bf16 %v1630_v27  ;;  %v1867_v40 = vunpack.c.h.s8.bf16 %v1629_v25  ;;  %v1686_v35 = vld [vmem:[#allocation9 + $0x228] sm:$0xff] }
 0x416   :  { %2437 = vmatpush1.bf16.msra.mxu1 %v2261_v24  ;;  %2601 = vmatpush1.bf16.msra.mxu0 %v2263_v34  ;;  %v1874_v24 = vunpack.c.l.s8.bf16 %v1636_v42  ;;  %v1635_v34 = vld [vmem:[#allocation9 + $0x90] sm:$0xff] }
 0x417   :  { %2438 = vmatprep.subr.bf16.mxu1 %v2269_v45  ;;  %2602 = vmatprep.subr.bf16.mxu0 %v2271_v46  ;;  %v1931_v45 = vunpack.c.l.s8.bf16 %v1665_v43  ;;  %v1637_v46 = vld [vmem:[#allocation9 + $0xa0] sm:$0xff]  ;;  %v1873_v30 = vunpack.c.l.s8.bf16 %v1635_v34  ;;  %v1980_v43 = vunpack.c.h.s8.bf16 %v1686_v35 }
 0x418   :  { %v1875_v47 = vunpack.c.l.s8.bf16 %v1637_v46 }
 0x41a   :  { %2439 = vmatpush1.bf16.msra.mxu1 %v2268_v55  ;;  %2603 = vmatpush1.bf16.msra.mxu0 %v2270_v56  ;;  %v1672_v55 = vld [vmem:[#allocation9 + $0x1b8] sm:$0xff]  ;;  %v1880_v56 = vunpack.c.h.s8.bf16 %v1635_v34  ;;  %v1693_v34 = vld [vmem:[#allocation9 + $0x260] sm:$0xff] }
 0x41b   :  { %2440 = vmatprep.subr.bf16.mxu1 %v2276_v57  ;;  %2604 = vmatprep.subr.bf16.mxu0 %v2278_v19  ;;  %v1882_v57 = vunpack.c.h.s8.bf16 %v1637_v46  ;;  %v1888_v19 = vunpack.c.l.s8.bf16 %v1643_v52  ;;  %v1945_v60 = vunpack.c.l.s8.bf16 %v1672_v55  ;;  %v1987_v46 = vunpack.c.l.s8.bf16 %v1693_v34 }
 0x41e   :  { %2441 = vmatpush1.bf16.msra.mxu1 %v2275_v37  ;;  %2605 = vmatpush1.bf16.msra.mxu0 %v2277_v62  ;;  %v1887_v37 = vunpack.c.l.s8.bf16 %v1642_v59  ;;  %v1889_v62 = vunpack.c.l.s8.bf16 %v1644_v61  ;;  %v1700_v59 = vld [vmem:[#allocation9 + $0x298] sm:$0xff] }
 0x41f   :  { %2442 = vmatprep.subr.bf16.mxu1 %v2283_v0  ;;  %2606 = vmatprep.subr.bf16.mxu0 %v2285_v1  ;;  %v1895_v0 = vunpack.c.h.s8.bf16 %v1643_v52  ;;  %v1952_v1 = vunpack.c.h.s8.bf16 %v1672_v55  ;;  %v1994_v55 = vunpack.c.h.s8.bf16 %v1693_v34 }
 0x422   :  { %2443 = vmatpush1.bf16.msra.mxu1 %v2282_v4  ;;  %2607 = vmatpush1.bf16.msra.mxu0 %v2284_v6  ;;  %v1896_v4 = vunpack.c.h.s8.bf16 %v1644_v61  ;;  %v1902_v6 = vunpack.c.l.s8.bf16 %v1650_v23  ;;  %v2001_v61 = vunpack.c.l.s8.bf16 %v1700_v59 }
 0x423   :  { %2617 = vmatprep.subr.bf16.mxu1 %v1846_v7  ;;  %3165 = vmatprep.subr.bf16.mxu0 %v1903_v8  ;;  %v1649_v7 = vld [vmem:[#allocation9 + $0x100] sm:$0xff]  ;;  %v2015_v8 = vunpack.c.l.s8.bf16 %v1707_v2 }
 0x424   :  { %v1901_v13 = vunpack.c.l.s8.bf16 %v1649_v7  ;;  %v1908_v25 = vunpack.c.h.s8.bf16 %v1649_v7  ;;  %v1735_v7 = vld [vmem:[#allocation9 + $0x3b0] sm:$0xff] }
 0x425   :  { %2445 = vmatmul.mubr.bf16.vlgmr.msra.gmra.mrb[8].mxu1 %v3899_v17  ;;  %2609 = vmatmul.mubr.bf16.vlgmr.msra.gmra.mrb[20].mxu0 %v3899_v17  ;;  %v2071_v11 = vunpack.c.l.s8.bf16 %v1735_v7 }
 0x426   :  { %2618 = vmatpush1.bf16.msra.mxu1 %v1845_v15  ;;  %2649 = vmatprep.mubr.bf16.mxu1 %v3833_v53  ;;  %v1909_v15 = vunpack.c.h.s8.bf16 %v1650_v23 }
 0x427   :  { %3166 = vmatpush3.bf16.msra.mxu0 %v1847_v18  ;;  %2813 = vmatprep.mubr.bf16.mxu0 %v3833_v53  ;;  %v1868_v53 = vunpack.c.h.s8.bf16 %v1630_v27  ;;  %v2022_v18 = vunpack.c.h.s8.bf16 %v1707_v2  ;;  %v1973_v27 = vunpack.c.l.s8.bf16 %v1686_v35  ;;  %v2008_v2 = vunpack.c.h.s8.bf16 %v1700_v59 }
 0x428   :  { %2619 = vmatprep.subr.bf16.mxu1 %v1853_v20  ;;  %3167 = vmatprep.subr.bf16.mxu0 %v1910_v22  ;;  %v1657_v20 = vld [vmem:[#allocation9 + $0x140] sm:$0xff]  ;;  %v1714_v22 = vld [vmem:[#allocation9 + $0x308] sm:$0xff] }
 0x42a   :  { %2620 = vmatpush1.bf16.msra.mxu1 %v1852_v21  ;;  %v1916_v21 = vunpack.c.l.s8.bf16 %v1657_v20 }
 0x42b   :  { %3168 = vmatpush3.bf16.msra.mxu0 %v1854_v28  ;;  %2621 = vmatprep.subr.bf16.mxu1 %v1860_v32  ;;  %v1656_v28 = vld [vmem:[#allocation9 + $0x138] sm:$0xff]  ;;  %v2029_v32 = vunpack.c.l.s8.bf16 %v1714_v22 }
 0x42c   :  { %3169 = vmatprep.subr.bf16.mxu0 %v1917_v36  ;;  %v1915_v36 = vunpack.c.l.s8.bf16 %v1656_v28  ;;  %v1922_v42 = vunpack.c.h.s8.bf16 %v1656_v28  ;;  %v1742_v28 = vld [vmem:[#allocation9 + $0x3e8] sm:$0xff] }
 0x42e   :  { %2622 = vmatpush1.bf16.msra.mxu1 %v1859_v38  ;;  %v1923_v38 = vunpack.c.h.s8.bf16 %v1657_v20 }
 0x42f   :  { %3170 = vmatpush3.bf16.msra.mxu0 %v1861_v39  ;;  %2623 = vmatprep.subr.bf16.mxu1 %v1867_v40  ;;  %v2036_v39 = vunpack.c.h.s8.bf16 %v1714_v22  ;;  %v1664_v40 = vld [vmem:[#allocation9 + $0x178] sm:$0xff]  ;;  %v2078_v22 = vunpack.c.h.s8.bf16 %v1735_v7 }
 0x430   :  { %3171 = vmatprep.subr.bf16.mxu0 %v1924_v41  ;;  %v1721_v41 = vld [vmem:[#allocation9 + $0x340] sm:$0xff] }
 0x432   :  { %2624 = vmatpush1.bf16.msra.mxu1 %v1866_v44  ;;  %v1930_v44 = vunpack.c.l.s8.bf16 %v1664_v40 }
 0x433   :  { %3172 = vmatpush3.bf16.msra.mxu0 %v1868_v53  ;;  %2625 = vmatprep.subr.bf16.mxu1 %v1874_v24  ;;  %v1663_v53 = vld [vmem:[#allocation9 + $0x170] sm:$0xff]  ;;  %v2043_v24 = vunpack.c.l.s8.bf16 %v1721_v41 }
 0x434   :  { %3173 = vmatprep.subr.bf16.mxu0 %v1931_v45  ;;  %v1929_v45 = vunpack.c.l.s8.bf16 %v1663_v53  ;;  %v1936_v52 = vunpack.c.h.s8.bf16 %v1663_v53 }
 0x436   :  { %2626 = vmatpush1.bf16.msra.mxu1 %v1873_v30  ;;  %v1937_v30 = vunpack.c.h.s8.bf16 %v1664_v40 }
 0x437   :  { %3174 = vmatpush3.bf16.msra.mxu0 %v1875_v47  ;;  %2627 = vmatprep.subr.bf16.mxu1 %v1881_v48  ;;  %v2050_v47 = vunpack.c.h.s8.bf16 %v1721_v41  ;;  %v1671_v48 = vld [vmem:[#allocation9 + $0x1b0] sm:$0xff] }
 0x438   :  { %3175 = vmatprep.subr.bf16.mxu0 %v1938_v49  ;;  %v1728_v49 = vld [vmem:[#allocation9 + $0x378] sm:$0xff]  ;;  %v1691_v41 = vld [vmem:[#allocation9 + $0x250] sm:$0xff] }
 0x43a   :  { %2628 = vmatpush1.bf16.msra.mxu1 %v1880_v56  ;;  %v1944_v56 = vunpack.c.l.s8.bf16 %v1671_v48 }
 0x43b   :  { %3176 = vmatpush3.bf16.msra.mxu0 %v1882_v57  ;;  %2629 = vmatprep.subr.bf16.mxu1 %v1888_v19  ;;  %v1670_v57 = vld [vmem:[#allocation9 + $0x1a8] sm:$0xff]  ;;  %v2057_v19 = vunpack.c.l.s8.bf16 %v1728_v49 }
 0x43c   :  { %3177 = vmatprep.subr.bf16.mxu0 %v1945_v60  ;;  %v1943_v60 = vunpack.c.l.s8.bf16 %v1670_v57  ;;  %v1950_v23 = vunpack.c.h.s8.bf16 %v1670_v57 }
 0x43e   :  { %2630 = vmatpush1.bf16.msra.mxu1 %v1887_v37  ;;  %v1951_v37 = vunpack.c.h.s8.bf16 %v1671_v48 }
 0x43f   :  { %3178 = vmatpush3.bf16.msra.mxu0 %v1889_v62  ;;  %2631 = vmatprep.subr.bf16.mxu1 %v1895_v0  ;;  %v2064_v62 = vunpack.c.h.s8.bf16 %v1728_v49  ;;  %v1678_v0 = vld [vmem:[#allocation9 + $0x1e8] sm:$0xff] }
 0x440   :  { %3179 = vmatprep.subr.bf16.mxu0 %v1952_v1  ;;  %v1763_v1 = vld [vmem:[#allocation9 + $0x490] sm:$0xff]  ;;  %v1698_v49 = vld [vmem:[#allocation9 + $0x288] sm:$0xff] }
 0x442   :  { %2632 = vmatpush1.bf16.msra.mxu1 %v1894_v3  ;;  %v1958_v3 = vunpack.c.l.s8.bf16 %v1678_v0 }
 0x443   :  { %3180 = vmatpush3.bf16.msra.mxu0 %v1896_v4  ;;  %2633 = vmatprep.subr.bf16.mxu1 %v1902_v6  ;;  %v1677_v4 = vld [vmem:[#allocation9 + $0x1e0] sm:$0xff]  ;;  %v2127_v6 = vunpack.c.l.s8.bf16 %v1763_v1 }
 0x444   :  { %3187 = vmatprep.subr.bf16.mxu0 %v2015_v8  ;;  %v1957_v8 = vunpack.c.l.s8.bf16 %v1677_v4  ;;  %v1964_v20 = vunpack.c.h.s8.bf16 %v1677_v4 }
 0x446   :  { %2814 = vmatmul.mubr.bf16.vlgmr.msra.gmra.mrb[24].mxu0 %v3835_v58  ;;  %2634 = vmatpush1.bf16.msra.mxu1 %v1901_v13  ;;  %v1965_v13 = vunpack.c.h.s8.bf16 %v1678_v0 }
 0x447   :  { %3188 = vmatpush3.bf16.msra.mxu0 %v1959_v14  ;;  %2853 = vmatprep.mubr.bf16.mxu0 %v3841_v63  ;;  %v1685_v14 = vld [vmem:[#allocation9 + $0x220] sm:$0xff] }
 0x448   :  { %2635 = vmatprep.subr.bf16.mxu1 %v1909_v15  ;;  %3189 = vmatprep.subr.bf16.mxu0 %v2022_v18  ;;  %v2134_v15 = vunpack.c.h.s8.bf16 %v1763_v1  ;;  %v1770_v18 = vld [vmem:[#allocation9 + $0x4c8] sm:$0xff]  ;;  %v1979_v35 = vunpack.c.h.s8.bf16 %v1685_v14  ;;  %v1705_v1 = vld [vmem:[#allocation9 + $0x2c0] sm:$0xff] }
 0x44a   :  { %2636 = vmatpush1.bf16.msra.mxu1 %v1908_v25  ;;  %v1972_v25 = vunpack.c.l.s8.bf16 %v1685_v14 }
 0x44b   :  { %3190 = vmatpush3.bf16.msra.mxu0 %v1966_v26  ;;  %2637 = vmatprep.subr.bf16.mxu1 %v1916_v21  ;;  %v1684_v26 = vld [vmem:[#allocation9 + $0x218] sm:$0xff]  ;;  %v2141_v21 = vunpack.c.l.s8.bf16 %v1770_v18 }
 0x44c   :  { %3191 = vmatprep.subr.bf16.mxu0 %v2029_v32  ;;  %v2085_v32 = vunpack.c.l.s8.bf16 %v1742_v28 }
 0x44e   :  { %2638 = vmatpush1.bf16.msra.mxu1 %v1915_v36  ;;  %v2148_v36 = vunpack.c.h.s8.bf16 %v1770_v18  ;;  %v1712_v18 = vld [vmem:[#allocation9 + $0x2f8] sm:$0xff] }
 0x44f   :  { %3192 = vmatpush3.bf16.msra.mxu0 %v1973_v27  ;;  %2639 = vmatprep.subr.bf16.mxu1 %v1923_v38  ;;  %v1692_v27 = vld [vmem:[#allocation9 + $0x258] sm:$0xff]  ;;  %v1978_v38 = vunpack.c.h.s8.bf16 %v1684_v26 }
 0x450   :  { %3193 = vmatprep.subr.bf16.mxu0 %v2036_v39  ;;  %v2092_v39 = vunpack.c.h.s8.bf16 %v1742_v28  ;;  %v1986_v40 = vunpack.c.l.s8.bf16 %v1692_v27 }
 0x452   :  { %2640 = vmatpush1.bf16.msra.mxu1 %v1922_v42 }
 0x453   :  { %3194 = vmatpush3.bf16.msra.mxu0 %v1980_v43  ;;  %2641 = vmatprep.subr.bf16.mxu1 %v1930_v44  ;;  %v1749_v43 = vld [vmem:[#allocation9 + $0x420] sm:$0xff]  ;;  %v1985_v44 = vunpack.c.l.s8.bf16 %v1691_v41 }
 0x454   :  { %3195 = vmatprep.subr.bf16.mxu0 %v2043_v24  ;;  %v2099_v53 = vunpack.c.l.s8.bf16 %v1749_v43  ;;  %v1993_v24 = vunpack.c.h.s8.bf16 %v1692_v27 }
 0x456   :  { %2642 = vmatpush1.bf16.msra.mxu1 %v1929_v45  ;;  %v1699_v45 = vld [vmem:[#allocation9 + $0x290] sm:$0xff] }
 0x457   :  { %3196 = vmatpush3.bf16.msra.mxu0 %v1987_v46  ;;  %2643 = vmatprep.subr.bf16.mxu1 %v1937_v30  ;;  %v1784_v46 = vld [vmem:[#allocation9 + $0x538] sm:$0xff]  ;;  %v1992_v30 = vunpack.c.h.s8.bf16 %v1691_v41  ;;  %v2000_v48 = vunpack.c.l.s8.bf16 %v1699_v45 }
 0x458   :  { %3197 = vmatprep.subr.bf16.mxu0 %v2050_v47  ;;  %v2106_v47 = vunpack.c.h.s8.bf16 %v1749_v43  ;;  %v2176_v59 = vunpack.c.h.s8.bf16 %v1784_v46 }
 0x45a   :  { %2644 = vmatpush1.bf16.msra.mxu1 %v1936_v52  ;;  %v2169_v52 = vunpack.c.l.s8.bf16 %v1784_v46  ;;  %v1726_v46 = vld [vmem:[#allocation9 + $0x368] sm:$0xff] }
 0x45b   :  { %3198 = vmatpush3.bf16.msra.mxu0 %v1994_v55  ;;  %2645 = vmatprep.subr.bf16.mxu1 %v1944_v56  ;;  %v1756_v55 = vld [vmem:[#allocation9 + $0x458] sm:$0xff]  ;;  %v1999_v56 = vunpack.c.l.s8.bf16 %v1698_v49 }
 0x45c   :  { %3199 = vmatprep.subr.bf16.mxu0 %v2057_v19  ;;  %v2113_v57 = vunpack.c.l.s8.bf16 %v1756_v55  ;;  %v2007_v19 = vunpack.c.h.s8.bf16 %v1699_v45 }
 0x45e   :  { %2646 = vmatpush1.bf16.msra.mxu1 %v1943_v60  ;;  %v1706_v60 = vld [vmem:[#allocation9 + $0x2c8] sm:$0xff] }
 0x45f   :  { %3200 = vmatpush3.bf16.msra.mxu0 %v2001_v61  ;;  %2647 = vmatprep.subr.bf16.mxu1 %v1951_v37  ;;  %v1819_v61 = vld [vmem:[#allocation9 + $0x650] sm:$0xff]  ;;  %v2006_v37 = vunpack.c.h.s8.bf16 %v1698_v49  ;;  %v2014_v0 = vunpack.c.l.s8.bf16 %v1706_v60 }
 0x460   :  { %3201 = vmatprep.subr.bf16.mxu0 %v2064_v62  ;;  %v2120_v62 = vunpack.c.h.s8.bf16 %v1756_v55  ;;  %v2246_v7 = vunpack.c.h.s8.bf16 %v1819_v61 }
 0x462   :  { %2648 = vmatpush1.bf16.msra.mxu1 %v1950_v23  ;;  %v2239_v23 = vunpack.c.l.s8.bf16 %v1819_v61 }
 0x463   :  { %3202 = vmatpush3.bf16.msra.mxu0 %v2008_v2  ;;  %2658 = vmatprep.subr.bf16.mxu1 %v1958_v3  ;;  %v1791_v2 = vld [vmem:[#allocation9 + $0x570] sm:$0xff]  ;;  %v2013_v3 = vunpack.c.l.s8.bf16 %v1705_v1 }
 0x464   :  { %3209 = vmatprep.subr.bf16.mxu0 %v2127_v6  ;;  %v2183_v4 = vunpack.c.l.s8.bf16 %v1791_v2  ;;  %v2021_v6 = vunpack.c.h.s8.bf16 %v1706_v60  ;;  %v2190_v14 = vunpack.c.h.s8.bf16 %v1791_v2  ;;  %v1733_v60 = vld [vmem:[#allocation9 + $0x3a0] sm:$0xff] }
 0x465   :  { %2650 = vmatmul.mubr.bf16.vlgmr.msra.gmra.mrb[12].mxu1 %v3835_v58  ;;  %v1971_v58 = vunpack.c.l.s8.bf16 %v1684_v26  ;;  %v2069_v61 = vunpack.c.l.s8.bf16 %v1733_v60 }
 0x466   :  { %2854 = vmatmul.mubr.bf16.vlgmr.msra.gmra.mrb[28].mxu0 %v3852_v50  ;;  %2659 = vmatpush1.bf16.msra.mxu1 %v1957_v8  ;;  %v1713_v8 = vld [vmem:[#allocation9 + $0x300] sm:$0xff] }
 0x467   :  { %2690 = vmatprep.mubr.bf16.mxu1 %v3841_v63  ;;  %3210 = vmatpush3.bf16.msra.mxu0 %v2071_v11  ;;  %v1777_v63 = vld [vmem:[#allocation9 + $0x500] sm:$0xff]  ;;  %v1826_v11 = vld [vmem:[#allocation9 + $0x688] sm:$0xff] }
 0x468   :  { %2893 = vmatprep.mubr.bf16.mxu0 %v3875_v5  ;;  %2660 = vmatprep.subr.bf16.mxu1 %v1965_v13  ;;  %v2155_v42 = vunpack.c.l.s8.bf16 %v1777_v63  ;;  %v2162_v34 = vunpack.c.h.s8.bf16 %v1777_v63  ;;  %v2020_v13 = vunpack.c.h.s8.bf16 %v1705_v1  ;;  %v2260_v28 = vunpack.c.h.s8.bf16 %v1826_v11  ;;  %v1719_v63 = vld [vmem:[#allocation9 + $0x330] sm:$0xff] }
 0x469   :  { %3211 = vmatprep.subr.bf16.mxu0 %v2134_v15  ;;  %v2028_v15 = vunpack.c.l.s8.bf16 %v1713_v8 }
 0x46a   :  { %2661 = vmatpush1.bf16.msra.mxu1 %v1964_v20  ;;  %v2253_v20 = vunpack.c.l.s8.bf16 %v1826_v11 }
 0x46b   :  { %3212 = vmatpush3.bf16.msra.mxu0 %v2078_v22  ;;  %2662 = vmatprep.subr.bf16.mxu1 %v1972_v25  ;;  %v1798_v22 = vld [vmem:[#allocation9 + $0x5a8] sm:$0xff]  ;;  %v2027_v25 = vunpack.c.l.s8.bf16 %v1712_v18 }
 0x46c   :  { %3213 = vmatprep.subr.bf16.mxu0 %v2141_v21  ;;  %v2197_v26 = vunpack.c.l.s8.bf16 %v1798_v22  ;;  %v2035_v21 = vunpack.c.h.s8.bf16 %v1713_v8  ;;  %v1747_v8 = vld [vmem:[#allocation9 + $0x410] sm:$0xff] }
 0x46e   :  { %2663 = vmatpush1.bf16.msra.mxu1 %v1971_v58  ;;  %v1720_v58 = vld [vmem:[#allocation9 + $0x338] sm:$0xff] }
 0x46f   :  { %3214 = vmatpush3.bf16.msra.mxu0 %v2085_v32  ;;  %2664 = vmatprep.subr.bf16.mxu1 %v1979_v35  ;;  %v1833_v32 = vld [vmem:[#allocation9 + $0x6c0] sm:$0xff]  ;;  %v2034_v35 = vunpack.c.h.s8.bf16 %v1712_v18  ;;  %v2042_v27 = vunpack.c.l.s8.bf16 %v1720_v58 }
 0x470   :  { %3215 = vmatprep.subr.bf16.mxu0 %v2148_v36  ;;  %v2204_v36 = vunpack.c.h.s8.bf16 %v1798_v22  ;;  %v2274_v43 = vunpack.c.h.s8.bf16 %v1833_v32  ;;  %v1762_v22 = vld [vmem:[#allocation9 + $0x488] sm:$0xff] }
 0x472   :  { %2665 = vmatpush1.bf16.msra.mxu1 %v1978_v38  ;;  %v2267_v38 = vunpack.c.l.s8.bf16 %v1833_v32  ;;  %v1769_v32 = vld [vmem:[#allocation9 + $0x4c0] sm:$0xff] }
 0x473   :  { %3216 = vmatpush3.bf16.msra.mxu0 %v2092_v39  ;;  %2666 = vmatprep.subr.bf16.mxu1 %v1986_v40  ;;  %v1805_v39 = vld [vmem:[#allocation9 + $0x5e0] sm:$0xff]  ;;  %v2041_v40 = vunpack.c.l.s8.bf16 %v1719_v63 }
 0x474   :  { %3217 = vmatprep.subr.bf16.mxu0 %v2155_v42  ;;  %v2211_v41 = vunpack.c.l.s8.bf16 %v1805_v39  ;;  %v2049_v42 = vunpack.c.h.s8.bf16 %v1720_v58  ;;  %v2133_v58 = vunpack.c.h.s8.bf16 %v1762_v22 }
 0x476   :  { %2667 = vmatpush1.bf16.msra.mxu1 %v1985_v44  ;;  %v1727_v44 = vld [vmem:[#allocation9 + $0x370] sm:$0xff] }
 0x477   :  { %3218 = vmatpush3.bf16.msra.mxu0 %v2099_v53  ;;  %2668 = vmatprep.subr.bf16.mxu1 %v1993_v24  ;;  %v1840_v53 = vld [vmem:[#allocation9 + $0x6f8] sm:$0xff]  ;;  %v2048_v24 = vunpack.c.h.s8.bf16 %v1719_v63  ;;  %v2056_v45 = vunpack.c.l.s8.bf16 %v1727_v44 }
 0x478   :  { %3219 = vmatprep.subr.bf16.mxu0 %v2162_v34  ;;  %v2218_v34 = vunpack.c.h.s8.bf16 %v1805_v39  ;;  %v2288_v55 = vunpack.c.h.s8.bf16 %v1840_v53  ;;  %v1776_v39 = vld [vmem:[#allocation9 + $0x4f8] sm:$0xff] }
 0x47a   :  { %2669 = vmatpush1.bf16.msra.mxu1 %v1992_v30  ;;  %v2281_v30 = vunpack.c.l.s8.bf16 %v1840_v53  ;;  %v1783_v53 = vld [vmem:[#allocation9 + $0x530] sm:$0xff] }
 0x47b   :  { %3220 = vmatpush3.bf16.msra.mxu0 %v2106_v47  ;;  %2670 = vmatprep.subr.bf16.mxu1 %v2000_v48  ;;  %v1812_v47 = vld [vmem:[#allocation9 + $0x618] sm:$0xff]  ;;  %v2055_v48 = vunpack.c.l.s8.bf16 %v1726_v46 }
 0x47c   :  { %3221 = vmatprep.subr.bf16.mxu0 %v2169_v52  ;;  %v2225_v49 = vunpack.c.l.s8.bf16 %v1812_v47  ;;  %v2063_v52 = vunpack.c.h.s8.bf16 %v1727_v44  ;;  %v2161_v44 = vunpack.c.h.s8.bf16 %v1776_v39 }
 0x47e   :  { %2671 = vmatpush1.bf16.msra.mxu1 %v1999_v56  ;;  %v1734_v56 = vld [vmem:[#allocation9 + $0x3a8] sm:$0xff] }
 0x47f   :  { %3222 = vmatpush3.bf16.msra.mxu0 %v2113_v57  ;;  %2672 = vmatprep.subr.bf16.mxu1 %v2007_v19  ;;  %v2062_v57 = vunpack.c.h.s8.bf16 %v1726_v46  ;;  %v2232_v19 = vunpack.c.h.s8.bf16 %v1812_v47  ;;  %v1790_v47 = vld [vmem:[#allocation9 + $0x568] sm:$0xff] }
 0x480   :  { %3223 = vmatprep.subr.bf16.mxu0 %v2176_v59  ;;  %v2070_v59 = vunpack.c.l.s8.bf16 %v1734_v56 }
 0x482   :  { %2673 = vmatpush1.bf16.msra.mxu1 %v2006_v37  ;;  %v2077_v37 = vunpack.c.h.s8.bf16 %v1734_v56  ;;  %v2189_v56 = vunpack.c.h.s8.bf16 %v1790_v47 }
 0x483   :  { %3224 = vmatpush3.bf16.msra.mxu0 %v2120_v62  ;;  %2674 = vmatprep.subr.bf16.mxu1 %v2014_v0  ;;  %v1741_v62 = vld [vmem:[#allocation9 + $0x3e0] sm:$0xff]  ;;  %v2076_v0 = vunpack.c.h.s8.bf16 %v1733_v60  ;;  %v1796_v60 = vld [vmem:[#allocation9 + $0x598] sm:$0xff] }
 0x484   :  { %3231 = vmatprep.subr.bf16.mxu0 %v2239_v23  ;;  %v2084_v1 = vunpack.c.l.s8.bf16 %v1741_v62  ;;  %v1740_v23 = vld [vmem:[#allocation9 + $0x3d8] sm:$0xff] }
 0x485   :  { %v2083_v2 = vunpack.c.l.s8.bf16 %v1740_v23 }
 0x486   :  { %2894 = vmatmul.mubr.bf16.vlgmr.msra.gmra.mrb[32].mxu0 %v3877_v9  ;;  %2675 = vmatpush1.bf16.msra.mxu1 %v2013_v3  ;;  %v2091_v3 = vunpack.c.h.s8.bf16 %v1741_v62  ;;  %v1804_v62 = vld [vmem:[#allocation9 + $0x5d8] sm:$0xff] }
 0x487   :  { %3232 = vmatpush3.bf16.msra.mxu0 %v2183_v4  ;;  %2933 = vmatprep.mubr.bf16.mxu0 %v3881_v16  ;;  %v1748_v4 = vld [vmem:[#allocation9 + $0x418] sm:$0xff] }
 0x488   :  { %2676 = vmatprep.subr.bf16.mxu1 %v2021_v6  ;;  %3233 = vmatprep.subr.bf16.mxu0 %v2246_v7  ;;  %v2090_v6 = vunpack.c.h.s8.bf16 %v1740_v23  ;;  %v2098_v7 = vunpack.c.l.s8.bf16 %v1748_v4  ;;  %v2105_v11 = vunpack.c.h.s8.bf16 %v1748_v4  ;;  %v1803_v23 = vld [vmem:[#allocation9 + $0x5d0] sm:$0xff] }
 0x489   :  { %v1811_v4 = vld [vmem:[#allocation9 + $0x610] sm:$0xff] }
 0x48a   :  { %2677 = vmatpush1.bf16.msra.mxu1 %v2020_v13  ;;  %v1755_v13 = vld [vmem:[#allocation9 + $0x450] sm:$0xff] }
 0x48b   :  { %3234 = vmatpush3.bf16.msra.mxu0 %v2190_v14  ;;  %2678 = vmatprep.subr.bf16.mxu1 %v2028_v15  ;;  %v2112_v14 = vunpack.c.l.s8.bf16 %v1755_v13  ;;  %v1754_v15 = vld [vmem:[#allocation9 + $0x448] sm:$0xff] }
 0x48c   :  { %3235 = vmatprep.subr.bf16.mxu0 %v2253_v20  ;;  %v2111_v18 = vunpack.c.l.s8.bf16 %v1754_v15  ;;  %v2119_v20 = vunpack.c.h.s8.bf16 %v1755_v13 }
 0x48e   :  { %2679 = vmatpush1.bf16.msra.mxu1 %v2027_v25  ;;  %v2118_v25 = vunpack.c.h.s8.bf16 %v1754_v15  ;;  %v1810_v15 = vld [vmem:[#allocation9 + $0x608] sm:$0xff] }
 0x48f   :  { %3236 = vmatpush3.bf16.msra.mxu0 %v2197_v26  ;;  %2680 = vmatprep.subr.bf16.mxu1 %v2035_v21  ;;  %v2126_v26 = vunpack.c.l.s8.bf16 %v1762_v22  ;;  %v1761_v21 = vld [vmem:[#allocation9 + $0x480] sm:$0xff] }
 0x490   :  { %3237 = vmatprep.subr.bf16.mxu0 %v2260_v28  ;;  %v2125_v28 = vunpack.c.l.s8.bf16 %v1761_v21 }
 0x492   :  { %2681 = vmatpush1.bf16.msra.mxu1 %v2034_v35  ;;  %v2132_v35 = vunpack.c.h.s8.bf16 %v1761_v21 }
 0x493   :  { %3238 = vmatpush3.bf16.msra.mxu0 %v2204_v36  ;;  %2682 = vmatprep.subr.bf16.mxu1 %v2042_v27  ;;  %v2140_v36 = vunpack.c.l.s8.bf16 %v1769_v32  ;;  %v1768_v27 = vld [vmem:[#allocation9 + $0x4b8] sm:$0xff] }
 0x494   :  { %3239 = vmatprep.subr.bf16.mxu0 %v2267_v38  ;;  %v2139_v63 = vunpack.c.l.s8.bf16 %v1768_v27  ;;  %v2147_v38 = vunpack.c.h.s8.bf16 %v1769_v32 }
 0x496   :  { %2683 = vmatpush1.bf16.msra.mxu1 %v2041_v40  ;;  %v2146_v40 = vunpack.c.h.s8.bf16 %v1768_v27 }
 0x497   :  { %3240 = vmatpush3.bf16.msra.mxu0 %v2211_v41  ;;  %2684 = vmatprep.subr.bf16.mxu1 %v2049_v42  ;;  %v2154_v41 = vunpack.c.l.s8.bf16 %v1776_v39  ;;  %v1775_v42 = vld [vmem:[#allocation9 + $0x4f0] sm:$0xff] }
 0x498   :  { %3241 = vmatprep.subr.bf16.mxu0 %v2274_v43  ;;  %v2153_v43 = vunpack.c.l.s8.bf16 %v1775_v42 }
 0x49a   :  { %2685 = vmatpush1.bf16.msra.mxu1 %v2048_v24  ;;  %v2160_v24 = vunpack.c.h.s8.bf16 %v1775_v42  ;;  %v1818_v42 = vld [vmem:[#allocation9 + $0x648] sm:$0xff] }
 0x49b   :  { %3242 = vmatpush3.bf16.msra.mxu0 %v2218_v34  ;;  %2686 = vmatprep.subr.bf16.mxu1 %v2056_v45  ;;  %v2168_v34 = vunpack.c.l.s8.bf16 %v1783_v53  ;;  %v1782_v45 = vld [vmem:[#allocation9 + $0x528] sm:$0xff] }
 0x49c   :  { %3243 = vmatprep.subr.bf16.mxu0 %v2281_v30  ;;  %v2167_v46 = vunpack.c.l.s8.bf16 %v1782_v45  ;;  %v2175_v30 = vunpack.c.h.s8.bf16 %v1783_v53 }
 0x49e   :  { %2687 = vmatpush1.bf16.msra.mxu1 %v2055_v48  ;;  %v2174_v48 = vunpack.c.h.s8.bf16 %v1782_v45 }
 0x49f   :  { %3244 = vmatpush3.bf16.msra.mxu0 %v2225_v49  ;;  %2688 = vmatprep.subr.bf16.mxu1 %v2063_v52  ;;  %v2182_v49 = vunpack.c.l.s8.bf16 %v1790_v47  ;;  %v1789_v52 = vld [vmem:[#allocation9 + $0x560] sm:$0xff]  ;;  %v1824_v47 = vld [vmem:[#allocation9 + $0x678] sm:$0xff] }
 0x4a0   :  { %3245 = vmatprep.subr.bf16.mxu0 %v2288_v55  ;;  %v2181_v55 = vunpack.c.l.s8.bf16 %v1789_v52 }
 0x4a2   :  { %2689 = vmatpush1.bf16.msra.mxu1 %v2062_v57  ;;  %v1797_v57 = vld [vmem:[#allocation9 + $0x5a0] sm:$0xff] }
 0x4a3   :  { %3246 = vmatpush3.bf16.msra.mxu0 %v2232_v19  ;;  %2699 = vmatprep.subr.bf16.mxu1 %v2070_v59  ;;  %v2188_v19 = vunpack.c.h.s8.bf16 %v1789_v52  ;;  %v2196_v59 = vunpack.c.l.s8.bf16 %v1797_v57 }
 0x4a5   :  { %2691 = vmatmul.mubr.bf16.vlgmr.msra.gmra.mrb[12].mxu1 %v3852_v50  ;;  %v2097_v50 = vunpack.c.l.s8.bf16 %v1747_v8 }
 0x4a6   :  { %2934 = vmatmul.mubr.bf16.vlgmr.msra.gmra.mrb[36].mxu0 %v3899_v17  ;;  %2700 = vmatpush1.bf16.msra.mxu1 %v2069_v61  ;;  %v2195_v61 = vunpack.c.l.s8.bf16 %v1796_v60 }
 0x4a7   :  { %2731 = vmatprep.mubr.bf16.mxu1 %v3875_v5  ;;  %2701 = vmatprep.subr.bf16.mxu1 %v2077_v37  ;;  %v2104_v5 = vunpack.c.h.s8.bf16 %v1747_v8  ;;  %v2203_v37 = vunpack.c.h.s8.bf16 %v1797_v57 }
 0x4aa   :  { %2702 = vmatpush1.bf16.msra.mxu1 %v2076_v0  ;;  %v2202_v0 = vunpack.c.h.s8.bf16 %v1796_v60  ;;  %v2258_v60 = vunpack.c.h.s8.bf16 %v1824_v47 }
 0x4ab   :  { %2703 = vmatprep.subr.bf16.mxu1 %v2084_v1  ;;  %v2210_v1 = vunpack.c.l.s8.bf16 %v1804_v62 }
 0x4ae   :  { %2704 = vmatpush1.bf16.msra.mxu1 %v2083_v2  ;;  %v2209_v2 = vunpack.c.l.s8.bf16 %v1803_v23 }
 0x4af   :  { %2705 = vmatprep.subr.bf16.mxu1 %v2091_v3  ;;  %v3923_v3 = vld [vmem:[#allocation10] sm:$0xff] }
 0x4b0   :  { %v2990_v13 = vrot.slane %v3923_v3, %v3745_v29  ;;  %v2994_v22 = vrot.slane %v3923_v3, %v3751_v31 }
 0x4b2   :  { %2706 = vmatpush1.bf16.msra.mxu1 %v2090_v6 }
 0x4b3   :  { %2707 = vmatprep.subr.bf16.mxu1 %v2098_v7 }
 0x4b6   :  { %2708 = vmatpush1.bf16.msra.mxu1 %v2097_v50 }
 0x4b7   :  { %2709 = vmatprep.subr.bf16.mxu1 %v2105_v11  ;;  %v2216_v11 = vunpack.c.h.s8.bf16 %v1803_v23 }
 0x4ba   :  { %2710 = vmatpush1.bf16.msra.mxu1 %v2104_v5  ;;  %v2998_v5 = vrot.slane %v3923_v3, %v3778_v51 }
 0x4bb   :  { %2711 = vmatprep.subr.bf16.mxu1 %v2112_v14  ;;  %v2224_v14 = vunpack.c.l.s8.bf16 %v1811_v4 }
 0x4be   :  { %2712 = vmatpush1.bf16.msra.mxu1 %v2111_v18 }
 0x4bf   :  { %2713 = vmatprep.subr.bf16.mxu1 %v2119_v20 }
 0x4c2   :  { %2714 = vmatpush1.bf16.msra.mxu1 %v2118_v25  ;;  %v3002_v25 = vrot.slane %v3923_v3, %v3781_v54 }
 0x4c3   :  { %2715 = vmatprep.subr.bf16.mxu1 %v2126_v26 }
 0x4c6   :  { %2716 = vmatpush1.bf16.msra.mxu1 %v2125_v28 }
 0x4c7   :  { %2717 = vmatprep.subr.bf16.mxu1 %v2133_v58 }
 0x4ca   :  { %2718 = vmatpush1.bf16.msra.mxu1 %v2132_v35 }
 0x4cb   :  { %2719 = vmatprep.subr.bf16.mxu1 %v2140_v36 }
 0x4ce   :  { %2720 = vmatpush1.bf16.msra.mxu1 %v2139_v63 }
 0x4cf   :  { %2721 = vmatprep.subr.bf16.mxu1 %v2147_v38 }
 0x4d2   :  { %2722 = vmatpush1.bf16.msra.mxu1 %v2146_v40  ;;  %v2231_v40 = vunpack.c.h.s8.bf16 %v1811_v4 }
 0x4d3   :  { %2723 = vmatprep.subr.bf16.mxu1 %v2154_v41 }
 0x4d6   :  { %2724 = vmatpush1.bf16.msra.mxu1 %v2153_v43  ;;  %v2238_v43 = vunpack.c.l.s8.bf16 %v1818_v42 }
 0x4d7   :  { %2725 = vmatprep.subr.bf16.mxu1 %v2161_v44  ;;  %v1817_v44 = vld [vmem:[#allocation9 + $0x640] sm:$0xff] }
 0x4d8   :  { %v2237_v53 = vunpack.c.l.s8.bf16 %v1817_v44  ;;  %v2244_v45 = vunpack.c.h.s8.bf16 %v1817_v44  ;;  %v3006_v44 = vrot.slane %v3923_v3, %v3857_v10 }
 0x4da   :  { %2726 = vmatpush1.bf16.msra.mxu1 %v2160_v24  ;;  %v2245_v24 = vunpack.c.h.s8.bf16 %v1818_v42 }
 0x4db   :  { %2727 = vmatprep.subr.bf16.mxu1 %v2168_v34  ;;  %v1825_v34 = vld [vmem:[#allocation9 + $0x680] sm:$0xff] }
 0x4de   :  { %2728 = vmatpush1.bf16.msra.mxu1 %v2167_v46 }
 0x4df   :  { %2729 = vmatprep.subr.bf16.mxu1 %v2175_v30  ;;  %v2252_v30 = vunpack.c.l.s8.bf16 %v1825_v34 }
 0x4e2   :  { %2730 = vmatpush1.bf16.msra.mxu1 %v2174_v48 }
 0x4e3   :  { %2740 = vmatprep.subr.bf16.mxu1 %v2182_v49 }
 0x4e5   :  { %2732 = vmatmul.mubr.bf16.vlgmr.msra.gmra.mrb[12].mxu1 %v3877_v9  ;;  %v3921_v9 = vld [vmem:[%s3975_s9] sm:$0xff] }
 0x4e6   :  { %2741 = vmatpush1.bf16.msra.mxu1 %v2181_v55  ;;  %2772 = vmatprep.mubr.bf16.mxu1 %v3881_v16  ;;  %v2217_v16 = vunpack.c.h.s8.bf16 %v1804_v62  ;;  %v2946_v6 = vrot.slane %v3921_v9, %v3745_v29  ;;  %v2954_v7 = vrot.slane %v3921_v9, %v3778_v51  ;;  %v2950_v8 = vrot.slane %v3921_v9, %v3751_v31 }
 0x4e7   :  { %2742 = vmatprep.subr.bf16.mxu1 %v2189_v56  ;;  %v2958_v50 = vrot.slane %v3921_v9, %v3781_v54  ;;  %v2223_v51 = vunpack.c.l.s8.bf16 %v1810_v15  ;;  %v2230_v54 = vunpack.c.h.s8.bf16 %v1810_v15  ;;  %v2251_v56 = vunpack.c.l.s8.bf16 %v1824_v47 }
 0x4ea   :  { %2743 = vmatpush1.bf16.msra.mxu1 %v2188_v19  ;;  %v2259_v19 = vunpack.c.h.s8.bf16 %v1825_v34 }
 0x4eb   :  { %2744 = vmatprep.subr.bf16.mxu1 %v2196_v59  ;;  %v1832_v59 = vld [vmem:[#allocation9 + $0x6b8] sm:$0xff] }
 0x4ee   :  { %2745 = vmatpush1.bf16.msra.mxu1 %v2195_v61  ;;  %v2266_v61 = vunpack.c.l.s8.bf16 %v1832_v59 }
 0x4ef   :  { %2746 = vmatprep.subr.bf16.mxu1 %v2203_v37  ;;  %v1831_v37 = vld [vmem:[#allocation9 + $0x6b0] sm:$0xff] }
 0x4f0   :  { %v2265_v62 = vunpack.c.l.s8.bf16 %v1831_v37  ;;  %v2272_v23 = vunpack.c.h.s8.bf16 %v1831_v37 }
 0x4f2   :  { %2747 = vmatpush1.bf16.msra.mxu1 %v2202_v0  ;;  %v2273_v0 = vunpack.c.h.s8.bf16 %v1832_v59 }
 0x4f3   :  { %2748 = vmatprep.subr.bf16.mxu1 %v2210_v1  ;;  %v1839_v1 = vld [vmem:[#allocation9 + $0x6f0] sm:$0xff] }
 0x4f6   :  { %2749 = vmatpush1.bf16.msra.mxu1 %v2209_v2  ;;  %v2280_v2 = vunpack.c.l.s8.bf16 %v1839_v1 }
 0x4f7   :  { %2750 = vmatprep.subr.bf16.mxu1 %v2217_v16  ;;  %v1838_v16 = vld [vmem:[#allocation9 + $0x6e8] sm:$0xff] }
 0x4f8   :  { %v2446_v18 = vpop.f32.mrb[8].mxu1  ;;  %v2610_v20 = vpop.f32.mrb[20].mxu0 }
 0x4f9   :  { %v2978_v26 = vmul.f32 %v2946_v6, %v2446_v18  ;;  %v2980_v21 = vmul.f32 %v2954_v7, %v2610_v20  ;;  %v2448_v28 = vpop.f32.mrb[9].mxu1  ;;  %v2612_v58 = vpop.f32.mrb[21].mxu0  ;;  %v2279_v7 = vunpack.c.l.s8.bf16 %v1838_v16 }
 0x4fa   :  { %v2979_v32 = vmul.f32 %v2950_v8, %v2448_v28  ;;  %v2981_v29 = vmul.f32 %v2958_v50, %v2612_v58  ;;  %v2450_v35 = vpop.f32.mrb[10].mxu1  ;;  %v2614_v36 = vpop.f32.mrb[22].mxu0  ;;  %2751 = vmatpush1.bf16.msra.mxu1 %v2216_v11  ;;  %v2287_v11 = vunpack.c.h.s8.bf16 %v1839_v1 }
 0x4fb   :  { %v3022_v27 = vadd.f32 %v2990_v13, %v2978_v26  ;;  %v3024_v63 = vadd.f32 %v2998_v5, %v2980_v21  ;;  %v2451_v38 = vpop.f32.mrb[11].mxu1  ;;  %v2615_v39 = vpop.f32.mrb[23].mxu0  ;;  %2752 = vmatprep.subr.bf16.mxu1 %v2224_v14  ;;  %v2286_v5 = vunpack.c.h.s8.bf16 %v1838_v16 }
 0x4fc   :  { %v3023_v31 = vadd.f32 %v2994_v22, %v2979_v32  ;;  %v3025_v41 = vadd.f32 %v3002_v25, %v2981_v29  ;;  %v3014_v39 = vrot.slane %v3923_v3, %v3888_v33 }
 0x4fd   :  { %3436 = vtanh.f32 %v3022_v27  ;;  %v2970_v27 = vrot.slane %v3921_v9, %v3888_v33  ;;  %v3010_v33 = vrot.slane %v3923_v3, %v3860_v12 }
 0x4fe   :  { %3438 = vtanh.f32 %v3024_v63  ;;  %2753 = vmatpush1.bf16.msra.mxu1 %v2223_v51 }
 0x4ff   :  { %3440 = vtanh.f32 %v3023_v31  ;;  %2754 = vmatprep.subr.bf16.mxu1 %v2231_v40 }
 0x500   :  { %3442 = vtanh.f32 %v3025_v41 }
 0x502   :  { %2755 = vmatpush1.bf16.msra.mxu1 %v2230_v54  ;;  %v2962_v54 = vrot.slane %v3921_v9, %v3857_v10 }
 0x503   :  { %2756 = vmatprep.subr.bf16.mxu1 %v2238_v43  ;;  %v2966_v43 = vrot.slane %v3921_v9, %v3860_v12 }
 0x506   :  { %2757 = vmatpush1.bf16.msra.mxu1 %v2237_v53 }
 0x507   :  { %v3437_v46 = vpop.eup %3436  ;;  %2758 = vmatprep.subr.bf16.mxu1 %v2245_v24 }
 0x508   :  { %v3439_v48 = vpop.eup %3438 }
 0x509   :  { %v3441_v49 = vpop.eup %3440 }
 0x50a   :  { %v3443_v52 = vpop.eup %3442  ;;  %v3161_v55 = vpack.c.bf16 %v3441_v49, %v3437_v46  ;;  %2759 = vmatpush1.bf16.msra.mxu1 %v2244_v45 }
 0x50b   :  { %v3162_v57 = vpack.c.bf16 %v3443_v52, %v3439_v48  ;;  %2760 = vmatprep.subr.bf16.mxu1 %v2252_v30 }
 0x50c   :  { %3065 = vst [vmem:[%s3977_s11] sm:$0xff] %v3161_v55 }
 0x50d   :  { %3066 = vst [vmem:[%s3977_s11 + $0x8] sm:$0xff] %v3162_v57 }
 0x50e   :  { %2761 = vmatpush1.bf16.msra.mxu1 %v2251_v56 }
 0x50f   :  { %2762 = vmatprep.subr.bf16.mxu1 %v2259_v19 }
 0x512   :  { %2763 = vmatpush1.bf16.msra.mxu1 %v2258_v60 }
 0x513   :  { %2764 = vmatprep.subr.bf16.mxu1 %v2266_v61 }
 0x516   :  { %2765 = vmatpush1.bf16.msra.mxu1 %v2265_v62 }
 0x517   :  { %2766 = vmatprep.subr.bf16.mxu1 %v2273_v0 }
 0x519   :  { %v3181_v4 = vpop.f32.mrb[24].mxu0 }
 0x51a   :  { %v3182_v6 = vpop.f32.mrb[25].mxu0  ;;  %2767 = vmatpush1.bf16.msra.mxu1 %v2272_v23 }
 0x51b   :  { %v3183_v8 = vadd.f32 %v3182_v6, %v3181_v4  ;;  %v3184_v50 = vpop.f32.mrb[26].mxu0  ;;  %2768 = vmatprep.subr.bf16.mxu1 %v2280_v2 }
 0x51c   :  { %v3185_v13 = vpop.f32.mrb[27].mxu0 }
 0x51e   :  { %2769 = vmatpush1.bf16.msra.mxu1 %v2279_v7 }
 0x51f   :  { %2770 = vmatprep.subr.bf16.mxu1 %v2287_v11 }
 0x522   :  { %2771 = vmatpush1.bf16.msra.mxu1 %v2286_v5 }
 0x525   :  { %2773 = vmatmul.mubr.bf16.vlgmr.msra.gmra.mrb[12].mxu1 %v3899_v17 }
 0x539   :  { %v3203_v14 = vpop.f32.mrb[28].mxu0 }
 0x53a   :  { %v3204_v15 = vpop.f32.mrb[29].mxu0 }
 0x53b   :  { %v3205_v18 = vadd.f32 %v3204_v15, %v3203_v14  ;;  %v3206_v20 = vpop.f32.mrb[30].mxu0 }
 0x53c   :  { %v3207_v22 = vpop.f32.mrb[31].mxu0 }
 0x53d   :  { %v2856_v25 = vadd.f32 %v3205_v18, %v3183_v8 }
 0x559   :  { %v3225_v26 = vpop.f32.mrb[32].mxu0 }
 0x55a   :  { %v3226_v21 = vpop.f32.mrb[33].mxu0 }
 0x55b   :  { %v3227_v28 = vadd.f32 %v3226_v21, %v3225_v26  ;;  %v3228_v58 = vpop.f32.mrb[34].mxu0 }
 0x55c   :  { %v3229_v32 = vpop.f32.mrb[35].mxu0 }
 0x55d   :  { %v2896_v29 = vadd.f32 %v3227_v28, %v2856_v25 }
 0x579   :  { %v3247_v35 = vpop.f32.mrb[36].mxu0 }
 0x57a   :  { %v3248_v36 = vpop.f32.mrb[37].mxu0 }
 0x57b   :  { %v3249_v51 = vadd.f32 %v3248_v36, %v3247_v35  ;;  %v3250_v63 = vpop.f32.mrb[38].mxu0 }
 0x57c   :  { %v3251_v17 = vpop.f32.mrb[39].mxu0 }
 0x57d   :  { %v2936_v38 = vadd.f32 %v3249_v51, %v2896_v29 }
 0x57f   :  { %v2984_v40 = vmul.f32 %v2970_v27, %v2936_v38 }
 0x581   :  { %v3028_v31 = vadd.f32 %v3014_v39, %v2984_v40 }
 0x583   :  { %3444 = vtanh.f32 %v3028_v31 }
 0x58d   :  { %v3445_v41 = vpop.eup %3444 }
 0x58e   :  { %v3164_v42 = vpack.c.bf16 %v3445_v41, %v3445_v41 }
 0x590   :  { %3068 = vst [vmem:[%s3977_s11 + $0x18] sm:$0xf] %v3164_v42 }
 0x5f8   :  { %v2774_v53 = vpop.f32.mrb[12].mxu1 }
 0x5f9   :  { %v2982_v24 = vmul.f32 %v2962_v54, %v2774_v53  ;;  %v2776_v34 = vpop.f32.mrb[13].mxu1 }
 0x5fa   :  { %v2983_v45 = vmul.f32 %v2966_v43, %v2776_v34  ;;  %v2778_v46 = vpop.f32.mrb[14].mxu1 }
 0x5fb   :  { %v3026_v30 = vadd.f32 %v3006_v44, %v2982_v24  ;;  %v2779_v47 = vpop.f32.mrb[15].mxu1 }
 0x5fc   :  { %v3027_v48 = vadd.f32 %v3010_v33, %v2983_v45 }
 0x5fd   :  { %3446 = vtanh.f32 %v3026_v30 }
 0x5fe   :  { %3448 = vtanh.f32 %v3027_v48 }
 0x607   :  { %v3447_v49 = vpop.eup %3446 }
 0x608   :  { %v3449_v52 = vpop.eup %3448 }
 0x609   :  { %v3163_v55 = vpack.c.bf16 %v3449_v52, %v3447_v49 }
 0x60b   :  { %3067 = vst [vmem:[%s3977_s11 + $0x10] sm:$0xff] %v3163_v55 }
 0x60c   :  { %3073 = vsyncpa [#allocation3], 1 }
 0x60d   :  { %3074 = vsyncpa [#allocation5], 1 }
 0x60e   :  { %3075 = vsyncpa [#allocation8], 1 }
 0x60f   :  { %3076 = vsyncpa [#allocation11], 1 }

</bundles_post_ra>
